<compile_context>
chip_gen: v5e
topology: v5e:2x2
jax: 0.10.0
libtpu: 0.0.40
codegen_flags: <defaults>
</compile_context>

<pallas_src>
import math
from functools import partial

import jax
import jax.numpy as jnp
from jax import lax
from jax.experimental import pallas as pl
from jax.experimental.pallas import tpu as pltpu

_LN_EPS = 1e-5


def _round_up(x, m):
    return ((x + m - 1) // m) * m


def _const_index_map(ndim):
    return lambda i, _n=ndim: (0,) * _n


# ------------------------- PyTorch-equivalent parameter init -----------------

def init_h_net_0_params(key, *, hyper_in_ch, hyper_num_hidden_layers,
                        hyper_hidden_ch, hidden_ch, num_hidden_layers,
                        in_ch, out_ch, dtype=jnp.float32):
    """kaiming_normal(fan_in, gain=sqrt(2)) weights, uniform(+-1/sqrt(fan_in))
    biases; the last hyper-layer weight is scaled by 0.1 (last_hyper_layer_init)."""

    def kaiming(k, fan_out, fan_in, scale=1.0):
        return (jax.random.normal(k, (fan_out, fan_in), dtype)
                * (math.sqrt(2.0 / fan_in) * scale))

    def bias_init(k, fan_out, fan_in):
        lim = 1.0 / math.sqrt(fan_in)
        return jax.random.uniform(k, (fan_out,), dtype, -lim, lim)

    target_dims = ([(in_ch, hidden_ch)]
                   + [(hidden_ch, hidden_ch)] * num_hidden_layers
                   + [(hidden_ch, out_ch)])                    # outermost_linear=True
    hyper_dims = ([(hyper_in_ch, hyper_hidden_ch)]
                  + [(hyper_hidden_ch, hyper_hidden_ch)] * hyper_num_hidden_layers)

    layers = []
    for (t_in, t_out) in target_dims:
        fc = []
        for (f_in, f_out) in hyper_dims:
            key, kw, kb = jax.random.split(key, 3)
            fc.append((kaiming(kw, f_out, f_in), bias_init(kb, f_out, f_in)))
        n_out = t_in * t_out + t_out
        key, kw, kb = jax.random.split(key, 3)
        last = (kaiming(kw, n_out, hyper_hidden_ch, scale=0.1),
                bias_init(kb, n_out, hyper_hidden_ch))
        layers.append(dict(fc=fc, last=last, t_in=t_in, t_out=t_out))
    return layers


# ----------------- one-time parameter preparation (hoisted work) -------------

def prepare_h_net_0(params, *, param_dtype=jnp.float32):
    """Re-layout hyper params ONCE for the fused kernel.

    Returns (meta, arrays):
      arrays["wfc"][j] : (L, Hh, in_j)      stacked tanh-FC weights (all target layers)
      arrays["bfc"][j] : (L, 1, Hh)         stacked tanh-FC biases (f32)
      arrays["wl3"][l] : (t_in, t_out*, Hh) last-FC weight rows for W_pred, by input col
      arrays["blw"][l] : (t_in, 1, t_out*)  last-FC bias entries for W_pred, by input col
      arrays["wlb"][l] : (t_out*, Hh)       last-FC weight rows for b_pred
      arrays["blb"][l] : (1, t_out*)        last-FC bias entries for b_pred
    where t_out* == t_out for hidden layers and round_up(out_ch, 128) for the
    last layer (zero-padded), so the kernel's final store is lane-dense.
    param_dtype=jnp.bfloat16 is valid on v5e/v6e/v7x; accumulation stays f32.
    """
    L = len(params)
    n_fc = len(params[0]["fc"])
    hh = params[0]["fc"][0][0].shape[0]
    hyper_in = params[0]["fc"][0][0].shape[1]
    t_dims = tuple((int(p["t_in"]), int(p["t_out"])) for p in params)
    outp = _round_up(t_dims[-1][1], 128)

    wfc, bfc = [], []
    for j in range(n_fc):
        wfc.append(jnp.stack([params[l]["fc"][j][0] for l in range(L)])
                   .astype(param_dtype))                                   # (L, Hh, in_j)
        bfc.append(jnp.stack([params[l]["fc"][j][1] for l in range(L)])
                   .reshape(L, 1, hh).astype(jnp.float32))                 # (L, 1, Hh)

    wl3, blw, wlb, blb = [], [], [], []
    for l, (t_in, t_out) in enumerate(t_dims):
        w_last, b_last = params[l]["last"]
        t_out_eff = t_out if l < L - 1 else outp
        ww = w_last[: t_in * t_out].reshape(t_out, t_in, hh)
        bw = b_last[: t_in * t_out].reshape(t_out, t_in)
        wb = w_last[t_in * t_out:]
        bb = b_last[t_in * t_out:]
        pad = t_out_eff - t_out
        if pad:
            ww = jnp.pad(ww, ((0, pad), (0, 0), (0, 0)))
            bw = jnp.pad(bw, ((0, pad), (0, 0)))
            wb = jnp.pad(wb, ((0, pad), (0, 0)))
            bb = jnp.pad(bb, ((0, pad),))
        wl3.append(jnp.transpose(ww, (1, 0, 2)).astype(param_dtype))        # (t_in, t_out*, Hh)
        blw.append(jnp.transpose(bw, (1, 0)).reshape(t_in, 1, t_out_eff)
                   .astype(jnp.float32))                                    # (t_in, 1, t_out*)
        wlb.append(wb.astype(param_dtype))                                  # (t_out*, Hh)
        blb.append(bb.reshape(1, t_out_eff).astype(jnp.float32))            # (1, t_out*)

    meta = dict(L=L, n_fc=n_fc, hh=hh, hyper_in=hyper_in, t_dims=t_dims, outp=outp)
    arrays = dict(wfc=wfc, bfc=bfc, wl3=wl3, blw=blw, wlb=wlb, blb=blb)
    return meta, arrays


# ------------------------------- fused kernel --------------------------------

def _fused_kernel(*refs, meta):
    L, n_fc = meta["L"], meta["n_fc"]
    t_dims = meta["t_dims"]

    it = iter(refs)
    h0_ref = next(it)
    x_ref = next(it)
    wfc_refs = [next(it) for _ in range(n_fc)]
    bfc_refs = [next(it) for _ in range(n_fc)]
    wl3_refs = [next(it) for _ in range(L)]
    blw_refs = [next(it) for _ in range(L)]
    wlb_refs = [next(it) for _ in range(L)]
    blb_refs = [next(it) for _ in range(L)]
    o_ref = next(it)

    pdt = wfc_refs[0].dtype                       # MXU operand dtype (f32 or bf16)
    dn = (((1,), (1,)), ((), ()))                 # contract dim 1 of both (no HBM transpose)

    h0 = h0_ref[...].astype(pdt)                  # (TB, hyper_in)
    h_cur = x_ref[...].astype(jnp.float32)        # (TB, in_ch) running activation

    for l in range(L):                            # static unroll over target layers
        t_in, t_out = t_dims[l]

        # --- hypernetwork tanh-FC stack for target layer l ---
        z = h0
        for j in range(n_fc):
            acc = lax.dot_general(z, wfc_refs[j][l], dn,
                                  preferred_element_type=jnp.float32)
            z = jnp.tanh(acc + bfc_refs[j][l]).astype(pdt)     # (TB, Hh)

        # --- fused last hyper FC + per-sample BatchLinear (W_pred never formed) ---
        # predicted bias contribution
        y = lax.dot_general(z, wlb_refs[l][...], dn,
                            preferred_element_type=jnp.float32) + blb_refs[l][...]
        # predicted weight columns, contracted against the running activation
        for i in range(t_in):
            col = lax.dot_general(z, wl3_refs[l][i], dn,
                                  preferred_element_type=jnp.float32) + blw_refs[l][i]
            y = y + h_cur[:, i:i + 1] * col        # (TB, t_out_eff)

        if l < L - 1:   # LayerNorm (no affine, eps=1e-5) + tanh on hidden layers
            mean = jnp.mean(y, axis=-1, keepdims=True)
            var = jnp.mean((y - mean) ** 2, axis=-1, keepdims=True)
            y = jnp.tanh((y - mean) * lax.rsqrt(var + _LN_EPS))

        h_cur = y

    o_ref[...] = h_cur.astype(o_ref.dtype)        # lane-dense (TB, outp) store


# ------------------------------ forward wrapper ------------------------------

def h_net_0_forward(meta, arrays, h0, x, *, block_b=128):
    """Pallas implementation of H_Net_0.forward(h_0, x) as one fused call."""
    B = x.shape[0]
    L, n_fc = meta["L"], meta["n_fc"]
    hh, hyper_in = meta["hh"], meta["hyper_in"]
    t_dims, outp = meta["t_dims"], meta["outp"]
    in_ch = t_dims[0][0]
    out_ch = t_dims[-1][1]
    assert h0.shape == (B, hyper_in) and x.shape == (B, in_ch)

    # batch blocking (TB samples per grid step)
    tb = min(block_b, _round_up(B, 8))
    bp = _round_up(B, tb)
    h0p = jnp.pad(h0, ((0, bp - B), (0, 0)))
    xp = jnp.pad(x, ((0, bp - B), (0, 0)))

    operands = [h0p, xp]
    in_specs = [pl.BlockSpec((tb, hyper_in), lambda i: (i, 0)),
                pl.BlockSpec((tb, in_ch), lambda i: (i, 0))]
    for name in ("wfc", "bfc", "wl3", "blw", "wlb", "blb"):
        for a in arrays[name]:
            operands.append(a)
            in_specs.append(pl.BlockSpec(a.shape, _const_index_map(a.ndim)))

    # advisory cost estimate
    flops, trans = 0, 0
    fc_in = [hyper_in] + [hh] * (n_fc - 1)
    for l, (t_in, t_out) in enumerate(t_dims):
        t_out_eff = t_out if l < L - 1 else outp
        flops += bp * (sum(2 * hh * k for k in fc_in)
                       + 2 * hh * t_out_eff * (t_in + 1) + 2 * t_in * t_out_eff)
        trans += bp * (n_fc * hh + (t_out if l < L - 1 else 0))
    bytes_acc = (sum(int(o.size) * o.dtype.itemsize for o in operands)
                 + bp * outp * 4)

    # VMEM budget: params + double-buffered I/O blocks, clamped to [32, 64] MiB
    param_bytes = sum(int(o.size) * o.dtype.itemsize for o in operands[2:])
    io_bytes = tb * (hyper_in + in_ch + outp) * 4
    vmem_limit = int(min(64 << 20, max(32 << 20, 4 * (param_bytes + io_bytes))))

    out = pl.pallas_call(
        partial(_fused_kernel, meta=meta),
        out_shape=jax.ShapeDtypeStruct((bp, outp), jnp.float32),
        grid_spec=pltpu.PrefetchScalarGridSpec(
            num_scalar_prefetch=0,
            grid=(bp // tb,),
            in_specs=in_specs,
            out_specs=pl.BlockSpec((tb, outp), lambda i: (i, 0)),
        ),
        compiler_params=pltpu.CompilerParams(
            dimension_semantics=("parallel",),
            vmem_limit_bytes=vmem_limit),
        cost_estimate=pl.CostEstimate(flops=int(flops),
                                      transcendentals=int(trans),
                                      bytes_accessed=int(bytes_acc)),
    )(*operands)

    return out[:B, :out_ch]


# ---------------------------- pure-JAX reference -----------------------------

def h_net_0_reference(params, h0, x):
    bsz = x.shape[0]
    h = x
    n_layers = len(params)
    for idx, layer in enumerate(params):
        z = h0
        for (w, b) in layer["fc"]:
            z = jnp.tanh(z @ w.T + b)
        w_last, b_last = layer["last"]
        z = z @ w_last.T + b_last
        t_in, t_out = layer["t_in"], layer["t_out"]
        w_pred = z[:, : t_in * t_out].reshape(bsz, t_out, t_in)
        b_pred = z[:, t_in * t_out: t_in * t_out + t_out]
        y = jnp.einsum("bi,boi->bo", h, w_pred) + b_pred
        if idx != n_layers - 1:
            mean = jnp.mean(y, axis=-1, keepdims=True)
            var = jnp.mean((y - mean) ** 2, axis=-1, keepdims=True)
            y = jnp.tanh((y - mean) / jnp.sqrt(var + _LN_EPS))
        h = y
    return h


if __name__ == "__main__":
    key = jax.random.PRNGKey(0)
    k_p, k_h, k_x = jax.random.split(key, 3)

    # Small shapes consistent with the module.
    batch = 2
    hyper_in_ch, hyper_num_hidden_layers, hyper_hidden_ch = 8, 1, 32
    hidden_ch, num_hidden_layers, in_ch, out_ch = 16, 1, 4, 4

    params = init_h_net_0_params(
        k_p, hyper_in_ch=hyper_in_ch,
        hyper_num_hidden_layers=hyper_num_hidden_layers,
        hyper_hidden_ch=hyper_hidden_ch, hidden_ch=hidden_ch,
        num_hidden_layers=num_hidden_layers, in_ch=in_ch, out_ch=out_ch)

    # One-time parameter preparation (padding/stacking/casting hoisted out of
    # the forward). param_dtype=jnp.bfloat16 is also fine on v5e/v6e/v7x.
    meta, arrays = prepare_h_net_0(params, param_dtype=jnp.float32)

    h0 = jax.random.normal(k_h, (batch, hyper_in_ch), dtype=jnp.float32)
    x = jax.random.normal(k_x, (batch, in_ch), dtype=jnp.float32)

    y = h_net_0_forward(meta, arrays, h0, x)
    jax.block_until_ready(y)

    y_ref = h_net_0_reference(params, h0, x)
    assert y.shape == (batch, out_ch), y.shape
    err = float(jnp.max(jnp.abs(y - y_ref)))
    assert jnp.allclose(y, y_ref, atol=1e-4, rtol=1e-4), err

    print("KERNEL_OK")
</pallas_src>

<mosaic_0001>
module attributes {stable_mosaic.version = 11 : i64} {
  func.func @_fused_kernel(%arg0: i32, %arg1: memref<8x8xf32, #tpu.memory_space<vmem>>, %arg2: memref<8x4xf32, #tpu.memory_space<vmem>>, %arg3: memref<3x32x8xf32, #tpu.memory_space<vmem>>, %arg4: memref<3x32x32xf32, #tpu.memory_space<vmem>>, %arg5: memref<3x1x32xf32, #tpu.memory_space<vmem>>, %arg6: memref<3x1x32xf32, #tpu.memory_space<vmem>>, %arg7: memref<4x16x32xf32, #tpu.memory_space<vmem>>, %arg8: memref<16x16x32xf32, #tpu.memory_space<vmem>>, %arg9: memref<16x128x32xf32, #tpu.memory_space<vmem>>, %arg10: memref<4x1x16xf32, #tpu.memory_space<vmem>>, %arg11: memref<16x1x16xf32, #tpu.memory_space<vmem>>, %arg12: memref<16x1x128xf32, #tpu.memory_space<vmem>>, %arg13: memref<16x32xf32, #tpu.memory_space<vmem>>, %arg14: memref<16x32xf32, #tpu.memory_space<vmem>>, %arg15: memref<128x32xf32, #tpu.memory_space<vmem>>, %arg16: memref<1x16xf32, #tpu.memory_space<vmem>>, %arg17: memref<1x16xf32, #tpu.memory_space<vmem>>, %arg18: memref<1x128xf32, #tpu.memory_space<vmem>>, %arg19: memref<8x128xf32, #tpu.memory_space<vmem>>) attributes {dimension_semantics = [#tpu.dimension_semantics<parallel>], iteration_bounds = array<i64: 1>, scalar_prefetch = 0 : i64, scratch_operands = 0 : i64, tpu.core_type = #tpu.core_type<tc>, window_params = [{transform_indices = @transform_0, window_bounds = array<i64: 8, 8>}, {transform_indices = @transform_1, window_bounds = array<i64: 8, 4>}, {pipeline_mode = #tpu.pipeline_mode<synchronous>, transform_indices = @transform_2, window_bounds = array<i64: 3, 32, 8>}, {pipeline_mode = #tpu.pipeline_mode<synchronous>, transform_indices = @transform_3, window_bounds = array<i64: 3, 32, 32>}, {pipeline_mode = #tpu.pipeline_mode<synchronous>, transform_indices = @transform_4, window_bounds = array<i64: 3, 1, 32>}, {pipeline_mode = #tpu.pipeline_mode<synchronous>, transform_indices = @transform_5, window_bounds = array<i64: 3, 1, 32>}, {pipeline_mode = #tpu.pipeline_mode<synchronous>, transform_indices = @transform_6, window_bounds = array<i64: 4, 16, 32>}, {pipeline_mode = #tpu.pipeline_mode<synchronous>, transform_indices = @transform_7, window_bounds = array<i64: 16, 16, 32>}, {pipeline_mode = #tpu.pipeline_mode<synchronous>, transform_indices = @transform_8, window_bounds = array<i64: 16, 128, 32>}, {pipeline_mode = #tpu.pipeline_mode<synchronous>, transform_indices = @transform_9, window_bounds = array<i64: 4, 1, 16>}, {pipeline_mode = #tpu.pipeline_mode<synchronous>, transform_indices = @transform_10, window_bounds = array<i64: 16, 1, 16>}, {pipeline_mode = #tpu.pipeline_mode<synchronous>, transform_indices = @transform_11, window_bounds = array<i64: 16, 1, 128>}, {pipeline_mode = #tpu.pipeline_mode<synchronous>, transform_indices = @transform_12, window_bounds = array<i64: 16, 32>}, {pipeline_mode = #tpu.pipeline_mode<synchronous>, transform_indices = @transform_13, window_bounds = array<i64: 16, 32>}, {pipeline_mode = #tpu.pipeline_mode<synchronous>, transform_indices = @transform_14, window_bounds = array<i64: 128, 32>}, {pipeline_mode = #tpu.pipeline_mode<synchronous>, transform_indices = @transform_15, window_bounds = array<i64: 1, 16>}, {pipeline_mode = #tpu.pipeline_mode<synchronous>, transform_indices = @transform_16, window_bounds = array<i64: 1, 16>}, {pipeline_mode = #tpu.pipeline_mode<synchronous>, transform_indices = @transform_17, window_bounds = array<i64: 1, 128>}, {transform_indices = @transform_18, window_bounds = array<i64: 8, 128>}]} {
    %c0 = arith.constant 0 : index
    %c0_0 = arith.constant 0 : index
    %0 = vector.load %arg1[%c0, %c0_0] : memref<8x8xf32, #tpu.memory_space<vmem>>, vector<8x8xf32>
    %c0_1 = arith.constant 0 : index
    %c0_2 = arith.constant 0 : index
    %1 = vector.load %arg2[%c0_1, %c0_2] : memref<8x4xf32, #tpu.memory_space<vmem>>, vector<8x4xf32>
    %c0_3 = arith.constant 0 : index
    %c0_4 = arith.constant 0 : index
    %c0_5 = arith.constant 0 : index
    %2 = vector.load %arg3[%c0_3, %c0_4, %c0_5] : memref<3x32x8xf32, #tpu.memory_space<vmem>>, vector<1x32x8xf32>
    %3 = vector.shape_cast %2 : vector<1x32x8xf32> to vector<32x8xf32>
    %cst = arith.constant dense<0.000000e+00> : vector<8x32xf32>
    %4 = tpu.matmul %0, %3, %cst {dimension_numbers = #tpu.dot_dimension_numbers<[1], [1], [0], [0], [0, 0, 1, 0], [], []>} : vector<8x8xf32>, vector<32x8xf32>, vector<8x32xf32> -> vector<8x32xf32>
    %c0_6 = arith.constant 0 : index
    %c0_7 = arith.constant 0 : index
    %c0_8 = arith.constant 0 : index
    %5 = vector.load %arg5[%c0_6, %c0_7, %c0_8] : memref<3x1x32xf32, #tpu.memory_space<vmem>>, vector<1x1x32xf32>
    %6 = vector.shape_cast %5 : vector<1x1x32xf32> to vector<1x32xf32>
    %7 = vector.broadcast %6 : vector<1x32xf32> to vector<8x32xf32>
    %8 = arith.addf %4, %7 : vector<8x32xf32>
    %9 = math.tanh %8 : vector<8x32xf32>
    %c0_9 = arith.constant 0 : index
    %c0_10 = arith.constant 0 : index
    %c0_11 = arith.constant 0 : index
    %10 = vector.load %arg4[%c0_9, %c0_10, %c0_11] : memref<3x32x32xf32, #tpu.memory_space<vmem>>, vector<1x32x32xf32>
    %11 = vector.shape_cast %10 : vector<1x32x32xf32> to vector<32x32xf32>
    %cst_12 = arith.constant dense<0.000000e+00> : vector<8x32xf32>
    %12 = tpu.matmul %9, %11, %cst_12 {dimension_numbers = #tpu.dot_dimension_numbers<[1], [1], [0], [0], [0, 0, 1, 0], [], []>} : vector<8x32xf32>, vector<32x32xf32>, vector<8x32xf32> -> vector<8x32xf32>
    %c0_13 = arith.constant 0 : index
    %c0_14 = arith.constant 0 : index
    %c0_15 = arith.constant 0 : index
    %13 = vector.load %arg6[%c0_13, %c0_14, %c0_15] : memref<3x1x32xf32, #tpu.memory_space<vmem>>, vector<1x1x32xf32>
    %14 = vector.shape_cast %13 : vector<1x1x32xf32> to vector<1x32xf32>
    %15 = vector.broadcast %14 : vector<1x32xf32> to vector<8x32xf32>
    %16 = arith.addf %12, %15 : vector<8x32xf32>
    %17 = math.tanh %16 : vector<8x32xf32>
    %c0_16 = arith.constant 0 : index
    %c0_17 = arith.constant 0 : index
    %18 = vector.load %arg13[%c0_16, %c0_17] : memref<16x32xf32, #tpu.memory_space<vmem>>, vector<16x32xf32>
    %cst_18 = arith.constant dense<0.000000e+00> : vector<8x16xf32>
    %19 = tpu.matmul %17, %18, %cst_18 {dimension_numbers = #tpu.dot_dimension_numbers<[1], [1], [0], [0], [0, 0, 1, 0], [], []>} : vector<8x32xf32>, vector<16x32xf32>, vector<8x16xf32> -> vector<8x16xf32>
    %c0_19 = arith.constant 0 : index
    %c0_20 = arith.constant 0 : index
    %20 = vector.load %arg16[%c0_19, %c0_20] : memref<1x16xf32, #tpu.memory_space<vmem>>, vector<1x16xf32>
    %21 = vector.broadcast %20 : vector<1x16xf32> to vector<8x16xf32>
    %22 = arith.addf %19, %21 : vector<8x16xf32>
    %c0_21 = arith.constant 0 : index
    %c0_22 = arith.constant 0 : index
    %c0_23 = arith.constant 0 : index
    %23 = vector.load %arg7[%c0_21, %c0_22, %c0_23] : memref<4x16x32xf32, #tpu.memory_space<vmem>>, vector<1x16x32xf32>
    %24 = vector.shape_cast %23 : vector<1x16x32xf32> to vector<16x32xf32>
    %cst_24 = arith.constant dense<0.000000e+00> : vector<8x16xf32>
    %25 = tpu.matmul %17, %24, %cst_24 {dimension_numbers = #tpu.dot_dimension_numbers<[1], [1], [0], [0], [0, 0, 1, 0], [], []>} : vector<8x32xf32>, vector<16x32xf32>, vector<8x16xf32> -> vector<8x16xf32>
    %c0_25 = arith.constant 0 : index
    %c0_26 = arith.constant 0 : index
    %c0_27 = arith.constant 0 : index
    %26 = vector.load %arg10[%c0_25, %c0_26, %c0_27] : memref<4x1x16xf32, #tpu.memory_space<vmem>>, vector<1x1x16xf32>
    %27 = vector.shape_cast %26 : vector<1x1x16xf32> to vector<1x16xf32>
    %28 = vector.broadcast %27 : vector<1x16xf32> to vector<8x16xf32>
    %29 = arith.addf %25, %28 : vector<8x16xf32>
    %30 = vector.extract_strided_slice %1 {offsets = [0, 0], sizes = [8, 1], strides = [1, 1]} : vector<8x4xf32> to vector<8x1xf32>
    %31 = vector.broadcast %30 : vector<8x1xf32> to vector<8x16xf32>
    %32 = arith.mulf %31, %29 : vector<8x16xf32>
    %33 = arith.addf %22, %32 : vector<8x16xf32>
    %c1 = arith.constant 1 : index
    %c0_28 = arith.constant 0 : index
    %c0_29 = arith.constant 0 : index
    %34 = vector.load %arg7[%c1, %c0_28, %c0_29] : memref<4x16x32xf32, #tpu.memory_space<vmem>>, vector<1x16x32xf32>
    %35 = vector.shape_cast %34 : vector<1x16x32xf32> to vector<16x32xf32>
    %cst_30 = arith.constant dense<0.000000e+00> : vector<8x16xf32>
    %36 = tpu.matmul %17, %35, %cst_30 {dimension_numbers = #tpu.dot_dimension_numbers<[1], [1], [0], [0], [0, 0, 1, 0], [], []>} : vector<8x32xf32>, vector<16x32xf32>, vector<8x16xf32> -> vector<8x16xf32>
    %c1_31 = arith.constant 1 : index
    %c0_32 = arith.constant 0 : index
    %c0_33 = arith.constant 0 : index
    %37 = vector.load %arg10[%c1_31, %c0_32, %c0_33] : memref<4x1x16xf32, #tpu.memory_space<vmem>>, vector<1x1x16xf32>
    %38 = vector.shape_cast %37 : vector<1x1x16xf32> to vector<1x16xf32>
    %39 = vector.broadcast %38 : vector<1x16xf32> to vector<8x16xf32>
    %40 = arith.addf %36, %39 : vector<8x16xf32>
    %41 = vector.extract_strided_slice %1 {offsets = [0, 1], sizes = [8, 1], strides = [1, 1]} : vector<8x4xf32> to vector<8x1xf32>
    %42 = vector.broadcast %41 : vector<8x1xf32> to vector<8x16xf32>
    %43 = arith.mulf %42, %40 : vector<8x16xf32>
    %44 = arith.addf %33, %43 : vector<8x16xf32>
    %c2 = arith.constant 2 : index
    %c0_34 = arith.constant 0 : index
    %c0_35 = arith.constant 0 : index
    %45 = vector.load %arg7[%c2, %c0_34, %c0_35] : memref<4x16x32xf32, #tpu.memory_space<vmem>>, vector<1x16x32xf32>
    %46 = vector.shape_cast %45 : vector<1x16x32xf32> to vector<16x32xf32>
    %cst_36 = arith.constant dense<0.000000e+00> : vector<8x16xf32>
    %47 = tpu.matmul %17, %46, %cst_36 {dimension_numbers = #tpu.dot_dimension_numbers<[1], [1], [0], [0], [0, 0, 1, 0], [], []>} : vector<8x32xf32>, vector<16x32xf32>, vector<8x16xf32> -> vector<8x16xf32>
    %c2_37 = arith.constant 2 : index
    %c0_38 = arith.constant 0 : index
    %c0_39 = arith.constant 0 : index
    %48 = vector.load %arg10[%c2_37, %c0_38, %c0_39] : memref<4x1x16xf32, #tpu.memory_space<vmem>>, vector<1x1x16xf32>
    %49 = vector.shape_cast %48 : vector<1x1x16xf32> to vector<1x16xf32>
    %50 = vector.broadcast %49 : vector<1x16xf32> to vector<8x16xf32>
    %51 = arith.addf %47, %50 : vector<8x16xf32>
    %52 = vector.extract_strided_slice %1 {offsets = [0, 2], sizes = [8, 1], strides = [1, 1]} : vector<8x4xf32> to vector<8x1xf32>
    %53 = vector.broadcast %52 : vector<8x1xf32> to vector<8x16xf32>
    %54 = arith.mulf %53, %51 : vector<8x16xf32>
    %55 = arith.addf %44, %54 : vector<8x16xf32>
    %c3 = arith.constant 3 : index
    %c0_40 = arith.constant 0 : index
    %c0_41 = arith.constant 0 : index
    %56 = vector.load %arg7[%c3, %c0_40, %c0_41] : memref<4x16x32xf32, #tpu.memory_space<vmem>>, vector<1x16x32xf32>
    %57 = vector.shape_cast %56 : vector<1x16x32xf32> to vector<16x32xf32>
    %cst_42 = arith.constant dense<0.000000e+00> : vector<8x16xf32>
    %58 = tpu.matmul %17, %57, %cst_42 {dimension_numbers = #tpu.dot_dimension_numbers<[1], [1], [0], [0], [0, 0, 1, 0], [], []>} : vector<8x32xf32>, vector<16x32xf32>, vector<8x16xf32> -> vector<8x16xf32>
    %c3_43 = arith.constant 3 : index
    %c0_44 = arith.constant 0 : index
    %c0_45 = arith.constant 0 : index
    %59 = vector.load %arg10[%c3_43, %c0_44, %c0_45] : memref<4x1x16xf32, #tpu.memory_space<vmem>>, vector<1x1x16xf32>
    %60 = vector.shape_cast %59 : vector<1x1x16xf32> to vector<1x16xf32>
    %61 = vector.broadcast %60 : vector<1x16xf32> to vector<8x16xf32>
    %62 = arith.addf %58, %61 : vector<8x16xf32>
    %63 = vector.extract_strided_slice %1 {offsets = [0, 3], sizes = [8, 1], strides = [1, 1]} : vector<8x4xf32> to vector<8x1xf32>
    %64 = vector.broadcast %63 : vector<8x1xf32> to vector<8x16xf32>
    %65 = arith.mulf %64, %62 : vector<8x16xf32>
    %66 = arith.addf %55, %65 : vector<8x16xf32>
    %cst_46 = arith.constant dense<0.000000e+00> : vector<8xf32>
    %67 = vector.multi_reduction <add>, %66, %cst_46 [1] : vector<8x16xf32> to vector<8xf32>
    %68 = vector.shape_cast %67 : vector<8xf32> to vector<8x1xf32>
    %cst_47 = arith.constant 1.600000e+01 : f32
    %69 = vector.broadcast %cst_47 : f32 to vector<8x1xf32>
    %70 = arith.divf %68, %69 : vector<8x1xf32>
    %71 = vector.broadcast %70 : vector<8x1xf32> to vector<8x16xf32>
    %72 = arith.subf %66, %71 : vector<8x16xf32>
    %73 = arith.mulf %72, %72 : vector<8x16xf32>
    %cst_48 = arith.constant dense<0.000000e+00> : vector<8xf32>
    %74 = vector.multi_reduction <add>, %73, %cst_48 [1] : vector<8x16xf32> to vector<8xf32>
    %75 = vector.shape_cast %74 : vector<8xf32> to vector<8x1xf32>
    %cst_49 = arith.constant 1.600000e+01 : f32
    %76 = vector.broadcast %cst_49 : f32 to vector<8x1xf32>
    %77 = arith.divf %75, %76 : vector<8x1xf32>
    %78 = vector.broadcast %70 : vector<8x1xf32> to vector<8x16xf32>
    %79 = arith.subf %66, %78 : vector<8x16xf32>
    %cst_50 = arith.constant 9.99999974E-6 : f32
    %80 = vector.broadcast %cst_50 : f32 to vector<8x1xf32>
    %81 = arith.addf %77, %80 : vector<8x1xf32>
    %82 = math.rsqrt %81 : vector<8x1xf32>
    %83 = vector.broadcast %82 : vector<8x1xf32> to vector<8x16xf32>
    %84 = arith.mulf %79, %83 : vector<8x16xf32>
    %85 = math.tanh %84 : vector<8x16xf32>
    %c1_51 = arith.constant 1 : index
    %c0_52 = arith.constant 0 : index
    %c0_53 = arith.constant 0 : index
    %86 = vector.load %arg3[%c1_51, %c0_52, %c0_53] : memref<3x32x8xf32, #tpu.memory_space<vmem>>, vector<1x32x8xf32>
    %87 = vector.shape_cast %86 : vector<1x32x8xf32> to vector<32x8xf32>
    %cst_54 = arith.constant dense<0.000000e+00> : vector<8x32xf32>
    %88 = tpu.matmul %0, %87, %cst_54 {dimension_numbers = #tpu.dot_dimension_numbers<[1], [1], [0], [0], [0, 0, 1, 0], [], []>} : vector<8x8xf32>, vector<32x8xf32>, vector<8x32xf32> -> vector<8x32xf32>
    %c1_55 = arith.constant 1 : index
    %c0_56 = arith.constant 0 : index
    %c0_57 = arith.constant 0 : index
    %89 = vector.load %arg5[%c1_55, %c0_56, %c0_57] : memref<3x1x32xf32, #tpu.memory_space<vmem>>, vector<1x1x32xf32>
    %90 = vector.shape_cast %89 : vector<1x1x32xf32> to vector<1x32xf32>
    %91 = vector.broadcast %90 : vector<1x32xf32> to vector<8x32xf32>
    %92 = arith.addf %88, %91 : vector<8x32xf32>
    %93 = math.tanh %92 : vector<8x32xf32>
    %c1_58 = arith.constant 1 : index
    %c0_59 = arith.constant 0 : index
    %c0_60 = arith.constant 0 : index
    %94 = vector.load %arg4[%c1_58, %c0_59, %c0_60] : memref<3x32x32xf32, #tpu.memory_space<vmem>>, vector<1x32x32xf32>
    %95 = vector.shape_cast %94 : vector<1x32x32xf32> to vector<32x32xf32>
    %cst_61 = arith.constant dense<0.000000e+00> : vector<8x32xf32>
    %96 = tpu.matmul %93, %95, %cst_61 {dimension_numbers = #tpu.dot_dimension_numbers<[1], [1], [0], [0], [0, 0, 1, 0], [], []>} : vector<8x32xf32>, vector<32x32xf32>, vector<8x32xf32> -> vector<8x32xf32>
    %c1_62 = arith.constant 1 : index
    %c0_63 = arith.constant 0 : index
    %c0_64 = arith.constant 0 : index
    %97 = vector.load %arg6[%c1_62, %c0_63, %c0_64] : memref<3x1x32xf32, #tpu.memory_space<vmem>>, vector<1x1x32xf32>
    %98 = vector.shape_cast %97 : vector<1x1x32xf32> to vector<1x32xf32>
    %99 = vector.broadcast %98 : vector<1x32xf32> to vector<8x32xf32>
    %100 = arith.addf %96, %99 : vector<8x32xf32>
    %101 = math.tanh %100 : vector<8x32xf32>
    %c0_65 = arith.constant 0 : index
    %c0_66 = arith.constant 0 : index
    %102 = vector.load %arg14[%c0_65, %c0_66] : memref<16x32xf32, #tpu.memory_space<vmem>>, vector<16x32xf32>
    %cst_67 = arith.constant dense<0.000000e+00> : vector<8x16xf32>
    %103 = tpu.matmul %101, %102, %cst_67 {dimension_numbers = #tpu.dot_dimension_numbers<[1], [1], [0], [0], [0, 0, 1, 0], [], []>} : vector<8x32xf32>, vector<16x32xf32>, vector<8x16xf32> -> vector<8x16xf32>
    %c0_68 = arith.constant 0 : index
    %c0_69 = arith.constant 0 : index
    %104 = vector.load %arg17[%c0_68, %c0_69] : memref<1x16xf32, #tpu.memory_space<vmem>>, vector<1x16xf32>
    %105 = vector.broadcast %104 : vector<1x16xf32> to vector<8x16xf32>
    %106 = arith.addf %103, %105 : vector<8x16xf32>
    %c0_70 = arith.constant 0 : index
    %c0_71 = arith.constant 0 : index
    %c0_72 = arith.constant 0 : index
    %107 = vector.load %arg8[%c0_70, %c0_71, %c0_72] : memref<16x16x32xf32, #tpu.memory_space<vmem>>, vector<1x16x32xf32>
    %108 = vector.shape_cast %107 : vector<1x16x32xf32> to vector<16x32xf32>
    %cst_73 = arith.constant dense<0.000000e+00> : vector<8x16xf32>
    %109 = tpu.matmul %101, %108, %cst_73 {dimension_numbers = #tpu.dot_dimension_numbers<[1], [1], [0], [0], [0, 0, 1, 0], [], []>} : vector<8x32xf32>, vector<16x32xf32>, vector<8x16xf32> -> vector<8x16xf32>
    %c0_74 = arith.constant 0 : index
    %c0_75 = arith.constant 0 : index
    %c0_76 = arith.constant 0 : index
    %110 = vector.load %arg11[%c0_74, %c0_75, %c0_76] : memref<16x1x16xf32, #tpu.memory_space<vmem>>, vector<1x1x16xf32>
    %111 = vector.shape_cast %110 : vector<1x1x16xf32> to vector<1x16xf32>
    %112 = vector.broadcast %111 : vector<1x16xf32> to vector<8x16xf32>
    %113 = arith.addf %109, %112 : vector<8x16xf32>
    %114 = vector.extract_strided_slice %85 {offsets = [0, 0], sizes = [8, 1], strides = [1, 1]} : vector<8x16xf32> to vector<8x1xf32>
    %115 = vector.broadcast %114 : vector<8x1xf32> to vector<8x16xf32>
    %116 = arith.mulf %115, %113 : vector<8x16xf32>
    %117 = arith.addf %106, %116 : vector<8x16xf32>
    %c1_77 = arith.constant 1 : index
    %c0_78 = arith.constant 0 : index
    %c0_79 = arith.constant 0 : index
    %118 = vector.load %arg8[%c1_77, %c0_78, %c0_79] : memref<16x16x32xf32, #tpu.memory_space<vmem>>, vector<1x16x32xf32>
    %119 = vector.shape_cast %118 : vector<1x16x32xf32> to vector<16x32xf32>
    %cst_80 = arith.constant dense<0.000000e+00> : vector<8x16xf32>
    %120 = tpu.matmul %101, %119, %cst_80 {dimension_numbers = #tpu.dot_dimension_numbers<[1], [1], [0], [0], [0, 0, 1, 0], [], []>} : vector<8x32xf32>, vector<16x32xf32>, vector<8x16xf32> -> vector<8x16xf32>
    %c1_81 = arith.constant 1 : index
    %c0_82 = arith.constant 0 : index
    %c0_83 = arith.constant 0 : index
    %121 = vector.load %arg11[%c1_81, %c0_82, %c0_83] : memref<16x1x16xf32, #tpu.memory_space<vmem>>, vector<1x1x16xf32>
    %122 = vector.shape_cast %121 : vector<1x1x16xf32> to vector<1x16xf32>
    %123 = vector.broadcast %122 : vector<1x16xf32> to vector<8x16xf32>
    %124 = arith.addf %120, %123 : vector<8x16xf32>
    %125 = vector.extract_strided_slice %85 {offsets = [0, 1], sizes = [8, 1], strides = [1, 1]} : vector<8x16xf32> to vector<8x1xf32>
    %126 = vector.broadcast %125 : vector<8x1xf32> to vector<8x16xf32>
    %127 = arith.mulf %126, %124 : vector<8x16xf32>
    %128 = arith.addf %117, %127 : vector<8x16xf32>
    %c2_84 = arith.constant 2 : index
    %c0_85 = arith.constant 0 : index
    %c0_86 = arith.constant 0 : index
    %129 = vector.load %arg8[%c2_84, %c0_85, %c0_86] : memref<16x16x32xf32, #tpu.memory_space<vmem>>, vector<1x16x32xf32>
    %130 = vector.shape_cast %129 : vector<1x16x32xf32> to vector<16x32xf32>
    %cst_87 = arith.constant dense<0.000000e+00> : vector<8x16xf32>
    %131 = tpu.matmul %101, %130, %cst_87 {dimension_numbers = #tpu.dot_dimension_numbers<[1], [1], [0], [0], [0, 0, 1, 0], [], []>} : vector<8x32xf32>, vector<16x32xf32>, vector<8x16xf32> -> vector<8x16xf32>
    %c2_88 = arith.constant 2 : index
    %c0_89 = arith.constant 0 : index
    %c0_90 = arith.constant 0 : index
    %132 = vector.load %arg11[%c2_88, %c0_89, %c0_90] : memref<16x1x16xf32, #tpu.memory_space<vmem>>, vector<1x1x16xf32>
    %133 = vector.shape_cast %132 : vector<1x1x16xf32> to vector<1x16xf32>
    %134 = vector.broadcast %133 : vector<1x16xf32> to vector<8x16xf32>
    %135 = arith.addf %131, %134 : vector<8x16xf32>
    %136 = vector.extract_strided_slice %85 {offsets = [0, 2], sizes = [8, 1], strides = [1, 1]} : vector<8x16xf32> to vector<8x1xf32>
    %137 = vector.broadcast %136 : vector<8x1xf32> to vector<8x16xf32>
    %138 = arith.mulf %137, %135 : vector<8x16xf32>
    %139 = arith.addf %128, %138 : vector<8x16xf32>
    %c3_91 = arith.constant 3 : index
    %c0_92 = arith.constant 0 : index
    %c0_93 = arith.constant 0 : index
    %140 = vector.load %arg8[%c3_91, %c0_92, %c0_93] : memref<16x16x32xf32, #tpu.memory_space<vmem>>, vector<1x16x32xf32>
    %141 = vector.shape_cast %140 : vector<1x16x32xf32> to vector<16x32xf32>
    %cst_94 = arith.constant dense<0.000000e+00> : vector<8x16xf32>
    %142 = tpu.matmul %101, %141, %cst_94 {dimension_numbers = #tpu.dot_dimension_numbers<[1], [1], [0], [0], [0, 0, 1, 0], [], []>} : vector<8x32xf32>, vector<16x32xf32>, vector<8x16xf32> -> vector<8x16xf32>
    %c3_95 = arith.constant 3 : index
    %c0_96 = arith.constant 0 : index
    %c0_97 = arith.constant 0 : index
    %143 = vector.load %arg11[%c3_95, %c0_96, %c0_97] : memref<16x1x16xf32, #tpu.memory_space<vmem>>, vector<1x1x16xf32>
    %144 = vector.shape_cast %143 : vector<1x1x16xf32> to vector<1x16xf32>
    %145 = vector.broadcast %144 : vector<1x16xf32> to vector<8x16xf32>
    %146 = arith.addf %142, %145 : vector<8x16xf32>
    %147 = vector.extract_strided_slice %85 {offsets = [0, 3], sizes = [8, 1], strides = [1, 1]} : vector<8x16xf32> to vector<8x1xf32>
    %148 = vector.broadcast %147 : vector<8x1xf32> to vector<8x16xf32>
    %149 = arith.mulf %148, %146 : vector<8x16xf32>
    %150 = arith.addf %139, %149 : vector<8x16xf32>
    %c4 = arith.constant 4 : index
    %c0_98 = arith.constant 0 : index
    %c0_99 = arith.constant 0 : index
    %151 = vector.load %arg8[%c4, %c0_98, %c0_99] : memref<16x16x32xf32, #tpu.memory_space<vmem>>, vector<1x16x32xf32>
    %152 = vector.shape_cast %151 : vector<1x16x32xf32> to vector<16x32xf32>
    %cst_100 = arith.constant dense<0.000000e+00> : vector<8x16xf32>
    %153 = tpu.matmul %101, %152, %cst_100 {dimension_numbers = #tpu.dot_dimension_numbers<[1], [1], [0], [0], [0, 0, 1, 0], [], []>} : vector<8x32xf32>, vector<16x32xf32>, vector<8x16xf32> -> vector<8x16xf32>
    %c4_101 = arith.constant 4 : index
    %c0_102 = arith.constant 0 : index
    %c0_103 = arith.constant 0 : index
    %154 = vector.load %arg11[%c4_101, %c0_102, %c0_103] : memref<16x1x16xf32, #tpu.memory_space<vmem>>, vector<1x1x16xf32>
    %155 = vector.shape_cast %154 : vector<1x1x16xf32> to vector<1x16xf32>
    %156 = vector.broadcast %155 : vector<1x16xf32> to vector<8x16xf32>
    %157 = arith.addf %153, %156 : vector<8x16xf32>
    %158 = vector.extract_strided_slice %85 {offsets = [0, 4], sizes = [8, 1], strides = [1, 1]} : vector<8x16xf32> to vector<8x1xf32>
    %159 = vector.broadcast %158 : vector<8x1xf32> to vector<8x16xf32>
    %160 = arith.mulf %159, %157 : vector<8x16xf32>
    %161 = arith.addf %150, %160 : vector<8x16xf32>
    %c5 = arith.constant 5 : index
    %c0_104 = arith.constant 0 : index
    %c0_105 = arith.constant 0 : index
    %162 = vector.load %arg8[%c5, %c0_104, %c0_105] : memref<16x16x32xf32, #tpu.memory_space<vmem>>, vector<1x16x32xf32>
    %163 = vector.shape_cast %162 : vector<1x16x32xf32> to vector<16x32xf32>
    %cst_106 = arith.constant dense<0.000000e+00> : vector<8x16xf32>
    %164 = tpu.matmul %101, %163, %cst_106 {dimension_numbers = #tpu.dot_dimension_numbers<[1], [1], [0], [0], [0, 0, 1, 0], [], []>} : vector<8x32xf32>, vector<16x32xf32>, vector<8x16xf32> -> vector<8x16xf32>
    %c5_107 = arith.constant 5 : index
    %c0_108 = arith.constant 0 : index
    %c0_109 = arith.constant 0 : index
    %165 = vector.load %arg11[%c5_107, %c0_108, %c0_109] : memref<16x1x16xf32, #tpu.memory_space<vmem>>, vector<1x1x16xf32>
    %166 = vector.shape_cast %165 : vector<1x1x16xf32> to vector<1x16xf32>
    %167 = vector.broadcast %166 : vector<1x16xf32> to vector<8x16xf32>
    %168 = arith.addf %164, %167 : vector<8x16xf32>
    %169 = vector.extract_strided_slice %85 {offsets = [0, 5], sizes = [8, 1], strides = [1, 1]} : vector<8x16xf32> to vector<8x1xf32>
    %170 = vector.broadcast %169 : vector<8x1xf32> to vector<8x16xf32>
    %171 = arith.mulf %170, %168 : vector<8x16xf32>
    %172 = arith.addf %161, %171 : vector<8x16xf32>
    %c6 = arith.constant 6 : index
    %c0_110 = arith.constant 0 : index
    %c0_111 = arith.constant 0 : index
    %173 = vector.load %arg8[%c6, %c0_110, %c0_111] : memref<16x16x32xf32, #tpu.memory_space<vmem>>, vector<1x16x32xf32>
    %174 = vector.shape_cast %173 : vector<1x16x32xf32> to vector<16x32xf32>
    %cst_112 = arith.constant dense<0.000000e+00> : vector<8x16xf32>
    %175 = tpu.matmul %101, %174, %cst_112 {dimension_numbers = #tpu.dot_dimension_numbers<[1], [1], [0], [0], [0, 0, 1, 0], [], []>} : vector<8x32xf32>, vector<16x32xf32>, vector<8x16xf32> -> vector<8x16xf32>
    %c6_113 = arith.constant 6 : index
    %c0_114 = arith.constant 0 : index
    %c0_115 = arith.constant 0 : index
    %176 = vector.load %arg11[%c6_113, %c0_114, %c0_115] : memref<16x1x16xf32, #tpu.memory_space<vmem>>, vector<1x1x16xf32>
    %177 = vector.shape_cast %176 : vector<1x1x16xf32> to vector<1x16xf32>
    %178 = vector.broadcast %177 : vector<1x16xf32> to vector<8x16xf32>
    %179 = arith.addf %175, %178 : vector<8x16xf32>
    %180 = vector.extract_strided_slice %85 {offsets = [0, 6], sizes = [8, 1], strides = [1, 1]} : vector<8x16xf32> to vector<8x1xf32>
    %181 = vector.broadcast %180 : vector<8x1xf32> to vector<8x16xf32>
    %182 = arith.mulf %181, %179 : vector<8x16xf32>
    %183 = arith.addf %172, %182 : vector<8x16xf32>
    %c7 = arith.constant 7 : index
    %c0_116 = arith.constant 0 : index
    %c0_117 = arith.constant 0 : index
    %184 = vector.load %arg8[%c7, %c0_116, %c0_117] : memref<16x16x32xf32, #tpu.memory_space<vmem>>, vector<1x16x32xf32>
    %185 = vector.shape_cast %184 : vector<1x16x32xf32> to vector<16x32xf32>
    %cst_118 = arith.constant dense<0.000000e+00> : vector<8x16xf32>
    %186 = tpu.matmul %101, %185, %cst_118 {dimension_numbers = #tpu.dot_dimension_numbers<[1], [1], [0], [0], [0, 0, 1, 0], [], []>} : vector<8x32xf32>, vector<16x32xf32>, vector<8x16xf32> -> vector<8x16xf32>
    %c7_119 = arith.constant 7 : index
    %c0_120 = arith.constant 0 : index
    %c0_121 = arith.constant 0 : index
    %187 = vector.load %arg11[%c7_119, %c0_120, %c0_121] : memref<16x1x16xf32, #tpu.memory_space<vmem>>, vector<1x1x16xf32>
    %188 = vector.shape_cast %187 : vector<1x1x16xf32> to vector<1x16xf32>
    %189 = vector.broadcast %188 : vector<1x16xf32> to vector<8x16xf32>
    %190 = arith.addf %186, %189 : vector<8x16xf32>
    %191 = vector.extract_strided_slice %85 {offsets = [0, 7], sizes = [8, 1], strides = [1, 1]} : vector<8x16xf32> to vector<8x1xf32>
    %192 = vector.broadcast %191 : vector<8x1xf32> to vector<8x16xf32>
    %193 = arith.mulf %192, %190 : vector<8x16xf32>
    %194 = arith.addf %183, %193 : vector<8x16xf32>
    %c8 = arith.constant 8 : index
    %c0_122 = arith.constant 0 : index
    %c0_123 = arith.constant 0 : index
    %195 = vector.load %arg8[%c8, %c0_122, %c0_123] : memref<16x16x32xf32, #tpu.memory_space<vmem>>, vector<1x16x32xf32>
    %196 = vector.shape_cast %195 : vector<1x16x32xf32> to vector<16x32xf32>
    %cst_124 = arith.constant dense<0.000000e+00> : vector<8x16xf32>
    %197 = tpu.matmul %101, %196, %cst_124 {dimension_numbers = #tpu.dot_dimension_numbers<[1], [1], [0], [0], [0, 0, 1, 0], [], []>} : vector<8x32xf32>, vector<16x32xf32>, vector<8x16xf32> -> vector<8x16xf32>
    %c8_125 = arith.constant 8 : index
    %c0_126 = arith.constant 0 : index
    %c0_127 = arith.constant 0 : index
    %198 = vector.load %arg11[%c8_125, %c0_126, %c0_127] : memref<16x1x16xf32, #tpu.memory_space<vmem>>, vector<1x1x16xf32>
    %199 = vector.shape_cast %198 : vector<1x1x16xf32> to vector<1x16xf32>
    %200 = vector.broadcast %199 : vector<1x16xf32> to vector<8x16xf32>
    %201 = arith.addf %197, %200 : vector<8x16xf32>
    %202 = vector.extract_strided_slice %85 {offsets = [0, 8], sizes = [8, 1], strides = [1, 1]} : vector<8x16xf32> to vector<8x1xf32>
    %203 = vector.broadcast %202 : vector<8x1xf32> to vector<8x16xf32>
    %204 = arith.mulf %203, %201 : vector<8x16xf32>
    %205 = arith.addf %194, %204 : vector<8x16xf32>
    %c9 = arith.constant 9 : index
    %c0_128 = arith.constant 0 : index
    %c0_129 = arith.constant 0 : index
    %206 = vector.load %arg8[%c9, %c0_128, %c0_129] : memref<16x16x32xf32, #tpu.memory_space<vmem>>, vector<1x16x32xf32>
    %207 = vector.shape_cast %206 : vector<1x16x32xf32> to vector<16x32xf32>
    %cst_130 = arith.constant dense<0.000000e+00> : vector<8x16xf32>
    %208 = tpu.matmul %101, %207, %cst_130 {dimension_numbers = #tpu.dot_dimension_numbers<[1], [1], [0], [0], [0, 0, 1, 0], [], []>} : vector<8x32xf32>, vector<16x32xf32>, vector<8x16xf32> -> vector<8x16xf32>
    %c9_131 = arith.constant 9 : index
    %c0_132 = arith.constant 0 : index
    %c0_133 = arith.constant 0 : index
    %209 = vector.load %arg11[%c9_131, %c0_132, %c0_133] : memref<16x1x16xf32, #tpu.memory_space<vmem>>, vector<1x1x16xf32>
    %210 = vector.shape_cast %209 : vector<1x1x16xf32> to vector<1x16xf32>
    %211 = vector.broadcast %210 : vector<1x16xf32> to vector<8x16xf32>
    %212 = arith.addf %208, %211 : vector<8x16xf32>
    %213 = vector.extract_strided_slice %85 {offsets = [0, 9], sizes = [8, 1], strides = [1, 1]} : vector<8x16xf32> to vector<8x1xf32>
    %214 = vector.broadcast %213 : vector<8x1xf32> to vector<8x16xf32>
    %215 = arith.mulf %214, %212 : vector<8x16xf32>
    %216 = arith.addf %205, %215 : vector<8x16xf32>
    %c10 = arith.constant 10 : index
    %c0_134 = arith.constant 0 : index
    %c0_135 = arith.constant 0 : index
    %217 = vector.load %arg8[%c10, %c0_134, %c0_135] : memref<16x16x32xf32, #tpu.memory_space<vmem>>, vector<1x16x32xf32>
    %218 = vector.shape_cast %217 : vector<1x16x32xf32> to vector<16x32xf32>
    %cst_136 = arith.constant dense<0.000000e+00> : vector<8x16xf32>
    %219 = tpu.matmul %101, %218, %cst_136 {dimension_numbers = #tpu.dot_dimension_numbers<[1], [1], [0], [0], [0, 0, 1, 0], [], []>} : vector<8x32xf32>, vector<16x32xf32>, vector<8x16xf32> -> vector<8x16xf32>
    %c10_137 = arith.constant 10 : index
    %c0_138 = arith.constant 0 : index
    %c0_139 = arith.constant 0 : index
    %220 = vector.load %arg11[%c10_137, %c0_138, %c0_139] : memref<16x1x16xf32, #tpu.memory_space<vmem>>, vector<1x1x16xf32>
    %221 = vector.shape_cast %220 : vector<1x1x16xf32> to vector<1x16xf32>
    %222 = vector.broadcast %221 : vector<1x16xf32> to vector<8x16xf32>
    %223 = arith.addf %219, %222 : vector<8x16xf32>
    %224 = vector.extract_strided_slice %85 {offsets = [0, 10], sizes = [8, 1], strides = [1, 1]} : vector<8x16xf32> to vector<8x1xf32>
    %225 = vector.broadcast %224 : vector<8x1xf32> to vector<8x16xf32>
    %226 = arith.mulf %225, %223 : vector<8x16xf32>
    %227 = arith.addf %216, %226 : vector<8x16xf32>
    %c11 = arith.constant 11 : index
    %c0_140 = arith.constant 0 : index
    %c0_141 = arith.constant 0 : index
    %228 = vector.load %arg8[%c11, %c0_140, %c0_141] : memref<16x16x32xf32, #tpu.memory_space<vmem>>, vector<1x16x32xf32>
    %229 = vector.shape_cast %228 : vector<1x16x32xf32> to vector<16x32xf32>
    %cst_142 = arith.constant dense<0.000000e+00> : vector<8x16xf32>
    %230 = tpu.matmul %101, %229, %cst_142 {dimension_numbers = #tpu.dot_dimension_numbers<[1], [1], [0], [0], [0, 0, 1, 0], [], []>} : vector<8x32xf32>, vector<16x32xf32>, vector<8x16xf32> -> vector<8x16xf32>
    %c11_143 = arith.constant 11 : index
    %c0_144 = arith.constant 0 : index
    %c0_145 = arith.constant 0 : index
    %231 = vector.load %arg11[%c11_143, %c0_144, %c0_145] : memref<16x1x16xf32, #tpu.memory_space<vmem>>, vector<1x1x16xf32>
    %232 = vector.shape_cast %231 : vector<1x1x16xf32> to vector<1x16xf32>
    %233 = vector.broadcast %232 : vector<1x16xf32> to vector<8x16xf32>
    %234 = arith.addf %230, %233 : vector<8x16xf32>
    %235 = vector.extract_strided_slice %85 {offsets = [0, 11], sizes = [8, 1], strides = [1, 1]} : vector<8x16xf32> to vector<8x1xf32>
    %236 = vector.broadcast %235 : vector<8x1xf32> to vector<8x16xf32>
    %237 = arith.mulf %236, %234 : vector<8x16xf32>
    %238 = arith.addf %227, %237 : vector<8x16xf32>
    %c12 = arith.constant 12 : index
    %c0_146 = arith.constant 0 : index
    %c0_147 = arith.constant 0 : index
    %239 = vector.load %arg8[%c12, %c0_146, %c0_147] : memref<16x16x32xf32, #tpu.memory_space<vmem>>, vector<1x16x32xf32>
    %240 = vector.shape_cast %239 : vector<1x16x32xf32> to vector<16x32xf32>
    %cst_148 = arith.constant dense<0.000000e+00> : vector<8x16xf32>
    %241 = tpu.matmul %101, %240, %cst_148 {dimension_numbers = #tpu.dot_dimension_numbers<[1], [1], [0], [0], [0, 0, 1, 0], [], []>} : vector<8x32xf32>, vector<16x32xf32>, vector<8x16xf32> -> vector<8x16xf32>
    %c12_149 = arith.constant 12 : index
    %c0_150 = arith.constant 0 : index
    %c0_151 = arith.constant 0 : index
    %242 = vector.load %arg11[%c12_149, %c0_150, %c0_151] : memref<16x1x16xf32, #tpu.memory_space<vmem>>, vector<1x1x16xf32>
    %243 = vector.shape_cast %242 : vector<1x1x16xf32> to vector<1x16xf32>
    %244 = vector.broadcast %243 : vector<1x16xf32> to vector<8x16xf32>
    %245 = arith.addf %241, %244 : vector<8x16xf32>
    %246 = vector.extract_strided_slice %85 {offsets = [0, 12], sizes = [8, 1], strides = [1, 1]} : vector<8x16xf32> to vector<8x1xf32>
    %247 = vector.broadcast %246 : vector<8x1xf32> to vector<8x16xf32>
    %248 = arith.mulf %247, %245 : vector<8x16xf32>
    %249 = arith.addf %238, %248 : vector<8x16xf32>
    %c13 = arith.constant 13 : index
    %c0_152 = arith.constant 0 : index
    %c0_153 = arith.constant 0 : index
    %250 = vector.load %arg8[%c13, %c0_152, %c0_153] : memref<16x16x32xf32, #tpu.memory_space<vmem>>, vector<1x16x32xf32>
    %251 = vector.shape_cast %250 : vector<1x16x32xf32> to vector<16x32xf32>
    %cst_154 = arith.constant dense<0.000000e+00> : vector<8x16xf32>
    %252 = tpu.matmul %101, %251, %cst_154 {dimension_numbers = #tpu.dot_dimension_numbers<[1], [1], [0], [0], [0, 0, 1, 0], [], []>} : vector<8x32xf32>, vector<16x32xf32>, vector<8x16xf32> -> vector<8x16xf32>
    %c13_155 = arith.constant 13 : index
    %c0_156 = arith.constant 0 : index
    %c0_157 = arith.constant 0 : index
    %253 = vector.load %arg11[%c13_155, %c0_156, %c0_157] : memref<16x1x16xf32, #tpu.memory_space<vmem>>, vector<1x1x16xf32>
    %254 = vector.shape_cast %253 : vector<1x1x16xf32> to vector<1x16xf32>
    %255 = vector.broadcast %254 : vector<1x16xf32> to vector<8x16xf32>
    %256 = arith.addf %252, %255 : vector<8x16xf32>
    %257 = vector.extract_strided_slice %85 {offsets = [0, 13], sizes = [8, 1], strides = [1, 1]} : vector<8x16xf32> to vector<8x1xf32>
    %258 = vector.broadcast %257 : vector<8x1xf32> to vector<8x16xf32>
    %259 = arith.mulf %258, %256 : vector<8x16xf32>
    %260 = arith.addf %249, %259 : vector<8x16xf32>
    %c14 = arith.constant 14 : index
    %c0_158 = arith.constant 0 : index
    %c0_159 = arith.constant 0 : index
    %261 = vector.load %arg8[%c14, %c0_158, %c0_159] : memref<16x16x32xf32, #tpu.memory_space<vmem>>, vector<1x16x32xf32>
    %262 = vector.shape_cast %261 : vector<1x16x32xf32> to vector<16x32xf32>
    %cst_160 = arith.constant dense<0.000000e+00> : vector<8x16xf32>
    %263 = tpu.matmul %101, %262, %cst_160 {dimension_numbers = #tpu.dot_dimension_numbers<[1], [1], [0], [0], [0, 0, 1, 0], [], []>} : vector<8x32xf32>, vector<16x32xf32>, vector<8x16xf32> -> vector<8x16xf32>
    %c14_161 = arith.constant 14 : index
    %c0_162 = arith.constant 0 : index
    %c0_163 = arith.constant 0 : index
    %264 = vector.load %arg11[%c14_161, %c0_162, %c0_163] : memref<16x1x16xf32, #tpu.memory_space<vmem>>, vector<1x1x16xf32>
    %265 = vector.shape_cast %264 : vector<1x1x16xf32> to vector<1x16xf32>
    %266 = vector.broadcast %265 : vector<1x16xf32> to vector<8x16xf32>
    %267 = arith.addf %263, %266 : vector<8x16xf32>
    %268 = vector.extract_strided_slice %85 {offsets = [0, 14], sizes = [8, 1], strides = [1, 1]} : vector<8x16xf32> to vector<8x1xf32>
    %269 = vector.broadcast %268 : vector<8x1xf32> to vector<8x16xf32>
    %270 = arith.mulf %269, %267 : vector<8x16xf32>
    %271 = arith.addf %260, %270 : vector<8x16xf32>
    %c15 = arith.constant 15 : index
    %c0_164 = arith.constant 0 : index
    %c0_165 = arith.constant 0 : index
    %272 = vector.load %arg8[%c15, %c0_164, %c0_165] : memref<16x16x32xf32, #tpu.memory_space<vmem>>, vector<1x16x32xf32>
    %273 = vector.shape_cast %272 : vector<1x16x32xf32> to vector<16x32xf32>
    %cst_166 = arith.constant dense<0.000000e+00> : vector<8x16xf32>
    %274 = tpu.matmul %101, %273, %cst_166 {dimension_numbers = #tpu.dot_dimension_numbers<[1], [1], [0], [0], [0, 0, 1, 0], [], []>} : vector<8x32xf32>, vector<16x32xf32>, vector<8x16xf32> -> vector<8x16xf32>
    %c15_167 = arith.constant 15 : index
    %c0_168 = arith.constant 0 : index
    %c0_169 = arith.constant 0 : index
    %275 = vector.load %arg11[%c15_167, %c0_168, %c0_169] : memref<16x1x16xf32, #tpu.memory_space<vmem>>, vector<1x1x16xf32>
    %276 = vector.shape_cast %275 : vector<1x1x16xf32> to vector<1x16xf32>
    %277 = vector.broadcast %276 : vector<1x16xf32> to vector<8x16xf32>
    %278 = arith.addf %274, %277 : vector<8x16xf32>
    %279 = vector.extract_strided_slice %85 {offsets = [0, 15], sizes = [8, 1], strides = [1, 1]} : vector<8x16xf32> to vector<8x1xf32>
    %280 = vector.broadcast %279 : vector<8x1xf32> to vector<8x16xf32>
    %281 = arith.mulf %280, %278 : vector<8x16xf32>
    %282 = arith.addf %271, %281 : vector<8x16xf32>
    %cst_170 = arith.constant dense<0.000000e+00> : vector<8xf32>
    %283 = vector.multi_reduction <add>, %282, %cst_170 [1] : vector<8x16xf32> to vector<8xf32>
    %284 = vector.shape_cast %283 : vector<8xf32> to vector<8x1xf32>
    %cst_171 = arith.constant 1.600000e+01 : f32
    %285 = vector.broadcast %cst_171 : f32 to vector<8x1xf32>
    %286 = arith.divf %284, %285 : vector<8x1xf32>
    %287 = vector.broadcast %286 : vector<8x1xf32> to vector<8x16xf32>
    %288 = arith.subf %282, %287 : vector<8x16xf32>
    %289 = arith.mulf %288, %288 : vector<8x16xf32>
    %cst_172 = arith.constant dense<0.000000e+00> : vector<8xf32>
    %290 = vector.multi_reduction <add>, %289, %cst_172 [1] : vector<8x16xf32> to vector<8xf32>
    %291 = vector.shape_cast %290 : vector<8xf32> to vector<8x1xf32>
    %cst_173 = arith.constant 1.600000e+01 : f32
    %292 = vector.broadcast %cst_173 : f32 to vector<8x1xf32>
    %293 = arith.divf %291, %292 : vector<8x1xf32>
    %294 = vector.broadcast %286 : vector<8x1xf32> to vector<8x16xf32>
    %295 = arith.subf %282, %294 : vector<8x16xf32>
    %cst_174 = arith.constant 9.99999974E-6 : f32
    %296 = vector.broadcast %cst_174 : f32 to vector<8x1xf32>
    %297 = arith.addf %293, %296 : vector<8x1xf32>
    %298 = math.rsqrt %297 : vector<8x1xf32>
    %299 = vector.broadcast %298 : vector<8x1xf32> to vector<8x16xf32>
    %300 = arith.mulf %295, %299 : vector<8x16xf32>
    %301 = math.tanh %300 : vector<8x16xf32>
    %c2_175 = arith.constant 2 : index
    %c0_176 = arith.constant 0 : index
    %c0_177 = arith.constant 0 : index
    %302 = vector.load %arg3[%c2_175, %c0_176, %c0_177] : memref<3x32x8xf32, #tpu.memory_space<vmem>>, vector<1x32x8xf32>
    %303 = vector.shape_cast %302 : vector<1x32x8xf32> to vector<32x8xf32>
    %cst_178 = arith.constant dense<0.000000e+00> : vector<8x32xf32>
    %304 = tpu.matmul %0, %303, %cst_178 {dimension_numbers = #tpu.dot_dimension_numbers<[1], [1], [0], [0], [0, 0, 1, 0], [], []>} : vector<8x8xf32>, vector<32x8xf32>, vector<8x32xf32> -> vector<8x32xf32>
    %c2_179 = arith.constant 2 : index
    %c0_180 = arith.constant 0 : index
    %c0_181 = arith.constant 0 : index
    %305 = vector.load %arg5[%c2_179, %c0_180, %c0_181] : memref<3x1x32xf32, #tpu.memory_space<vmem>>, vector<1x1x32xf32>
    %306 = vector.shape_cast %305 : vector<1x1x32xf32> to vector<1x32xf32>
    %307 = vector.broadcast %306 : vector<1x32xf32> to vector<8x32xf32>
    %308 = arith.addf %304, %307 : vector<8x32xf32>
    %309 = math.tanh %308 : vector<8x32xf32>
    %c2_182 = arith.constant 2 : index
    %c0_183 = arith.constant 0 : index
    %c0_184 = arith.constant 0 : index
    %310 = vector.load %arg4[%c2_182, %c0_183, %c0_184] : memref<3x32x32xf32, #tpu.memory_space<vmem>>, vector<1x32x32xf32>
    %311 = vector.shape_cast %310 : vector<1x32x32xf32> to vector<32x32xf32>
    %cst_185 = arith.constant dense<0.000000e+00> : vector<8x32xf32>
    %312 = tpu.matmul %309, %311, %cst_185 {dimension_numbers = #tpu.dot_dimension_numbers<[1], [1], [0], [0], [0, 0, 1, 0], [], []>} : vector<8x32xf32>, vector<32x32xf32>, vector<8x32xf32> -> vector<8x32xf32>
    %c2_186 = arith.constant 2 : index
    %c0_187 = arith.constant 0 : index
    %c0_188 = arith.constant 0 : index
    %313 = vector.load %arg6[%c2_186, %c0_187, %c0_188] : memref<3x1x32xf32, #tpu.memory_space<vmem>>, vector<1x1x32xf32>
    %314 = vector.shape_cast %313 : vector<1x1x32xf32> to vector<1x32xf32>
    %315 = vector.broadcast %314 : vector<1x32xf32> to vector<8x32xf32>
    %316 = arith.addf %312, %315 : vector<8x32xf32>
    %317 = math.tanh %316 : vector<8x32xf32>
    %c0_189 = arith.constant 0 : index
    %c0_190 = arith.constant 0 : index
    %318 = vector.load %arg15[%c0_189, %c0_190] : memref<128x32xf32, #tpu.memory_space<vmem>>, vector<128x32xf32>
    %cst_191 = arith.constant dense<0.000000e+00> : vector<8x128xf32>
    %319 = tpu.matmul %317, %318, %cst_191 {dimension_numbers = #tpu.dot_dimension_numbers<[1], [1], [0], [0], [0, 0, 1, 0], [], []>} : vector<8x32xf32>, vector<128x32xf32>, vector<8x128xf32> -> vector<8x128xf32>
    %c0_192 = arith.constant 0 : index
    %c0_193 = arith.constant 0 : index
    %320 = vector.load %arg18[%c0_192, %c0_193] : memref<1x128xf32, #tpu.memory_space<vmem>>, vector<1x128xf32>
    %321 = vector.broadcast %320 : vector<1x128xf32> to vector<8x128xf32>
    %322 = arith.addf %319, %321 : vector<8x128xf32>
    %c0_194 = arith.constant 0 : index
    %c0_195 = arith.constant 0 : index
    %c0_196 = arith.constant 0 : index
    %323 = vector.load %arg9[%c0_194, %c0_195, %c0_196] : memref<16x128x32xf32, #tpu.memory_space<vmem>>, vector<1x128x32xf32>
    %324 = vector.shape_cast %323 : vector<1x128x32xf32> to vector<128x32xf32>
    %cst_197 = arith.constant dense<0.000000e+00> : vector<8x128xf32>
    %325 = tpu.matmul %317, %324, %cst_197 {dimension_numbers = #tpu.dot_dimension_numbers<[1], [1], [0], [0], [0, 0, 1, 0], [], []>} : vector<8x32xf32>, vector<128x32xf32>, vector<8x128xf32> -> vector<8x128xf32>
    %c0_198 = arith.constant 0 : index
    %c0_199 = arith.constant 0 : index
    %c0_200 = arith.constant 0 : index
    %326 = vector.load %arg12[%c0_198, %c0_199, %c0_200] : memref<16x1x128xf32, #tpu.memory_space<vmem>>, vector<1x1x128xf32>
    %327 = vector.shape_cast %326 : vector<1x1x128xf32> to vector<1x128xf32>
    %328 = vector.broadcast %327 : vector<1x128xf32> to vector<8x128xf32>
    %329 = arith.addf %325, %328 : vector<8x128xf32>
    %330 = vector.extract_strided_slice %301 {offsets = [0, 0], sizes = [8, 1], strides = [1, 1]} : vector<8x16xf32> to vector<8x1xf32>
    %331 = vector.broadcast %330 : vector<8x1xf32> to vector<8x128xf32>
    %332 = arith.mulf %331, %329 : vector<8x128xf32>
    %333 = arith.addf %322, %332 : vector<8x128xf32>
    %c1_201 = arith.constant 1 : index
    %c0_202 = arith.constant 0 : index
    %c0_203 = arith.constant 0 : index
    %334 = vector.load %arg9[%c1_201, %c0_202, %c0_203] : memref<16x128x32xf32, #tpu.memory_space<vmem>>, vector<1x128x32xf32>
    %335 = vector.shape_cast %334 : vector<1x128x32xf32> to vector<128x32xf32>
    %cst_204 = arith.constant dense<0.000000e+00> : vector<8x128xf32>
    %336 = tpu.matmul %317, %335, %cst_204 {dimension_numbers = #tpu.dot_dimension_numbers<[1], [1], [0], [0], [0, 0, 1, 0], [], []>} : vector<8x32xf32>, vector<128x32xf32>, vector<8x128xf32> -> vector<8x128xf32>
    %c1_205 = arith.constant 1 : index
    %c0_206 = arith.constant 0 : index
    %c0_207 = arith.constant 0 : index
    %337 = vector.load %arg12[%c1_205, %c0_206, %c0_207] : memref<16x1x128xf32, #tpu.memory_space<vmem>>, vector<1x1x128xf32>
    %338 = vector.shape_cast %337 : vector<1x1x128xf32> to vector<1x128xf32>
    %339 = vector.broadcast %338 : vector<1x128xf32> to vector<8x128xf32>
    %340 = arith.addf %336, %339 : vector<8x128xf32>
    %341 = vector.extract_strided_slice %301 {offsets = [0, 1], sizes = [8, 1], strides = [1, 1]} : vector<8x16xf32> to vector<8x1xf32>
    %342 = vector.broadcast %341 : vector<8x1xf32> to vector<8x128xf32>
    %343 = arith.mulf %342, %340 : vector<8x128xf32>
    %344 = arith.addf %333, %343 : vector<8x128xf32>
    %c2_208 = arith.constant 2 : index
    %c0_209 = arith.constant 0 : index
    %c0_210 = arith.constant 0 : index
    %345 = vector.load %arg9[%c2_208, %c0_209, %c0_210] : memref<16x128x32xf32, #tpu.memory_space<vmem>>, vector<1x128x32xf32>
    %346 = vector.shape_cast %345 : vector<1x128x32xf32> to vector<128x32xf32>
    %cst_211 = arith.constant dense<0.000000e+00> : vector<8x128xf32>
    %347 = tpu.matmul %317, %346, %cst_211 {dimension_numbers = #tpu.dot_dimension_numbers<[1], [1], [0], [0], [0, 0, 1, 0], [], []>} : vector<8x32xf32>, vector<128x32xf32>, vector<8x128xf32> -> vector<8x128xf32>
    %c2_212 = arith.constant 2 : index
    %c0_213 = arith.constant 0 : index
    %c0_214 = arith.constant 0 : index
    %348 = vector.load %arg12[%c2_212, %c0_213, %c0_214] : memref<16x1x128xf32, #tpu.memory_space<vmem>>, vector<1x1x128xf32>
    %349 = vector.shape_cast %348 : vector<1x1x128xf32> to vector<1x128xf32>
    %350 = vector.broadcast %349 : vector<1x128xf32> to vector<8x128xf32>
    %351 = arith.addf %347, %350 : vector<8x128xf32>
    %352 = vector.extract_strided_slice %301 {offsets = [0, 2], sizes = [8, 1], strides = [1, 1]} : vector<8x16xf32> to vector<8x1xf32>
    %353 = vector.broadcast %352 : vector<8x1xf32> to vector<8x128xf32>
    %354 = arith.mulf %353, %351 : vector<8x128xf32>
    %355 = arith.addf %344, %354 : vector<8x128xf32>
    %c3_215 = arith.constant 3 : index
    %c0_216 = arith.constant 0 : index
    %c0_217 = arith.constant 0 : index
    %356 = vector.load %arg9[%c3_215, %c0_216, %c0_217] : memref<16x128x32xf32, #tpu.memory_space<vmem>>, vector<1x128x32xf32>
    %357 = vector.shape_cast %356 : vector<1x128x32xf32> to vector<128x32xf32>
    %cst_218 = arith.constant dense<0.000000e+00> : vector<8x128xf32>
    %358 = tpu.matmul %317, %357, %cst_218 {dimension_numbers = #tpu.dot_dimension_numbers<[1], [1], [0], [0], [0, 0, 1, 0], [], []>} : vector<8x32xf32>, vector<128x32xf32>, vector<8x128xf32> -> vector<8x128xf32>
    %c3_219 = arith.constant 3 : index
    %c0_220 = arith.constant 0 : index
    %c0_221 = arith.constant 0 : index
    %359 = vector.load %arg12[%c3_219, %c0_220, %c0_221] : memref<16x1x128xf32, #tpu.memory_space<vmem>>, vector<1x1x128xf32>
    %360 = vector.shape_cast %359 : vector<1x1x128xf32> to vector<1x128xf32>
    %361 = vector.broadcast %360 : vector<1x128xf32> to vector<8x128xf32>
    %362 = arith.addf %358, %361 : vector<8x128xf32>
    %363 = vector.extract_strided_slice %301 {offsets = [0, 3], sizes = [8, 1], strides = [1, 1]} : vector<8x16xf32> to vector<8x1xf32>
    %364 = vector.broadcast %363 : vector<8x1xf32> to vector<8x128xf32>
    %365 = arith.mulf %364, %362 : vector<8x128xf32>
    %366 = arith.addf %355, %365 : vector<8x128xf32>
    %c4_222 = arith.constant 4 : index
    %c0_223 = arith.constant 0 : index
    %c0_224 = arith.constant 0 : index
    %367 = vector.load %arg9[%c4_222, %c0_223, %c0_224] : memref<16x128x32xf32, #tpu.memory_space<vmem>>, vector<1x128x32xf32>
    %368 = vector.shape_cast %367 : vector<1x128x32xf32> to vector<128x32xf32>
    %cst_225 = arith.constant dense<0.000000e+00> : vector<8x128xf32>
    %369 = tpu.matmul %317, %368, %cst_225 {dimension_numbers = #tpu.dot_dimension_numbers<[1], [1], [0], [0], [0, 0, 1, 0], [], []>} : vector<8x32xf32>, vector<128x32xf32>, vector<8x128xf32> -> vector<8x128xf32>
    %c4_226 = arith.constant 4 : index
    %c0_227 = arith.constant 0 : index
    %c0_228 = arith.constant 0 : index
    %370 = vector.load %arg12[%c4_226, %c0_227, %c0_228] : memref<16x1x128xf32, #tpu.memory_space<vmem>>, vector<1x1x128xf32>
    %371 = vector.shape_cast %370 : vector<1x1x128xf32> to vector<1x128xf32>
    %372 = vector.broadcast %371 : vector<1x128xf32> to vector<8x128xf32>
    %373 = arith.addf %369, %372 : vector<8x128xf32>
    %374 = vector.extract_strided_slice %301 {offsets = [0, 4], sizes = [8, 1], strides = [1, 1]} : vector<8x16xf32> to vector<8x1xf32>
    %375 = vector.broadcast %374 : vector<8x1xf32> to vector<8x128xf32>
    %376 = arith.mulf %375, %373 : vector<8x128xf32>
    %377 = arith.addf %366, %376 : vector<8x128xf32>
    %c5_229 = arith.constant 5 : index
    %c0_230 = arith.constant 0 : index
    %c0_231 = arith.constant 0 : index
    %378 = vector.load %arg9[%c5_229, %c0_230, %c0_231] : memref<16x128x32xf32, #tpu.memory_space<vmem>>, vector<1x128x32xf32>
    %379 = vector.shape_cast %378 : vector<1x128x32xf32> to vector<128x32xf32>
    %cst_232 = arith.constant dense<0.000000e+00> : vector<8x128xf32>
    %380 = tpu.matmul %317, %379, %cst_232 {dimension_numbers = #tpu.dot_dimension_numbers<[1], [1], [0], [0], [0, 0, 1, 0], [], []>} : vector<8x32xf32>, vector<128x32xf32>, vector<8x128xf32> -> vector<8x128xf32>
    %c5_233 = arith.constant 5 : index
    %c0_234 = arith.constant 0 : index
    %c0_235 = arith.constant 0 : index
    %381 = vector.load %arg12[%c5_233, %c0_234, %c0_235] : memref<16x1x128xf32, #tpu.memory_space<vmem>>, vector<1x1x128xf32>
    %382 = vector.shape_cast %381 : vector<1x1x128xf32> to vector<1x128xf32>
    %383 = vector.broadcast %382 : vector<1x128xf32> to vector<8x128xf32>
    %384 = arith.addf %380, %383 : vector<8x128xf32>
    %385 = vector.extract_strided_slice %301 {offsets = [0, 5], sizes = [8, 1], strides = [1, 1]} : vector<8x16xf32> to vector<8x1xf32>
    %386 = vector.broadcast %385 : vector<8x1xf32> to vector<8x128xf32>
    %387 = arith.mulf %386, %384 : vector<8x128xf32>
    %388 = arith.addf %377, %387 : vector<8x128xf32>
    %c6_236 = arith.constant 6 : index
    %c0_237 = arith.constant 0 : index
    %c0_238 = arith.constant 0 : index
    %389 = vector.load %arg9[%c6_236, %c0_237, %c0_238] : memref<16x128x32xf32, #tpu.memory_space<vmem>>, vector<1x128x32xf32>
    %390 = vector.shape_cast %389 : vector<1x128x32xf32> to vector<128x32xf32>
    %cst_239 = arith.constant dense<0.000000e+00> : vector<8x128xf32>
    %391 = tpu.matmul %317, %390, %cst_239 {dimension_numbers = #tpu.dot_dimension_numbers<[1], [1], [0], [0], [0, 0, 1, 0], [], []>} : vector<8x32xf32>, vector<128x32xf32>, vector<8x128xf32> -> vector<8x128xf32>
    %c6_240 = arith.constant 6 : index
    %c0_241 = arith.constant 0 : index
    %c0_242 = arith.constant 0 : index
    %392 = vector.load %arg12[%c6_240, %c0_241, %c0_242] : memref<16x1x128xf32, #tpu.memory_space<vmem>>, vector<1x1x128xf32>
    %393 = vector.shape_cast %392 : vector<1x1x128xf32> to vector<1x128xf32>
    %394 = vector.broadcast %393 : vector<1x128xf32> to vector<8x128xf32>
    %395 = arith.addf %391, %394 : vector<8x128xf32>
    %396 = vector.extract_strided_slice %301 {offsets = [0, 6], sizes = [8, 1], strides = [1, 1]} : vector<8x16xf32> to vector<8x1xf32>
    %397 = vector.broadcast %396 : vector<8x1xf32> to vector<8x128xf32>
    %398 = arith.mulf %397, %395 : vector<8x128xf32>
    %399 = arith.addf %388, %398 : vector<8x128xf32>
    %c7_243 = arith.constant 7 : index
    %c0_244 = arith.constant 0 : index
    %c0_245 = arith.constant 0 : index
    %400 = vector.load %arg9[%c7_243, %c0_244, %c0_245] : memref<16x128x32xf32, #tpu.memory_space<vmem>>, vector<1x128x32xf32>
    %401 = vector.shape_cast %400 : vector<1x128x32xf32> to vector<128x32xf32>
    %cst_246 = arith.constant dense<0.000000e+00> : vector<8x128xf32>
    %402 = tpu.matmul %317, %401, %cst_246 {dimension_numbers = #tpu.dot_dimension_numbers<[1], [1], [0], [0], [0, 0, 1, 0], [], []>} : vector<8x32xf32>, vector<128x32xf32>, vector<8x128xf32> -> vector<8x128xf32>
    %c7_247 = arith.constant 7 : index
    %c0_248 = arith.constant 0 : index
    %c0_249 = arith.constant 0 : index
    %403 = vector.load %arg12[%c7_247, %c0_248, %c0_249] : memref<16x1x128xf32, #tpu.memory_space<vmem>>, vector<1x1x128xf32>
    %404 = vector.shape_cast %403 : vector<1x1x128xf32> to vector<1x128xf32>
    %405 = vector.broadcast %404 : vector<1x128xf32> to vector<8x128xf32>
    %406 = arith.addf %402, %405 : vector<8x128xf32>
    %407 = vector.extract_strided_slice %301 {offsets = [0, 7], sizes = [8, 1], strides = [1, 1]} : vector<8x16xf32> to vector<8x1xf32>
    %408 = vector.broadcast %407 : vector<8x1xf32> to vector<8x128xf32>
    %409 = arith.mulf %408, %406 : vector<8x128xf32>
    %410 = arith.addf %399, %409 : vector<8x128xf32>
    %c8_250 = arith.constant 8 : index
    %c0_251 = arith.constant 0 : index
    %c0_252 = arith.constant 0 : index
    %411 = vector.load %arg9[%c8_250, %c0_251, %c0_252] : memref<16x128x32xf32, #tpu.memory_space<vmem>>, vector<1x128x32xf32>
    %412 = vector.shape_cast %411 : vector<1x128x32xf32> to vector<128x32xf32>
    %cst_253 = arith.constant dense<0.000000e+00> : vector<8x128xf32>
    %413 = tpu.matmul %317, %412, %cst_253 {dimension_numbers = #tpu.dot_dimension_numbers<[1], [1], [0], [0], [0, 0, 1, 0], [], []>} : vector<8x32xf32>, vector<128x32xf32>, vector<8x128xf32> -> vector<8x128xf32>
    %c8_254 = arith.constant 8 : index
    %c0_255 = arith.constant 0 : index
    %c0_256 = arith.constant 0 : index
    %414 = vector.load %arg12[%c8_254, %c0_255, %c0_256] : memref<16x1x128xf32, #tpu.memory_space<vmem>>, vector<1x1x128xf32>
    %415 = vector.shape_cast %414 : vector<1x1x128xf32> to vector<1x128xf32>
    %416 = vector.broadcast %415 : vector<1x128xf32> to vector<8x128xf32>
    %417 = arith.addf %413, %416 : vector<8x128xf32>
    %418 = vector.extract_strided_slice %301 {offsets = [0, 8], sizes = [8, 1], strides = [1, 1]} : vector<8x16xf32> to vector<8x1xf32>
    %419 = vector.broadcast %418 : vector<8x1xf32> to vector<8x128xf32>
    %420 = arith.mulf %419, %417 : vector<8x128xf32>
    %421 = arith.addf %410, %420 : vector<8x128xf32>
    %c9_257 = arith.constant 9 : index
    %c0_258 = arith.constant 0 : index
    %c0_259 = arith.constant 0 : index
    %422 = vector.load %arg9[%c9_257, %c0_258, %c0_259] : memref<16x128x32xf32, #tpu.memory_space<vmem>>, vector<1x128x32xf32>
    %423 = vector.shape_cast %422 : vector<1x128x32xf32> to vector<128x32xf32>
    %cst_260 = arith.constant dense<0.000000e+00> : vector<8x128xf32>
    %424 = tpu.matmul %317, %423, %cst_260 {dimension_numbers = #tpu.dot_dimension_numbers<[1], [1], [0], [0], [0, 0, 1, 0], [], []>} : vector<8x32xf32>, vector<128x32xf32>, vector<8x128xf32> -> vector<8x128xf32>
    %c9_261 = arith.constant 9 : index
    %c0_262 = arith.constant 0 : index
    %c0_263 = arith.constant 0 : index
    %425 = vector.load %arg12[%c9_261, %c0_262, %c0_263] : memref<16x1x128xf32, #tpu.memory_space<vmem>>, vector<1x1x128xf32>
    %426 = vector.shape_cast %425 : vector<1x1x128xf32> to vector<1x128xf32>
    %427 = vector.broadcast %426 : vector<1x128xf32> to vector<8x128xf32>
    %428 = arith.addf %424, %427 : vector<8x128xf32>
    %429 = vector.extract_strided_slice %301 {offsets = [0, 9], sizes = [8, 1], strides = [1, 1]} : vector<8x16xf32> to vector<8x1xf32>
    %430 = vector.broadcast %429 : vector<8x1xf32> to vector<8x128xf32>
    %431 = arith.mulf %430, %428 : vector<8x128xf32>
    %432 = arith.addf %421, %431 : vector<8x128xf32>
    %c10_264 = arith.constant 10 : index
    %c0_265 = arith.constant 0 : index
    %c0_266 = arith.constant 0 : index
    %433 = vector.load %arg9[%c10_264, %c0_265, %c0_266] : memref<16x128x32xf32, #tpu.memory_space<vmem>>, vector<1x128x32xf32>
    %434 = vector.shape_cast %433 : vector<1x128x32xf32> to vector<128x32xf32>
    %cst_267 = arith.constant dense<0.000000e+00> : vector<8x128xf32>
    %435 = tpu.matmul %317, %434, %cst_267 {dimension_numbers = #tpu.dot_dimension_numbers<[1], [1], [0], [0], [0, 0, 1, 0], [], []>} : vector<8x32xf32>, vector<128x32xf32>, vector<8x128xf32> -> vector<8x128xf32>
    %c10_268 = arith.constant 10 : index
    %c0_269 = arith.constant 0 : index
    %c0_270 = arith.constant 0 : index
    %436 = vector.load %arg12[%c10_268, %c0_269, %c0_270] : memref<16x1x128xf32, #tpu.memory_space<vmem>>, vector<1x1x128xf32>
    %437 = vector.shape_cast %436 : vector<1x1x128xf32> to vector<1x128xf32>
    %438 = vector.broadcast %437 : vector<1x128xf32> to vector<8x128xf32>
    %439 = arith.addf %435, %438 : vector<8x128xf32>
    %440 = vector.extract_strided_slice %301 {offsets = [0, 10], sizes = [8, 1], strides = [1, 1]} : vector<8x16xf32> to vector<8x1xf32>
    %441 = vector.broadcast %440 : vector<8x1xf32> to vector<8x128xf32>
    %442 = arith.mulf %441, %439 : vector<8x128xf32>
    %443 = arith.addf %432, %442 : vector<8x128xf32>
    %c11_271 = arith.constant 11 : index
    %c0_272 = arith.constant 0 : index
    %c0_273 = arith.constant 0 : index
    %444 = vector.load %arg9[%c11_271, %c0_272, %c0_273] : memref<16x128x32xf32, #tpu.memory_space<vmem>>, vector<1x128x32xf32>
    %445 = vector.shape_cast %444 : vector<1x128x32xf32> to vector<128x32xf32>
    %cst_274 = arith.constant dense<0.000000e+00> : vector<8x128xf32>
    %446 = tpu.matmul %317, %445, %cst_274 {dimension_numbers = #tpu.dot_dimension_numbers<[1], [1], [0], [0], [0, 0, 1, 0], [], []>} : vector<8x32xf32>, vector<128x32xf32>, vector<8x128xf32> -> vector<8x128xf32>
    %c11_275 = arith.constant 11 : index
    %c0_276 = arith.constant 0 : index
    %c0_277 = arith.constant 0 : index
    %447 = vector.load %arg12[%c11_275, %c0_276, %c0_277] : memref<16x1x128xf32, #tpu.memory_space<vmem>>, vector<1x1x128xf32>
    %448 = vector.shape_cast %447 : vector<1x1x128xf32> to vector<1x128xf32>
    %449 = vector.broadcast %448 : vector<1x128xf32> to vector<8x128xf32>
    %450 = arith.addf %446, %449 : vector<8x128xf32>
    %451 = vector.extract_strided_slice %301 {offsets = [0, 11], sizes = [8, 1], strides = [1, 1]} : vector<8x16xf32> to vector<8x1xf32>
    %452 = vector.broadcast %451 : vector<8x1xf32> to vector<8x128xf32>
    %453 = arith.mulf %452, %450 : vector<8x128xf32>
    %454 = arith.addf %443, %453 : vector<8x128xf32>
    %c12_278 = arith.constant 12 : index
    %c0_279 = arith.constant 0 : index
    %c0_280 = arith.constant 0 : index
    %455 = vector.load %arg9[%c12_278, %c0_279, %c0_280] : memref<16x128x32xf32, #tpu.memory_space<vmem>>, vector<1x128x32xf32>
    %456 = vector.shape_cast %455 : vector<1x128x32xf32> to vector<128x32xf32>
    %cst_281 = arith.constant dense<0.000000e+00> : vector<8x128xf32>
    %457 = tpu.matmul %317, %456, %cst_281 {dimension_numbers = #tpu.dot_dimension_numbers<[1], [1], [0], [0], [0, 0, 1, 0], [], []>} : vector<8x32xf32>, vector<128x32xf32>, vector<8x128xf32> -> vector<8x128xf32>
    %c12_282 = arith.constant 12 : index
    %c0_283 = arith.constant 0 : index
    %c0_284 = arith.constant 0 : index
    %458 = vector.load %arg12[%c12_282, %c0_283, %c0_284] : memref<16x1x128xf32, #tpu.memory_space<vmem>>, vector<1x1x128xf32>
    %459 = vector.shape_cast %458 : vector<1x1x128xf32> to vector<1x128xf32>
    %460 = vector.broadcast %459 : vector<1x128xf32> to vector<8x128xf32>
    %461 = arith.addf %457, %460 : vector<8x128xf32>
    %462 = vector.extract_strided_slice %301 {offsets = [0, 12], sizes = [8, 1], strides = [1, 1]} : vector<8x16xf32> to vector<8x1xf32>
    %463 = vector.broadcast %462 : vector<8x1xf32> to vector<8x128xf32>
    %464 = arith.mulf %463, %461 : vector<8x128xf32>
    %465 = arith.addf %454, %464 : vector<8x128xf32>
    %c13_285 = arith.constant 13 : index
    %c0_286 = arith.constant 0 : index
    %c0_287 = arith.constant 0 : index
    %466 = vector.load %arg9[%c13_285, %c0_286, %c0_287] : memref<16x128x32xf32, #tpu.memory_space<vmem>>, vector<1x128x32xf32>
    %467 = vector.shape_cast %466 : vector<1x128x32xf32> to vector<128x32xf32>
    %cst_288 = arith.constant dense<0.000000e+00> : vector<8x128xf32>
    %468 = tpu.matmul %317, %467, %cst_288 {dimension_numbers = #tpu.dot_dimension_numbers<[1], [1], [0], [0], [0, 0, 1, 0], [], []>} : vector<8x32xf32>, vector<128x32xf32>, vector<8x128xf32> -> vector<8x128xf32>
    %c13_289 = arith.constant 13 : index
    %c0_290 = arith.constant 0 : index
    %c0_291 = arith.constant 0 : index
    %469 = vector.load %arg12[%c13_289, %c0_290, %c0_291] : memref<16x1x128xf32, #tpu.memory_space<vmem>>, vector<1x1x128xf32>
    %470 = vector.shape_cast %469 : vector<1x1x128xf32> to vector<1x128xf32>
    %471 = vector.broadcast %470 : vector<1x128xf32> to vector<8x128xf32>
    %472 = arith.addf %468, %471 : vector<8x128xf32>
    %473 = vector.extract_strided_slice %301 {offsets = [0, 13], sizes = [8, 1], strides = [1, 1]} : vector<8x16xf32> to vector<8x1xf32>
    %474 = vector.broadcast %473 : vector<8x1xf32> to vector<8x128xf32>
    %475 = arith.mulf %474, %472 : vector<8x128xf32>
    %476 = arith.addf %465, %475 : vector<8x128xf32>
    %c14_292 = arith.constant 14 : index
    %c0_293 = arith.constant 0 : index
    %c0_294 = arith.constant 0 : index
    %477 = vector.load %arg9[%c14_292, %c0_293, %c0_294] : memref<16x128x32xf32, #tpu.memory_space<vmem>>, vector<1x128x32xf32>
    %478 = vector.shape_cast %477 : vector<1x128x32xf32> to vector<128x32xf32>
    %cst_295 = arith.constant dense<0.000000e+00> : vector<8x128xf32>
    %479 = tpu.matmul %317, %478, %cst_295 {dimension_numbers = #tpu.dot_dimension_numbers<[1], [1], [0], [0], [0, 0, 1, 0], [], []>} : vector<8x32xf32>, vector<128x32xf32>, vector<8x128xf32> -> vector<8x128xf32>
    %c14_296 = arith.constant 14 : index
    %c0_297 = arith.constant 0 : index
    %c0_298 = arith.constant 0 : index
    %480 = vector.load %arg12[%c14_296, %c0_297, %c0_298] : memref<16x1x128xf32, #tpu.memory_space<vmem>>, vector<1x1x128xf32>
    %481 = vector.shape_cast %480 : vector<1x1x128xf32> to vector<1x128xf32>
    %482 = vector.broadcast %481 : vector<1x128xf32> to vector<8x128xf32>
    %483 = arith.addf %479, %482 : vector<8x128xf32>
    %484 = vector.extract_strided_slice %301 {offsets = [0, 14], sizes = [8, 1], strides = [1, 1]} : vector<8x16xf32> to vector<8x1xf32>
    %485 = vector.broadcast %484 : vector<8x1xf32> to vector<8x128xf32>
    %486 = arith.mulf %485, %483 : vector<8x128xf32>
    %487 = arith.addf %476, %486 : vector<8x128xf32>
    %c15_299 = arith.constant 15 : index
    %c0_300 = arith.constant 0 : index
    %c0_301 = arith.constant 0 : index
    %488 = vector.load %arg9[%c15_299, %c0_300, %c0_301] : memref<16x128x32xf32, #tpu.memory_space<vmem>>, vector<1x128x32xf32>
    %489 = vector.shape_cast %488 : vector<1x128x32xf32> to vector<128x32xf32>
    %cst_302 = arith.constant dense<0.000000e+00> : vector<8x128xf32>
    %490 = tpu.matmul %317, %489, %cst_302 {dimension_numbers = #tpu.dot_dimension_numbers<[1], [1], [0], [0], [0, 0, 1, 0], [], []>} : vector<8x32xf32>, vector<128x32xf32>, vector<8x128xf32> -> vector<8x128xf32>
    %c15_303 = arith.constant 15 : index
    %c0_304 = arith.constant 0 : index
    %c0_305 = arith.constant 0 : index
    %491 = vector.load %arg12[%c15_303, %c0_304, %c0_305] : memref<16x1x128xf32, #tpu.memory_space<vmem>>, vector<1x1x128xf32>
    %492 = vector.shape_cast %491 : vector<1x1x128xf32> to vector<1x128xf32>
    %493 = vector.broadcast %492 : vector<1x128xf32> to vector<8x128xf32>
    %494 = arith.addf %490, %493 : vector<8x128xf32>
    %495 = vector.extract_strided_slice %301 {offsets = [0, 15], sizes = [8, 1], strides = [1, 1]} : vector<8x16xf32> to vector<8x1xf32>
    %496 = vector.broadcast %495 : vector<8x1xf32> to vector<8x128xf32>
    %497 = arith.mulf %496, %494 : vector<8x128xf32>
    %498 = arith.addf %487, %497 : vector<8x128xf32>
    %c0_306 = arith.constant 0 : index
    %c0_307 = arith.constant 0 : index
    %499 = vector.load %arg19[%c0_306, %c0_307] : memref<8x128xf32, #tpu.memory_space<vmem>>, vector<8x128xf32>
    tpu.vector_store %arg19[%c0_306, %c0_307], %498 {strides = array<i32>} : memref<8x128xf32, #tpu.memory_space<vmem>>, vector<8x128xf32>,
    return
  }
  func.func @transform_0(%arg0: i32) -> (i32, i32) {
    %c0_i32 = arith.constant 0 : i32
    %c0_i32_0 = arith.constant 0 : i32
    return %arg0, %c0_i32 : i32, i32
  }
  func.func @transform_1(%arg0: i32) -> (i32, i32) {
    %c0_i32 = arith.constant 0 : i32
    %c0_i32_0 = arith.constant 0 : i32
    return %arg0, %c0_i32 : i32, i32
  }
  func.func @transform_2(%arg0: i32) -> (i32, i32, i32) {
    %c0_i32 = arith.constant 0 : i32
    %c0_i32_0 = arith.constant 0 : i32
    %c0_i32_1 = arith.constant 0 : i32
    %c0_i32_2 = arith.constant 0 : i32
    return %c0_i32, %c0_i32_0, %c0_i32_1 : i32, i32, i32
  }
  func.func @transform_3(%arg0: i32) -> (i32, i32, i32) {
    %c0_i32 = arith.constant 0 : i32
    %c0_i32_0 = arith.constant 0 : i32
    %c0_i32_1 = arith.constant 0 : i32
    %c0_i32_2 = arith.constant 0 : i32
    return %c0_i32, %c0_i32_0, %c0_i32_1 : i32, i32, i32
  }
  func.func @transform_4(%arg0: i32) -> (i32, i32, i32) {
    %c0_i32 = arith.constant 0 : i32
    %c0_i32_0 = arith.constant 0 : i32
    %c0_i32_1 = arith.constant 0 : i32
    %c0_i32_2 = arith.constant 0 : i32
    return %c0_i32, %c0_i32_0, %c0_i32_1 : i32, i32, i32
  }
  func.func @transform_5(%arg0: i32) -> (i32, i32, i32) {
    %c0_i32 = arith.constant 0 : i32
    %c0_i32_0 = arith.constant 0 : i32
    %c0_i32_1 = arith.constant 0 : i32
    %c0_i32_2 = arith.constant 0 : i32
    return %c0_i32, %c0_i32_0, %c0_i32_1 : i32, i32, i32
  }
  func.func @transform_6(%arg0: i32) -> (i32, i32, i32) {
    %c0_i32 = arith.constant 0 : i32
    %c0_i32_0 = arith.constant 0 : i32
    %c0_i32_1 = arith.constant 0 : i32
    %c0_i32_2 = arith.constant 0 : i32
    return %c0_i32, %c0_i32_0, %c0_i32_1 : i32, i32, i32
  }
  func.func @transform_7(%arg0: i32) -> (i32, i32, i32) {
    %c0_i32 = arith.constant 0 : i32
    %c0_i32_0 = arith.constant 0 : i32
    %c0_i32_1 = arith.constant 0 : i32
    %c0_i32_2 = arith.constant 0 : i32
    return %c0_i32, %c0_i32_0, %c0_i32_1 : i32, i32, i32
  }
  func.func @transform_8(%arg0: i32) -> (i32, i32, i32) {
    %c0_i32 = arith.constant 0 : i32
    %c0_i32_0 = arith.constant 0 : i32
    %c0_i32_1 = arith.constant 0 : i32
    %c0_i32_2 = arith.constant 0 : i32
    return %c0_i32, %c0_i32_0, %c0_i32_1 : i32, i32, i32
  }
  func.func @transform_9(%arg0: i32) -> (i32, i32, i32) {
    %c0_i32 = arith.constant 0 : i32
    %c0_i32_0 = arith.constant 0 : i32
    %c0_i32_1 = arith.constant 0 : i32
    %c0_i32_2 = arith.constant 0 : i32
    return %c0_i32, %c0_i32_0, %c0_i32_1 : i32, i32, i32
  }
  func.func @transform_10(%arg0: i32) -> (i32, i32, i32) {
    %c0_i32 = arith.constant 0 : i32
    %c0_i32_0 = arith.constant 0 : i32
    %c0_i32_1 = arith.constant 0 : i32
    %c0_i32_2 = arith.constant 0 : i32
    return %c0_i32, %c0_i32_0, %c0_i32_1 : i32, i32, i32
  }
  func.func @transform_11(%arg0: i32) -> (i32, i32, i32) {
    %c0_i32 = arith.constant 0 : i32
    %c0_i32_0 = arith.constant 0 : i32
    %c0_i32_1 = arith.constant 0 : i32
    %c0_i32_2 = arith.constant 0 : i32
    return %c0_i32, %c0_i32_0, %c0_i32_1 : i32, i32, i32
  }
  func.func @transform_12(%arg0: i32) -> (i32, i32) {
    %c0_i32 = arith.constant 0 : i32
    %c0_i32_0 = arith.constant 0 : i32
    %c0_i32_1 = arith.constant 0 : i32
    return %c0_i32, %c0_i32_0 : i32, i32
  }
  func.func @transform_13(%arg0: i32) -> (i32, i32) {
    %c0_i32 = arith.constant 0 : i32
    %c0_i32_0 = arith.constant 0 : i32
    %c0_i32_1 = arith.constant 0 : i32
    return %c0_i32, %c0_i32_0 : i32, i32
  }
  func.func @transform_14(%arg0: i32) -> (i32, i32) {
    %c0_i32 = arith.constant 0 : i32
    %c0_i32_0 = arith.constant 0 : i32
    %c0_i32_1 = arith.constant 0 : i32
    return %c0_i32, %c0_i32_0 : i32, i32
  }
  func.func @transform_15(%arg0: i32) -> (i32, i32) {
    %c0_i32 = arith.constant 0 : i32
    %c0_i32_0 = arith.constant 0 : i32
    %c0_i32_1 = arith.constant 0 : i32
    return %c0_i32, %c0_i32_0 : i32, i32
  }
  func.func @transform_16(%arg0: i32) -> (i32, i32) {
    %c0_i32 = arith.constant 0 : i32
    %c0_i32_0 = arith.constant 0 : i32
    %c0_i32_1 = arith.constant 0 : i32
    return %c0_i32, %c0_i32_0 : i32, i32
  }
  func.func @transform_17(%arg0: i32) -> (i32, i32) {
    %c0_i32 = arith.constant 0 : i32
    %c0_i32_0 = arith.constant 0 : i32
    %c0_i32_1 = arith.constant 0 : i32
    return %c0_i32, %c0_i32_0 : i32, i32
  }
  func.func @transform_18(%arg0: i32) -> (i32, i32) {
    %c0_i32 = arith.constant 0 : i32
    %c0_i32_0 = arith.constant 0 : i32
    return %arg0, %c0_i32 : i32, i32
  }
}

</mosaic_0001>

<bundles_post_ra>
// kernel: tpu_custom_call.1
= control target key start
LH: loop header
LB: loop body
LE: loop exit
PB: predicated region body
PF: predicated region fallthrough
CT: control target
= control target key end

     0   :  { %s5561_s0 = inlined_call_operand.vmem [shape: f32[8,8], index: 0, kind: input, shape index: {}]   ;;  %s5562_s1 = inlined_call_operand.vmem [shape: f32[8,4], index: 1, kind: input, shape index: {}]   ;;  %s5563_s2 = inlined_call_operand.vmem [shape: f32[3,32,8], index: 2, kind: input, shape index: {}]   ;;  %s5564_s3 = inlined_call_operand.vmem [shape: f32[3,32,32], index: 3, kind: input, shape index: {}]   ;;  %s5565_s4 = inlined_call_operand.vmem [shape: f32[3,1,32], index: 4, kind: input, shape index: {}]   ;;  %s5566_s5 = inlined_call_operand.vmem [shape: f32[3,1,32], index: 5, kind: input, shape index: {}]   ;;  %s5567_s6 = inlined_call_operand.vmem [shape: f32[4,16,32], index: 6, kind: input, shape index: {}]   ;;  %s5568_s7 = inlined_call_operand.vmem [shape: f32[16,16,32], index: 7, kind: input, shape index: {}]   ;;  %s5569_s8 = inlined_call_operand.vmem [shape: f32[16,128,32], index: 8, kind: input, shape index: {}]   ;;  %s5570_s9 = inlined_call_operand.vmem [shape: f32[4,1,16], index: 9, kind: input, shape index: {}]   ;;  %s5571_s10 = inlined_call_operand.vmem [shape: f32[16,1,16], index: 10, kind: input, shape index: {}]   ;;  %s5572_s11 = inlined_call_operand.vmem [shape: f32[16,1,128], index: 11, kind: input, shape index: {}]   ;;  %s5573_s12 = inlined_call_operand.vmem [shape: f32[16,32], index: 12, kind: input, shape index: {}]   ;;  %s5574_s13 = inlined_call_operand.vmem [shape: f32[16,32], index: 13, kind: input, shape index: {}]   ;;  %s5575_s14 = inlined_call_operand.vmem [shape: f32[128,32], index: 14, kind: input, shape index: {}]   ;;  %s5576_s15 = inlined_call_operand.vmem [shape: f32[1,16], index: 15, kind: input, shape index: {}]   ;;  %s5577_s16 = inlined_call_operand.vmem [shape: f32[1,16], index: 16, kind: input, shape index: {}]   ;;  %s5578_s17 = inlined_call_operand.vmem [shape: f32[1,128], index: 17, kind: input, shape index: {}]   ;;  %s5579_s18 = inlined_call_operand.hbm [shape: f32[8,128], index: 18, kind: output, shape index: {}]  }
   0x1   :  { %5581 = sst [smem:[#allocation5_spill]] %s5561_s0 }
   0x2   :  { %5582 = sst [smem:[#allocation6_spill]] %s5562_s1 }
   0x3   :  { %5583 = sst [smem:[#allocation7_spill]] %s5563_s2 }
   0x4   :  { %s5584_s29 = sld [smem:[#allocation7_spill]]  ;;  %vm70_vm0 = vcmask 64512   ;;  %vm115_vm1 = vcmask 261120   ;;  %v110_v4 = vld [vmem:[%s5564_s3 + $0x18] sm:$0xff]  ;;  %v109_v6 = vld [vmem:[%s5564_s3 + $0x10] sm:$0xff] }
   0x5   :  { %s5585_s25 = sld [smem:[#allocation5_spill]] }
   0xa   :  { %v65_v0 = vld [vmem:[%s5584_s29 + $0x18] sm:$0xff]  ;;  %v64_v1 = vld [vmem:[%s5584_s29 + $0x10] sm:$0xff]  ;;  %v63_v2 = vld [vmem:[%s5584_s29 + $0x8] sm:$0xff] }
   0xb   :  { %2895 = vmatpush.xpose.msk.msra.mxu1 %vm70_vm0, %v65_v0  ;;  %v62_v3 = vld [vmem:[%s5584_s29] sm:$0xff] }
   0xc   :  { %v3890_v5 = vld [vmem:[%s5585_s25] sm:$0xff] }
   0xf   :  { %2896 = vmatpush.xpose.msk.msra.mxu1 %vm70_vm0, %v64_v1 }
  0x13   :  { %2897 = vmatpush.xpose.msk.msra.mxu1 %vm70_vm0, %v63_v2 }
  0x17   :  { %2898 = vmatpush.xpose.msk.msra.mxu1 %vm70_vm0, %v62_v3 }
  0x1a   :  { %2899 = vmatmul.msk.f32.vlgmr.msra.gmra.mxu1 %vm70_vm0, %v3890_v5 }
  0x1b   :  { %2900 = vmatpush.xpose.msk.msrb.mxu1 %vm115_vm1, %v110_v4 }
  0x1c   :  { %23 = vsyncpa [#allocation3], 0  ;;  %v108_v7 = vld [vmem:[%s5564_s3 + $0x8] sm:$0xff]  ;;  %v107_v8 = vld [vmem:[%s5564_s3] sm:$0xff]  ;;  %s5586_s19 = sld [smem:[#allocation6_spill]]  ;;  %v3756_v26 = vmov 0  }
  0x1d   :  { %v2932_v9 = vld [vmem:[%s5584_s29 + $0x38] sm:$0xff]  ;;  %v2931_v10 = vld [vmem:[%s5584_s29 + $0x30] sm:$0xff]  ;;  %v2930_v11 = vld [vmem:[%s5584_s29 + $0x28] sm:$0xff]  ;;  %3627 = vset.pattern.permute.xlu0 %v3756_v26  ;;  %v3757_v27 = vmov 2   ;;  %v3758_v29 = vmov 1   ;;  %v3759_v32 = vmov 3  }
  0x1e   :  { %v2929_v12 = vld [vmem:[%s5584_s29 + $0x20] sm:$0xff]  ;;  %v153_v17 = vld [vmem:[%s5573_s12 + $0x8] sm:$0xff]  ;;  %v2912_v21 = vld [vmem:[%s5567_s6 + $0x18] sm:$0xff]  ;;  %3629 = vset.pattern.permute.xlu1 %v3757_v27  ;;  %3632 = vset.pattern.permute.xlu2 %v3758_v29  ;;  %vm346_vm2 = vcmask 130048   ;;  %s3773_s28 = smov [#allocation2]  }
  0x1f   :  { %2901 = vmatpush.xpose.msk.msrb.mxu1 %vm115_vm1, %v109_v6  ;;  %v3663_v13 = vld [vmem:[%s5565_s4] ss:$0 sm:$0xff]  ;;  %v188_v18 = vld [vmem:[%s5567_s6 + $0x8] sm:$0xff]  ;;  %2905 = vmatpush.xpose.msk.msra.mxu2 %vm115_vm1, %v153_v17  ;;  %v2911_v23 = vld [vmem:[%s5567_s6 + $0x10] sm:$0xff]  ;;  %s2884_s30 = sshll.u32 %s3773_s28, 4  ;;  %s2885_s30 = int_to_ptr.vmem [resolvable:$true] %s2884_s30 }
  0x20   :  { %2908 = vmatpush.xpose.msk.msra.mxu3 %vm115_vm1, %v188_v18  ;;  %v152_v19 = vld [vmem:[%s5573_s12] sm:$0xff]  ;;  %v2918_v22 = vld [vmem:[%s5567_s6 + $0x28] sm:$0xff]  ;;  %v2924_v33 = vld [vmem:[%s5567_s6 + $0x38] sm:$0xff] }
  0x21   :  { %v187_v20 = vld [vmem:[%s5567_s6] sm:$0xff]  ;;  %v2923_v35 = vld [vmem:[%s5567_s6 + $0x30] sm:$0xff]  ;;  %v2942_v36 = vld [vmem:[%s5564_s3 + $0x38] sm:$0xff] }
  0x22   :  { %v2917_v24 = vld [vmem:[%s5567_s6 + $0x20] sm:$0xff]  ;;  %v2941_v39 = vld [vmem:[%s5564_s3 + $0x30] sm:$0xff]  ;;  %v2940_v41 = vld [vmem:[%s5564_s3 + $0x28] sm:$0xff] }
  0x23   :  { %2902 = vmatpush.xpose.msk.msrb.mxu1 %vm115_vm1, %v108_v7  ;;  %2906 = vmatpush.xpose.msk.msra.mxu2 %vm115_vm1, %v152_v19  ;;  %v61_v25 = vld [vmem:[%s5586_s19] sm:$0xff]  ;;  %v2974_v44 = vld [vmem:[%s5568_s7 + $0x48] sm:$0xff]  ;;  %v3048_v19 = vld [vmem:[%s5584_s29 + $0x58] sm:$0xff]  ;;  %s2886_s19 = sshll.u32 %s5579_s18, 4  ;;  %s2887_s19 = int_to_ptr.hbm [resolvable:$true] %s2886_s19 }
  0x24   :  { %2909 = vmatpush.xpose.msk.msra.mxu3 %vm115_vm1, %v187_v20  ;;  %221 = vperm.xlu0 %3627, %v61_v25   ;;  %v3664_v28 = vld [vmem:[%s5566_s5] ss:$0 sm:$0xff]  ;;  %v3665_v37 = vld [vmem:[%s5565_s4 + $0x1] ss:$0 sm:$0xff]  ;;  %v2998_v47 = vld [vmem:[%s5568_s7 + $0x88] sm:$0xff] }
  0x25   :  { %301 = vperm.xlu1 %3629, %v61_v25   ;;  %v2939_v42 = vld [vmem:[%s5564_s3 + $0x20] sm:$0xff]  ;;  %v3047_v20 = vld [vmem:[%s5584_s29 + $0x50] sm:$0xff] }
  0x26   :  { %v2973_v45 = vld [vmem:[%s5568_s7 + $0x40] sm:$0xff] }
  0x27   :  { %2903 = vmatpush.xpose.msk.msrb.mxu1 %vm115_vm1, %v107_v8  ;;  %2914 = vmatpush.xpose.msk.msrb.mxu2 %vm115_vm1, %v2912_v21  ;;  %v3667_v50 = vld [vmem:[%s5570_s9] ss:$0 sm:$0xff]  ;;  %v3668_v53 = vld [vmem:[%s5570_s9 + $0x1] ss:$0 sm:$0xff]  ;;  %v3669_v60 = vld [vmem:[%s5570_s9 + $0x2] ss:$0 sm:$0xff] }
  0x28   :  { %2920 = vmatpush.xpose.msk.msrb.mxu3 %vm115_vm1, %v2918_v22  ;;  %v2997_v51 = vld [vmem:[%s5568_s7 + $0x80] sm:$0xff]  ;;  %v3046_v21 = vld [vmem:[%s5584_s29 + $0x48] sm:$0xff] }
  0x29   :  { %v3666_v55 = vld [vmem:[%s5576_s15] ss:$0 sm:$0xff]  ;;  %v3670_v2 = vld [vmem:[%s5570_s9 + $0x3] ss:$0 sm:$0xff] }
  0x2a   :  { %v3021_v18 = vld [vmem:[%s5568_s7 + $0xc0] sm:$0xff] }
  0x2b   :  { %2934 = vmatpush.xpose.msk.msra.mxu1 %vm70_vm0, %v2932_v9  ;;  %2915 = vmatpush.xpose.msk.msrb.mxu2 %vm115_vm1, %v2911_v23  ;;  %v3045_v22 = vld [vmem:[%s5584_s29 + $0x40] sm:$0xff]  ;;  %v3760_v23 = vmov 16.0  }
  0x2c   :  { %2921 = vmatpush.xpose.msk.msrb.mxu3 %vm115_vm1, %v2917_v24  ;;  %3628 = vset.pattern.permute.xlu0 %v3758_v29  ;;  %v467_v24 = vld [vmem:[%s5574_s13 + $0x8] sm:$0xff] }
  0x2d   :  { %3630 = vset.pattern.permute.xlu1 %v3759_v32  ;;  %261 = vperm.xlu0 %3628, %v61_v25  }
  0x2e   :  { %341 = vperm.xlu1 %3630, %v61_v25   ;;  %v466_v25 = vld [vmem:[%s5574_s13] sm:$0xff] }
  0x2f   :  { %2935 = vmatpush.xpose.msk.msra.mxu1 %vm70_vm0, %v2931_v10 }
  0x33   :  { %2936 = vmatpush.xpose.msk.msra.mxu1 %vm70_vm0, %v2930_v11 }
  0x35   :  { %3633 = vset.pattern.permute.xlu0 %v3757_v27 }
  0x36   :  { %3631 = vset.pattern.permute.xlu1 %v3756_v26 }
  0x37   :  { %2937 = vmatpush.xpose.msk.msra.mxu1 %vm70_vm0, %v2929_v12  ;;  %v3671_v12 = vld [vmem:[%s5566_s5 + $0x1] ss:$0 sm:$0xff] }
  0x96   :  { %v222_v46 = vpop.permute.xlu0 %221 }
  0x97   :  { %v103_v14 = vpop.f32.mrf.mxu1  ;;  %v302_v54 = vpop.permute.xlu1 %301 }
  0x98   :  { %v104_v15 = vadd.f32 %v3663_v13, %v103_v14 }
  0x9a   :  { %3708 = vtanh.f32 %v104_v15 }
  0x9f   :  { %v262_v57 = vpop.permute.xlu0 %261 }
  0xa0   :  { %v3709_v16 = vpop.eup %3708  ;;  %v342_v6 = vpop.permute.xlu1 %341 }
  0xa1   :  { %2904 = vmatmul.msk.f32.vlgmr.msrb.gmra.mxu1 %vm115_vm1, %v3709_v16  ;;  %v3022_v16 = vld [vmem:[%s5568_s7 + $0xc8] sm:$0xff] }
  0xa9   :  { %2938 = vmatmul.msk.f32.vlgmr.msra.gmra.mxu1 %vm70_vm0, %v3890_v5 }
 0x11e   :  { %v148_v30 = vpop.f32.mrf.mxu1 }
 0x11f   :  { %v149_v31 = vadd.f32 %v3664_v28, %v148_v30  ;;  %v502_v30 = vld [vmem:[%s5568_s7 + $0x8] sm:$0xff] }
 0x121   :  { %3710 = vtanh.f32 %v149_v31  ;;  %v501_v31 = vld [vmem:[%s5568_s7] sm:$0xff] }
 0x126   :  { %v416_v38 = vpop.f32.mrf.mxu1 }
 0x127   :  { %v3711_v34 = vpop.eup %3710  ;;  %v417_v40 = vadd.f32 %v3665_v37, %v416_v38  ;;  %v2980_v38 = vld [vmem:[%s5568_s7 + $0x58] sm:$0xff] }
 0x128   :  { %2907 = vmatmul.msk.f32.vlgmr.msra.gmra.mxu2 %vm115_vm1, %v3711_v34  ;;  %2910 = vmatmul.msk.f32.vlgmr.msra.gmra.mxu3 %vm115_vm1, %v3711_v34 }
 0x129   :  { %2926 = vmatpush.xpose.msk.msra.mxu2 %vm115_vm1, %v2924_v33  ;;  %3712 = vtanh.f32 %v417_v40  ;;  %2949 = vmatpush.xpose.msk.msra.mxu3 %vm115_vm1, %v467_v24  ;;  %v2956_v33 = vld [vmem:[%s5568_s7 + $0x18] sm:$0xff]  ;;  %v2979_v40 = vld [vmem:[%s5568_s7 + $0x50] sm:$0xff] }
 0x12d   :  { %2927 = vmatpush.xpose.msk.msra.mxu2 %vm115_vm1, %v2923_v35  ;;  %2950 = vmatpush.xpose.msk.msra.mxu3 %vm115_vm1, %v466_v25  ;;  %v2955_v35 = vld [vmem:[%s5568_s7 + $0x10] sm:$0xff]  ;;  %v1261_v25 = vld [vmem:[%s5575_s14 + $0x48] sm:$0xff] }
 0x12f   :  { %v3713_v43 = vpop.eup %3712 }
 0x130   :  { %2916 = vmatmul.msk.f32.vlgmr.msrb.gmra.mxu2 %vm115_vm1, %v3711_v34  ;;  %2922 = vmatmul.msk.f32.vlgmr.msrb.gmra.mxu3 %vm115_vm1, %v3711_v34 }
 0x131   :  { %2944 = vmatpush.xpose.msk.msrb.mxu2 %vm115_vm1, %v2942_v36  ;;  %2952 = vmatpush.xpose.msk.msrb.mxu3 %vm115_vm1, %v502_v30 }
 0x135   :  { %2945 = vmatpush.xpose.msk.msrb.mxu2 %vm115_vm1, %v2941_v39  ;;  %2953 = vmatpush.xpose.msk.msrb.mxu3 %vm115_vm1, %v501_v31  ;;  %v1260_v31 = vld [vmem:[%s5575_s14 + $0x40] sm:$0xff] }
 0x138   :  { %2928 = vmatmul.msk.f32.vlgmr.msra.gmra.mxu2 %vm115_vm1, %v3711_v34 }
 0x139   :  { %2946 = vmatpush.xpose.msk.msrb.mxu2 %vm115_vm1, %v2940_v41 }
 0x13d   :  { %2947 = vmatpush.xpose.msk.msrb.mxu2 %vm115_vm1, %v2939_v42 }
 0x140   :  { %2948 = vmatmul.msk.f32.vlgmr.msrb.gmra.mxu2 %vm115_vm1, %v3713_v43 }
 0x141   :  { %2976 = vmatpush.xpose.msk.msra.mxu2 %vm115_vm1, %v2974_v44  ;;  %v3004_v44 = vld [vmem:[%s5568_s7 + $0x98] sm:$0xff] }
 0x145   :  { %2977 = vmatpush.xpose.msk.msra.mxu2 %vm115_vm1, %v2973_v45  ;;  %v2962_v45 = vld [vmem:[%s5568_s7 + $0x28] sm:$0xff] }
 0x146   :  { %2964 = vmatpush.xpose.msk.msrb.mxu1 %vm115_vm1, %v2962_v45  ;;  %v1254_v45 = vld [vmem:[%s5575_s14 + $0x10] sm:$0xff] }
 0x149   :  { %3000 = vmatpush.xpose.msk.msrb.mxu2 %vm115_vm1, %v2998_v47  ;;  %v3003_v47 = vld [vmem:[%s5568_s7 + $0x90] sm:$0xff] }
 0x14d   :  { %3001 = vmatpush.xpose.msk.msrb.mxu2 %vm115_vm1, %v2997_v51  ;;  %v3027_v51 = vld [vmem:[%s5568_s7 + $0xd0] sm:$0xff] }
 0x1ab   :  { %v184_v48 = vpop.f32.mrf.mxu2  ;;  %v216_v49 = vpop.f32.mrf.mxu3 }
 0x1ac   :  { %v217_v52 = vadd.f32 %v3667_v50, %v216_v49  ;;  %v185_v62 = vadd.f32 %v3666_v55, %v184_v48  ;;  %v2961_v48 = vld [vmem:[%s5568_s7 + $0x20] sm:$0xff]  ;;  %v3028_v50 = vld [vmem:[%s5568_s7 + $0xd8] sm:$0xff]  ;;  %v3057_v55 = vld [vmem:[%s5564_s3 + $0x50] sm:$0xff] }
 0x1ad   :  { %2965 = vmatpush.xpose.msk.msrb.mxu1 %vm115_vm1, %v2961_v48  ;;  %v3114_v48 = vld [vmem:[%s5569_s8 + $0xf8] sm:$0xff] }
 0x1ae   :  { %v224_v58 = vmul.f32 %v222_v46, %v217_v52  ;;  %v2968_v52 = vld [vmem:[%s5568_s7 + $0x38] sm:$0xff] }
 0x1b0   :  { %v225_v0 = vadd.f32 %v224_v58, %v185_v62  ;;  %v3056_v58 = vld [vmem:[%s5564_s3 + $0x48] sm:$0xff] }
 0x1b1   :  { %2970 = vmatpush.xpose.msk.msra.mxu1 %vm115_vm1, %v2968_v52  ;;  %v3765_v52 = vmov 4  }
 0x1b3   :  { %v257_v56 = vpop.f32.mrf.mxu2  ;;  %v297_v61 = vpop.f32.mrf.mxu3 }
 0x1b4   :  { %v258_v59 = vadd.f32 %v3668_v53, %v257_v56  ;;  %v298_v1 = vadd.f32 %v3669_v60, %v297_v61  ;;  %v3058_v53 = vld [vmem:[%s5564_s3 + $0x58] sm:$0xff]  ;;  %v3055_v60 = vld [vmem:[%s5564_s3 + $0x40] sm:$0xff] }
 0x1b5   :  { %v2992_v56 = vld [vmem:[%s5568_s7 + $0x78] sm:$0xff] }
 0x1b6   :  { %v264_v63 = vmul.f32 %v262_v57, %v258_v59  ;;  %v304_v7 = vmul.f32 %v302_v54, %v298_v1  ;;  %v2967_v54 = vld [vmem:[%s5568_s7 + $0x30] sm:$0xff]  ;;  %v2986_v57 = vld [vmem:[%s5568_s7 + $0x68] sm:$0xff] }
 0x1b7   :  { %2971 = vmatpush.xpose.msk.msra.mxu1 %vm115_vm1, %v2967_v54  ;;  %2988 = vmatpush.xpose.msk.msra.mxu0 %vm115_vm1, %v2986_v57  ;;  %v3182_v54 = vld [vmem:[%s5569_s8 + $0x1f8] sm:$0xff]  ;;  %v3113_v57 = vld [vmem:[%s5569_s8 + $0xf0] sm:$0xff] }
 0x1b8   :  { %v265_v3 = vadd.f32 %v264_v63, %v225_v0  ;;  %v3675_v63 = vld [vmem:[%s5565_s4 + $0x2] ss:$0 sm:$0xff] }
 0x1ba   :  { %v305_v10 = vadd.f32 %v304_v7, %v265_v3  ;;  %v2991_v3 = vld [vmem:[%s5568_s7 + $0x70] sm:$0xff]  ;;  %v3016_v7 = vld [vmem:[%s5568_s7 + $0xb8] sm:$0xff] }
 0x1bb   :  { %v337_v4 = vpop.f32.mrf.mxu2 }
 0x1bc   :  { %v338_v8 = vadd.f32 %v3670_v2, %v337_v4  ;;  %v2985_v4 = vld [vmem:[%s5568_s7 + $0x60] sm:$0xff] }
 0x1bd   :  { %2989 = vmatpush.xpose.msk.msra.mxu0 %vm115_vm1, %v2985_v4  ;;  %v3146_v4 = vld [vmem:[%s5569_s8 + $0x168] sm:$0xff] }
 0x1be   :  { %v344_v9 = vmul.f32 %v342_v6, %v338_v8  ;;  %v3010_v6 = vld [vmem:[%s5568_s7 + $0xa8] sm:$0xff]  ;;  %v3009_v8 = vld [vmem:[%s5568_s7 + $0xa0] sm:$0xff] }
 0x1c0   :  { %v345_v11 = vadd.f32 %v344_v9, %v305_v10  ;;  %v3015_v9 = vld [vmem:[%s5568_s7 + $0xb0] sm:$0xff]  ;;  %v3034_v10 = vld [vmem:[%s5568_s7 + $0xe8] sm:$0xff] }
 0x1c1   :  { %3012 = vmatpush.xpose.msk.msrb.mxu0 %vm115_vm1, %v3010_v6  ;;  %v3180_v6 = vld [vmem:[%s5569_s8 + $0x1e8] sm:$0xff] }
 0x1c2   :  { %v347_v13 = vsel %vm346_vm2, %v345_v11, 0.0 }
 0x1c3   :  { %348 = vadd.xlane.f32.xlu2 %v347_v13  ;;  %v462_v14 = vpop.f32.mrf.mxu2  ;;  %v3039_v13 = vld [vmem:[%s5568_s7 + $0xf0] sm:$0xff] }
 0x1c4   :  { %v463_v15 = vadd.f32 %v3671_v12, %v462_v14  ;;  %v3033_v12 = vld [vmem:[%s5568_s7 + $0xe0] sm:$0xff]  ;;  %v1267_v14 = vld [vmem:[%s5575_s14 + $0x78] sm:$0xff] }
 0x1c5   :  { %3013 = vmatpush.xpose.msk.msrb.mxu0 %vm115_vm1, %v3009_v8  ;;  %v1355_v8 = vld [vmem:[%s5569_s8 + $0x60] sm:$0xff] }
 0x1c6   :  { %3714 = vtanh.f32 %v463_v15  ;;  %v1266_v15 = vld [vmem:[%s5575_s14 + $0x70] sm:$0xff] }
 0x1c7   :  { %3716 = vrcp.f32 %v3760_v23 }
 0x1cc   :  { %v4046_v17 = vpop.eup %3714 }
 0x1cd   :  { %2978 = vmatmul.msk.f32.vlgmr.msra.gmra.mxu2 %vm115_vm1, %v4046_v17  ;;  %v3717_v28 = vpop.eup %3716  ;;  %2951 = vmatmul.msk.f32.vlgmr.msra.gmra.mxu3 %vm115_vm1, %v4046_v17 }
 0x1ce   :  { %3024 = vmatpush.xpose.msk.msra.mxu2 %vm115_vm1, %v3022_v16  ;;  %2958 = vmatpush.xpose.msk.msra.mxu3 %vm115_vm1, %v2956_v33  ;;  %vm355_vm3 = vweird.f32 %v3717_v28  ;;  %v1265_v16 = vld [vmem:[%s5575_s14 + $0x68] sm:$0xff] }
 0x1cf   :  { %2966 = vmatmul.msk.f32.vlgmr.msrb.gmra.mxu1 %vm115_vm1, %v4046_v17  ;;  %2990 = vmatmul.msk.f32.vlgmr.msra.gmra.mxu0 %vm115_vm1, %v4046_v17 }
 0x1d0   :  { %2994 = vmatpush.xpose.msk.msrb.mxu1 %vm115_vm1, %v2992_v56  ;;  %3036 = vmatpush.xpose.msk.msra.mxu0 %vm115_vm1, %v3034_v10  ;;  %v1357_v56 = vld [vmem:[%s5569_s8 + $0x70] sm:$0xff]  ;;  %v3145_v10 = vld [vmem:[%s5569_s8 + $0x160] sm:$0xff] }
 0x1d2   :  { %3025 = vmatpush.xpose.msk.msra.mxu2 %vm115_vm1, %v3021_v18  ;;  %2959 = vmatpush.xpose.msk.msra.mxu3 %vm115_vm1, %v2955_v35 }
 0x1d4   :  { %2995 = vmatpush.xpose.msk.msrb.mxu1 %vm115_vm1, %v2991_v3  ;;  %3037 = vmatpush.xpose.msk.msra.mxu0 %vm115_vm1, %v3033_v12  ;;  %v3768_v3 = vmov 6   ;;  %v1354_v12 = vld [vmem:[%s5569_s8 + $0x58] sm:$0xff] }
 0x1d5   :  { %3002 = vmatmul.msk.f32.vlgmr.msrb.gmra.mxu2 %vm115_vm1, %v4046_v17  ;;  %2954 = vmatmul.msk.f32.vlgmr.msrb.gmra.mxu3 %vm115_vm1, %v4046_v17 }
 0x1d6   :  { %3050 = vmatpush.xpose.msk.msrb.mxu2 %vm70_vm0, %v3048_v19  ;;  %2982 = vmatpush.xpose.msk.msrb.mxu3 %vm115_vm1, %v2980_v38  ;;  %v1257_v38 = vld [vmem:[%s5575_s14 + $0x28] sm:$0xff] }
 0x1d7   :  { %2972 = vmatmul.msk.f32.vlgmr.msra.gmra.mxu1 %vm115_vm1, %v4046_v17  ;;  %3014 = vmatmul.msk.f32.vlgmr.msrb.gmra.mxu0 %vm115_vm1, %v4046_v17 }
 0x1d8   :  { %3018 = vmatpush.xpose.msk.msra.mxu1 %vm115_vm1, %v3016_v7  ;;  %3065 = vmatpush.xpose.msk.msrb.mxu0 %vm115_vm1, %v1267_v14  ;;  %v3769_v14 = vmov 14  }
 0x1da   :  { %3051 = vmatpush.xpose.msk.msrb.mxu2 %vm70_vm0, %v3047_v20  ;;  %2983 = vmatpush.xpose.msk.msrb.mxu3 %vm115_vm1, %v2979_v40  ;;  %v1264_v20 = vld [vmem:[%s5575_s14 + $0x60] sm:$0xff] }
 0x1dc   :  { %3019 = vmatpush.xpose.msk.msra.mxu1 %vm115_vm1, %v3015_v9  ;;  %3066 = vmatpush.xpose.msk.msrb.mxu0 %vm115_vm1, %v1266_v15  ;;  %v3111_v9 = vld [vmem:[%s5569_s8 + $0xe0] sm:$0xff]  ;;  %v3770_v15 = vmov 8  }
 0x1dd   :  { %3026 = vmatmul.msk.f32.vlgmr.msra.gmra.mxu2 %vm115_vm1, %v4046_v17  ;;  %2960 = vmatmul.msk.f32.vlgmr.msra.gmra.mxu3 %vm115_vm1, %v4046_v17 }
 0x1de   :  { %3052 = vmatpush.xpose.msk.msrb.mxu2 %vm70_vm0, %v3046_v21  ;;  %3006 = vmatpush.xpose.msk.msra.mxu3 %vm115_vm1, %v3004_v44  ;;  %v1263_v21 = vld [vmem:[%s5575_s14 + $0x58] sm:$0xff]  ;;  %v3762_v44 = vmov 7  }
 0x1df   :  { %2996 = vmatmul.msk.f32.vlgmr.msrb.gmra.mxu1 %vm115_vm1, %v4046_v17  ;;  %3038 = vmatmul.msk.f32.vlgmr.msra.gmra.mxu0 %vm115_vm1, %v4046_v17 }
 0x1e0   :  { %3067 = vmatpush.xpose.msk.msrb.mxu0 %vm115_vm1, %v1265_v16  ;;  %v3144_v16 = vld [vmem:[%s5569_s8 + $0x158] sm:$0xff] }
 0x1e2   :  { %3053 = vmatpush.xpose.msk.msrb.mxu2 %vm70_vm0, %v3045_v22  ;;  %3007 = vmatpush.xpose.msk.msra.mxu3 %vm115_vm1, %v3003_v47  ;;  %v1262_v22 = vld [vmem:[%s5575_s14 + $0x50] sm:$0xff]  ;;  %v1358_v47 = vld [vmem:[%s5569_s8 + $0x78] sm:$0xff] }
 0x1e4   :  { %3068 = vmatpush.xpose.msk.msrb.mxu0 %vm115_vm1, %v1264_v20  ;;  %v3109_v20 = vld [vmem:[%s5569_s8 + $0xd0] sm:$0xff] }
 0x1e5   :  { %3054 = vmatmul.msk.f32.vlgmr.msrb.gmra.mxu2 %vm70_vm0, %v3890_v5  ;;  %v351_v5 = vmul.f32 16.0, %v3717_v28  ;;  %2984 = vmatmul.msk.f32.vlgmr.msrb.gmra.mxu3 %vm115_vm1, %v4046_v17 }
 0x1e6   :  { %3030 = vmatpush.xpose.msk.msrb.mxu3 %vm115_vm1, %v3028_v50  ;;  %v1252_v50 = vld [vmem:[%s5575_s14] sm:$0xff]  ;;  %3116 = vmatpush.xpose.msk.msra.mxu2 %vm115_vm1, %v3114_v48  ;;  %v3104_v48 = vld [vmem:[%s5569_s8 + $0xa8] sm:$0xff] }
 0x1e7   :  { %v352_v34 = vsub.f32 1.0, %v351_v5  ;;  %3020 = vmatmul.msk.f32.vlgmr.msra.gmra.mxu1 %vm115_vm1, %v4046_v17 }
 0x1e8   :  { %3069 = vmatpush.xpose.msk.msrb.mxu0 %vm115_vm1, %v1263_v21  ;;  %v3177_v21 = vld [vmem:[%s5569_s8 + $0x1d0] sm:$0xff] }
 0x1e9   :  { %v353_v36 = vmul.f32 %v3717_v28, %v352_v34  ;;  %v1259_v34 = vld [vmem:[%s5575_s14 + $0x38] sm:$0xff] }
 0x1ea   :  { %3031 = vmatpush.xpose.msk.msrb.mxu3 %vm115_vm1, %v3027_v51  ;;  %v3764_v51 = vmov 9   ;;  %3117 = vmatpush.xpose.msk.msra.mxu2 %vm115_vm1, %v3113_v57  ;;  %v3103_v57 = vld [vmem:[%s5569_s8 + $0xa0] sm:$0xff] }
 0x1eb   :  { %v354_v37 = vadd.f32 %v3717_v28, %v353_v36 }
 0x1ec   :  { %3070 = vmatpush.xpose.msk.msrb.mxu0 %vm115_vm1, %v1262_v22  ;;  %v1352_v22 = vld [vmem:[%s5569_s8 + $0x48] sm:$0xff] }
 0x1ed   :  { %v4109_v39 = vsel %vm355_vm3, %v3717_v28, %v354_v37  ;;  %3008 = vmatmul.msk.f32.vlgmr.msra.gmra.mxu3 %vm115_vm1, %v4046_v17  ;;  %v1258_v37 = vld [vmem:[%s5575_s14 + $0x30] sm:$0xff] }
 0x1ee   :  { %3060 = vmatpush.xpose.msk.msra.mxu3 %vm115_vm1, %v3058_v53  ;;  %v3148_v53 = vld [vmem:[%s5569_s8 + $0x178] sm:$0xff] }
 0x1f0   :  { %3071 = vmatpush.xpose.msk.msrb.mxu0 %vm115_vm1, %v1261_v25  ;;  %v3771_v25 = vmov 11  }
 0x1f2   :  { %3061 = vmatpush.xpose.msk.msra.mxu3 %vm115_vm1, %v3057_v55 }
 0x1f4   :  { %3072 = vmatpush.xpose.msk.msrb.mxu0 %vm115_vm1, %v1260_v31  ;;  %v3141_v31 = vld [vmem:[%s5569_s8 + $0x140] sm:$0xff] }
 0x1f5   :  { %3032 = vmatmul.msk.f32.vlgmr.msrb.gmra.mxu3 %vm115_vm1, %v4046_v17 }
 0x1f6   :  { %3062 = vmatpush.xpose.msk.msra.mxu3 %vm115_vm1, %v3056_v58  ;;  %v3147_v58 = vld [vmem:[%s5569_s8 + $0x170] sm:$0xff] }
 0x1f8   :  { %3073 = vmatpush.xpose.msk.msrb.mxu0 %vm115_vm1, %v1259_v34  ;;  %v1350_v34 = vld [vmem:[%s5569_s8 + $0x38] sm:$0xff] }
 0x1fa   :  { %3063 = vmatpush.xpose.msk.msra.mxu3 %vm115_vm1, %v3055_v60  ;;  %v3181_v60 = vld [vmem:[%s5569_s8 + $0x1f0] sm:$0xff] }
 0x1fc   :  { %3074 = vmatpush.xpose.msk.msrb.mxu0 %vm115_vm1, %v1258_v37  ;;  %v3174_v37 = vld [vmem:[%s5569_s8 + $0x1b8] sm:$0xff] }
 0x1fe   :  { %3150 = vmatpush.xpose.msk.msrb.mxu3 %vm115_vm1, %v3148_v53  ;;  %v3172_v53 = vld [vmem:[%s5569_s8 + $0x1a8] sm:$0xff] }
 0x200   :  { %3075 = vmatpush.xpose.msk.msrb.mxu0 %vm115_vm1, %v1257_v38  ;;  %v3772_v38 = vmov 13  }
 0x202   :  { %3151 = vmatpush.xpose.msk.msrb.mxu3 %vm115_vm1, %v3147_v58  ;;  %v3137_v58 = vld [vmem:[%s5569_s8 + $0x120] sm:$0xff] }
 0x206   :  { %3152 = vmatpush.xpose.msk.msrb.mxu3 %vm115_vm1, %v3146_v4  ;;  %v3136_v4 = vld [vmem:[%s5569_s8 + $0x118] sm:$0xff] }
 0x20a   :  { %3153 = vmatpush.xpose.msk.msrb.mxu3 %vm115_vm1, %v3145_v10  ;;  %v1345_v10 = vld [vmem:[%s5569_s8 + $0x10] sm:$0xff] }
 0x20e   :  { %3154 = vmatpush.xpose.msk.msrb.mxu3 %vm115_vm1, %v3144_v16  ;;  %v1344_v16 = vld [vmem:[%s5569_s8 + $0x8] sm:$0xff] }
 0x236   :  { %v349_v41 = vpop.xlane.xlu2 %348 }
 0x237   :  { %v357_v42 = vmul.f32 %v4109_v39, %v349_v41  ;;  %v1256_v41 = vld [vmem:[%s5575_s14 + $0x20] sm:$0xff] }
 0x238   :  { %3076 = vmatpush.xpose.msk.msrb.mxu0 %vm115_vm1, %v1256_v41 }
 0x239   :  { %v4118_v43 = vsub.f32 %v345_v11, %v357_v42  ;;  %v3040_v11 = vld [vmem:[%s5568_s7 + $0xf8] sm:$0xff] }
 0x23a   :  { %3042 = vmatpush.xpose.msk.msrb.mxu1 %vm115_vm1, %v3040_v11  ;;  %v1255_v42 = vld [vmem:[%s5575_s14 + $0x18] sm:$0xff]  ;;  %v3179_v11 = vld [vmem:[%s5569_s8 + $0x1e0] sm:$0xff] }
 0x23b   :  { %v359_v46 = vmul.f32 %v4118_v43, %v4118_v43 }
 0x23c   :  { %3077 = vmatpush.xpose.msk.msrb.mxu0 %vm115_vm1, %v1255_v42  ;;  %v1349_v42 = vld [vmem:[%s5569_s8 + $0x30] sm:$0xff] }
 0x23d   :  { %v360_v49 = vsel %vm346_vm2, %v359_v46, 0.0  ;;  %v1253_v46 = vld [vmem:[%s5575_s14 + $0x8] sm:$0xff] }
 0x23e   :  { %361 = vadd.xlane.f32.xlu2 %v360_v49  ;;  %3043 = vmatpush.xpose.msk.msrb.mxu1 %vm115_vm1, %v3039_v13  ;;  %v3763_v49 = vmov 10   ;;  %v3110_v13 = vld [vmem:[%s5569_s8 + $0xd8] sm:$0xff] }
 0x240   :  { %3078 = vmatpush.xpose.msk.msrb.mxu0 %vm115_vm1, %v1254_v45  ;;  %v3105_v45 = vld [vmem:[%s5569_s8 + $0xb0] sm:$0xff] }
 0x241   :  { %3044 = vmatmul.msk.f32.vlgmr.msrb.gmra.mxu1 %vm115_vm1, %v4046_v17 }
 0x242   :  { %3082 = vmatpush.xpose.msk.msra.mxu1 %vm115_vm1, %v1358_v47  ;;  %v1348_v47 = vld [vmem:[%s5569_s8 + $0x28] sm:$0xff] }
 0x244   :  { %3079 = vmatpush.xpose.msk.msrb.mxu0 %vm115_vm1, %v1253_v46  ;;  %v3139_v46 = vld [vmem:[%s5569_s8 + $0x130] sm:$0xff] }
 0x246   :  { %3083 = vmatpush.xpose.msk.msra.mxu1 %vm115_vm1, %v1357_v56  ;;  %v1347_v56 = vld [vmem:[%s5569_s8 + $0x20] sm:$0xff] }
 0x248   :  { %3080 = vmatpush.xpose.msk.msrb.mxu0 %vm115_vm1, %v1252_v50  ;;  %v3138_v50 = vld [vmem:[%s5569_s8 + $0x128] sm:$0xff] }
 0x24c   :  { %3184 = vmatpush.xpose.msk.msra.mxu0 %vm115_vm1, %v3182_v54 }
 0x250   :  { %v4185_v59 = vpop.f32.mrf.mxu2  ;;  %v4350_v55 = vpop.f32.mrf.mxu3  ;;  %3185 = vmatpush.xpose.msk.msra.mxu0 %vm115_vm1, %v3181_v60  ;;  %v3171_v60 = vld [vmem:[%s5569_s8 + $0x1a0] sm:$0xff] }
 0x254   :  { %3186 = vmatpush.xpose.msk.msra.mxu0 %vm115_vm1, %v3180_v6  ;;  %v3170_v6 = vld [vmem:[%s5569_s8 + $0x198] sm:$0xff] }
 0x258   :  { %v4191_v61 = vpop.f32.mrf.mxu2  ;;  %v4390_v7 = vpop.f32.mrf.mxu3  ;;  %3187 = vmatpush.xpose.msk.msra.mxu0 %vm115_vm1, %v3179_v11  ;;  %v3101_v11 = vld [vmem:[%s5569_s8 + $0x90] sm:$0xff] }
 0x260   :  { %v4193_v62 = vpop.f32.mrf.mxu2 }
 0x268   :  { %v1202_v0 = vpop.f32.mrf.mxu2 }
 0x269   :  { %v1203_v1 = vadd.f32 %v3675_v63, %v1202_v0  ;;  %v3766_v63 = vmov 15   ;;  %v3767_v0 = vmov 12  }
 0x26b   :  { %3718 = vtanh.f32 %v1203_v1  ;;  %v1356_v1 = vld [vmem:[%s5569_s8 + $0x68] sm:$0xff] }
 0x26c   :  { %3084 = vmatpush.xpose.msk.msra.mxu1 %vm115_vm1, %v1356_v1  ;;  %v3102_v1 = vld [vmem:[%s5569_s8 + $0x98] sm:$0xff] }
 0x270   :  { %3085 = vmatpush.xpose.msk.msra.mxu1 %vm115_vm1, %v1355_v8 }
 0x271   :  { %v3719_v2 = vpop.eup %3718 }
 0x272   :  { %3064 = vmatmul.msk.f32.vlgmr.msra.gmra.mxu3 %vm115_vm1, %v3719_v2  ;;  %v3112_v2 = vld [vmem:[%s5569_s8 + $0xe8] sm:$0xff] }
 0x273   :  { %3118 = vmatpush.xpose.msk.msra.mxu2 %vm115_vm1, %v3112_v2  ;;  %v3686_v2 = vld [vmem:[%s5566_s5 + $0x2] ss:$0 sm:$0xff] }
 0x274   :  { %3086 = vmatpush.xpose.msk.msra.mxu1 %vm115_vm1, %v1354_v12  ;;  %v3135_v12 = vld [vmem:[%s5569_s8 + $0x110] sm:$0xff] }
 0x277   :  { %3119 = vmatpush.xpose.msk.msra.mxu2 %vm115_vm1, %v3111_v9 }
 0x27b   :  { %3120 = vmatpush.xpose.msk.msra.mxu2 %vm115_vm1, %v3110_v13  ;;  %v3169_v13 = vld [vmem:[%s5569_s8 + $0x190] sm:$0xff] }
 0x27f   :  { %3121 = vmatpush.xpose.msk.msra.mxu2 %vm115_vm1, %v3109_v20  ;;  %v3168_v20 = vld [vmem:[%s5569_s8 + $0x188] sm:$0xff] }
 0x2b1   :  { %v362_v18 = vpop.xlane.xlu2 %361 }
 0x2b2   :  { %v363_v19 = vmul.f32 %v362_v18, %v4109_v39  ;;  %v3178_v18 = vld [vmem:[%s5569_s8 + $0x1d8] sm:$0xff] }
 0x2b3   :  { %3188 = vmatpush.xpose.msk.msra.mxu0 %vm115_vm1, %v3178_v18  ;;  %v3100_v18 = vld [vmem:[%s5569_s8 + $0x88] sm:$0xff] }
 0x2b4   :  { %v364_v17 = vadd.f32 1e-05, %v363_v19  ;;  %v1353_v19 = vld [vmem:[%s5569_s8 + $0x50] sm:$0xff] }
 0x2b5   :  { %3087 = vmatpush.xpose.msk.msra.mxu1 %vm115_vm1, %v1353_v19  ;;  %v3134_v19 = vld [vmem:[%s5569_s8 + $0x108] sm:$0xff] }
 0x2b6   :  { %3720 = vrsqrt.f32 %v364_v17  ;;  %vm371_vm5 = vweird.f32 %v364_v17 }
 0x2b7   :  { %3189 = vmatpush.xpose.msk.msra.mxu0 %vm115_vm1, %v3177_v21  ;;  %v1343_v21 = vld [vmem:[%s5569_s8] sm:$0xff] }
 0x2b9   :  { %3088 = vmatpush.xpose.msk.msra.mxu1 %vm115_vm1, %v1352_v22  ;;  %v3099_v22 = vld [vmem:[%s5569_s8 + $0x80] sm:$0xff] }
 0x2bc   :  { %v3721_v23 = vpop.eup %3720 }
 0x2bd   :  { %v366_v24 = vmul.f32 %v3721_v23, %v364_v17  ;;  %vm372_vm4 = vweird.f32 %v3721_v23  ;;  %v3143_v17 = vld [vmem:[%s5569_s8 + $0x150] sm:$0xff] }
 0x2be   :  { %vm373_vm6 = vmor %vm371_vm5, %vm372_vm4  ;;  %3155 = vmatpush.xpose.msk.msrb.mxu3 %vm115_vm1, %v3143_v17 }
 0x2bf   :  { %v367_v28 = vmul.f32 %v3721_v23, %v366_v24  ;;  %v3142_v24 = vld [vmem:[%s5569_s8 + $0x148] sm:$0xff] }
 0x2c1   :  { %v368_v30 = vmul.f32 0.5, %v367_v28  ;;  %v3176_v28 = vld [vmem:[%s5569_s8 + $0x1c8] sm:$0xff] }
 0x2c2   :  { %3156 = vmatpush.xpose.msk.msrb.mxu3 %vm115_vm1, %v3142_v24  ;;  %3190 = vmatpush.xpose.msk.msra.mxu0 %vm115_vm1, %v3176_v28  ;;  %v3133_v24 = vld [vmem:[%s5569_s8 + $0x100] sm:$0xff] }
 0x2c3   :  { %v369_v5 = vsub.f32 1.5, %v368_v30  ;;  %v3167_v28 = vld [vmem:[%s5569_s8 + $0x180] sm:$0xff] }
 0x2c5   :  { %v370_v33 = vmul.f32 %v3721_v23, %v369_v5  ;;  %v1351_v5 = vld [vmem:[%s5569_s8 + $0x40] sm:$0xff] }
 0x2c6   :  { %3089 = vmatpush.xpose.msk.msra.mxu1 %vm115_vm1, %v1351_v5  ;;  %3157 = vmatpush.xpose.msk.msrb.mxu3 %vm115_vm1, %v3141_v31  ;;  %v3250_v5 = vld [vmem:[%s5569_s8 + $0x2f8] sm:$0xff] }
 0x2c7   :  { %v374_v35 = vsel %vm373_vm6, %v3721_v23, %v370_v33  ;;  %v3108_v23 = vld [vmem:[%s5569_s8 + $0xc8] sm:$0xff]  ;;  %v3175_v33 = vld [vmem:[%s5569_s8 + $0x1c0] sm:$0xff]  ;;  %v3318_v31 = vld [vmem:[%s5569_s8 + $0x3f8] sm:$0xff] }
 0x2c8   :  { %v375_v36 = vmul.f32 %v374_v35, %v4118_v43  ;;  %v3761_v43 = vmov 5   ;;  %3122 = vmatpush.xpose.msk.msra.mxu2 %vm115_vm1, %v3108_v23  ;;  %3191 = vmatpush.xpose.msk.msra.mxu0 %vm115_vm1, %v3175_v33  ;;  %v3106_v35 = vld [vmem:[%s5569_s8 + $0xb8] sm:$0xff]  ;;  %v3215_v33 = vld [vmem:[%s5569_s8 + $0x270] sm:$0xff] }
 0x2c9   :  { %v3216_v23 = vld [vmem:[%s5569_s8 + $0x278] sm:$0xff] }
 0x2ca   :  { %3722 = vtanh.f32 %v375_v36  ;;  %v3140_v36 = vld [vmem:[%s5569_s8 + $0x138] sm:$0xff]  ;;  %3090 = vmatpush.xpose.msk.msra.mxu1 %vm115_vm1, %v1350_v34  ;;  %v3249_v34 = vld [vmem:[%s5569_s8 + $0x2f0] sm:$0xff] }
 0x2cb   :  { %3158 = vmatpush.xpose.msk.msrb.mxu3 %vm115_vm1, %v3140_v36  ;;  %v3317_v36 = vld [vmem:[%s5569_s8 + $0x3f0] sm:$0xff] }
 0x2cc   :  { %3192 = vmatpush.xpose.msk.msra.mxu0 %vm115_vm1, %v3174_v37  ;;  %v3214_v37 = vld [vmem:[%s5569_s8 + $0x268] sm:$0xff] }
 0x2ce   :  { %3091 = vmatpush.xpose.msk.msra.mxu1 %vm115_vm1, %v1349_v42  ;;  %v3248_v42 = vld [vmem:[%s5569_s8 + $0x2e8] sm:$0xff] }
 0x2cf   :  { %3159 = vmatpush.xpose.msk.msrb.mxu3 %vm115_vm1, %v3139_v46  ;;  %v3316_v46 = vld [vmem:[%s5569_s8 + $0x3e8] sm:$0xff] }
 0x2d0   :  { %v4296_v40 = vpop.eup %3722 }
 0x2d1   :  { %615 = vperm.xlu0 %3633, %v4296_v40   ;;  %575 = vperm.xlu2 %3632, %v4296_v40  }
 0x2d2   :  { %535 = vperm.xlu1 %3631, %v4296_v40   ;;  %3092 = vmatpush.xpose.msk.msra.mxu1 %vm115_vm1, %v1348_v47  ;;  %v3247_v47 = vld [vmem:[%s5569_s8 + $0x2e0] sm:$0xff] }
 0x2d3   :  { %3160 = vmatpush.xpose.msk.msrb.mxu3 %vm115_vm1, %v3138_v50  ;;  %v3315_v50 = vld [vmem:[%s5569_s8 + $0x3e0] sm:$0xff] }
 0x2d6   :  { %3093 = vmatpush.xpose.msk.msra.mxu1 %vm115_vm1, %v1347_v56  ;;  %v3246_v56 = vld [vmem:[%s5569_s8 + $0x2d8] sm:$0xff] }
 0x2d7   :  { %3161 = vmatpush.xpose.msk.msrb.mxu3 %vm115_vm1, %v3137_v58  ;;  %v3314_v58 = vld [vmem:[%s5569_s8 + $0x3d8] sm:$0xff] }
 0x2d9   :  { %3636 = vset.pattern.permute.xlu0 %v3761_v43  ;;  %3638 = vset.pattern.permute.xlu2 %v3762_v44 }
 0x2da   :  { %3634 = vset.pattern.permute.xlu1 %v3759_v32  ;;  %735 = vperm.xlu0 %3636, %v4296_v40  }
 0x2db   :  { %815 = vperm.xlu2 %3638, %v4296_v40   ;;  %655 = vperm.xlu1 %3634, %v4296_v40  }
 0x2dc   :  { %3162 = vmatpush.xpose.msk.msrb.mxu3 %vm115_vm1, %v3136_v4  ;;  %v3210_v4 = vld [vmem:[%s5569_s8 + $0x248] sm:$0xff] }
 0x2e0   :  { %3163 = vmatpush.xpose.msk.msrb.mxu3 %vm115_vm1, %v3135_v12  ;;  %v3676_v12 = vld [vmem:[%s5577_s16] ss:$0 sm:$0xff] }
 0x2e2   :  { %3641 = vset.pattern.permute.xlu0 %v3763_v49 }
 0x2e3   :  { %3640 = vset.pattern.permute.xlu2 %v3764_v51  ;;  %3635 = vset.pattern.permute.xlu1 %v3765_v52 }
 0x2e4   :  { %935 = vperm.xlu0 %3641, %v4296_v40   ;;  %895 = vperm.xlu2 %3640, %v4296_v40  }
 0x2e5   :  { %695 = vperm.xlu1 %3635, %v4296_v40   ;;  %3164 = vmatpush.xpose.msk.msrb.mxu3 %vm115_vm1, %v3134_v19 }
 0x2e9   :  { %3165 = vmatpush.xpose.msk.msrb.mxu3 %vm115_vm1, %v3133_v24 }
 0x2ec   :  { %3646 = vset.pattern.permute.xlu0 %v3766_v63  ;;  %3643 = vset.pattern.permute.xlu2 %v3767_v0 }
 0x2ed   :  { %3637 = vset.pattern.permute.xlu1 %v3768_v3  ;;  %1135 = vperm.xlu0 %3646, %v4296_v40  }
 0x2ee   :  { %1015 = vperm.xlu2 %3643, %v4296_v40   ;;  %775 = vperm.xlu1 %3637, %v4296_v40  }
 0x2f5   :  { %3647 = vset.pattern.permute.xlu0 %v3756_v26  ;;  %v4427_v26 = vpop.f32.mrf.mxu3 }
 0x2f6   :  { %3645 = vset.pattern.permute.xlu2 %v3769_v14  ;;  %3639 = vset.pattern.permute.xlu1 %v3770_v15 }
 0x2f7   :  { %1095 = vperm.xlu2 %3645, %v4296_v40   ;;  %855 = vperm.xlu1 %3639, %v4296_v40  }
 0x2fd   :  { %v4463_v30 = vpop.f32.mrf.mxu3 }
 0x2ff   :  { %3642 = vset.pattern.permute.xlu1 %v3771_v25  ;;  %3649 = vset.pattern.permute.xlu2 %v3757_v27  ;;  %v3107_v27 = vld [vmem:[%s5569_s8 + $0xc0] sm:$0xff] }
 0x300   :  { %975 = vperm.xlu1 %3642, %v4296_v40   ;;  %3123 = vmatpush.xpose.msk.msra.mxu2 %vm115_vm1, %v3107_v27  ;;  %v3284_v27 = vld [vmem:[%s5569_s8 + $0x378] sm:$0xff] }
 0x301   :  { %3286 = vmatpush.xpose.msk.msra.mxu3 %vm115_vm1, %v3284_v27 }
 0x304   :  { %3124 = vmatpush.xpose.msk.msra.mxu2 %vm115_vm1, %v3106_v35  ;;  %v3283_v35 = vld [vmem:[%s5569_s8 + $0x370] sm:$0xff] }
 0x305   :  { %v4498_v41 = vpop.f32.mrf.mxu3  ;;  %3287 = vmatpush.xpose.msk.msra.mxu3 %vm115_vm1, %v3283_v35  ;;  %v3241_v35 = vld [vmem:[%s5569_s8 + $0x2b0] sm:$0xff] }
 0x308   :  { %3644 = vset.pattern.permute.xlu1 %v3772_v38  ;;  %3125 = vmatpush.xpose.msk.msra.mxu2 %vm115_vm1, %v3105_v45  ;;  %v3282_v45 = vld [vmem:[%s5569_s8 + $0x368] sm:$0xff] }
 0x309   :  { %1055 = vperm.xlu1 %3644, %v4296_v40   ;;  %v3173_v40 = vld [vmem:[%s5569_s8 + $0x1b0] sm:$0xff]  ;;  %3288 = vmatpush.xpose.msk.msra.mxu3 %vm115_vm1, %v3282_v45  ;;  %v3206_v45 = vld [vmem:[%s5569_s8 + $0x228] sm:$0xff] }
 0x30a   :  { %3193 = vmatpush.xpose.msk.msra.mxu0 %vm115_vm1, %v3173_v40  ;;  %v3213_v40 = vld [vmem:[%s5569_s8 + $0x260] sm:$0xff] }
 0x30c   :  { %3126 = vmatpush.xpose.msk.msra.mxu2 %vm115_vm1, %v3104_v48  ;;  %v3281_v48 = vld [vmem:[%s5569_s8 + $0x360] sm:$0xff] }
 0x30d   :  { %v4533_v54 = vpop.f32.mrf.mxu3  ;;  %3289 = vmatpush.xpose.msk.msra.mxu3 %vm115_vm1, %v3281_v48 }
 0x30e   :  { %3194 = vmatpush.xpose.msk.msra.mxu0 %vm115_vm1, %v3172_v53  ;;  %v3212_v53 = vld [vmem:[%s5569_s8 + $0x258] sm:$0xff] }
 0x310   :  { %3127 = vmatpush.xpose.msk.msra.mxu2 %vm115_vm1, %v3103_v57  ;;  %v3280_v57 = vld [vmem:[%s5569_s8 + $0x358] sm:$0xff] }
 0x311   :  { %3650 = vset.pattern.permute.xlu1 %v3759_v32  ;;  %v1346_v32 = vld [vmem:[%s5569_s8 + $0x18] sm:$0xff]  ;;  %3290 = vmatpush.xpose.msk.msra.mxu3 %vm115_vm1, %v3280_v57  ;;  %v3205_v57 = vld [vmem:[%s5569_s8 + $0x220] sm:$0xff] }
 0x312   :  { %3195 = vmatpush.xpose.msk.msra.mxu0 %vm115_vm1, %v3171_v60  ;;  %3094 = vmatpush.xpose.msk.msra.mxu1 %vm115_vm1, %v1346_v32  ;;  %v3211_v60 = vld [vmem:[%s5569_s8 + $0x250] sm:$0xff] }
 0x313   :  { %v3245_v32 = vld [vmem:[%s5569_s8 + $0x2d0] sm:$0xff] }
 0x314   :  { %3128 = vmatpush.xpose.msk.msra.mxu2 %vm115_vm1, %v3102_v1  ;;  %v3279_v1 = vld [vmem:[%s5569_s8 + $0x350] sm:$0xff] }
 0x315   :  { %v1248_v8 = vpop.f32.mrf.mxu3  ;;  %3291 = vmatpush.xpose.msk.msra.mxu3 %vm115_vm1, %v3279_v1 }
 0x316   :  { %v1249_v9 = vadd.f32 %v3686_v2, %v1248_v8  ;;  %3196 = vmatpush.xpose.msk.msra.mxu0 %vm115_vm1, %v3170_v6  ;;  %3095 = vmatpush.xpose.msk.msra.mxu1 %vm115_vm1, %v1345_v10  ;;  %v3313_v2 = vld [vmem:[%s5569_s8 + $0x3d0] sm:$0xff]  ;;  %v3244_v6 = vld [vmem:[%s5569_s8 + $0x2c8] sm:$0xff] }
 0x317   :  { %v3278_v8 = vld [vmem:[%s5569_s8 + $0x348] sm:$0xff] }
 0x318   :  { %3724 = vtanh.f32 %v1249_v9  ;;  %3129 = vmatpush.xpose.msk.msra.mxu2 %vm115_vm1, %v3101_v11  ;;  %v3677_v9 = vld [vmem:[%s5571_s10] ss:$0 sm:$0xff]  ;;  %v3312_v10 = vld [vmem:[%s5569_s8 + $0x3c8] sm:$0xff] }
 0x319   :  { %v3209_v11 = vld [vmem:[%s5569_s8 + $0x240] sm:$0xff]  ;;  %3292 = vmatpush.xpose.msk.msra.mxu3 %vm115_vm1, %v3278_v8  ;;  %v531_v19 = vadd.f32 %v3677_v9, %v4390_v7  ;;  %v3204_v9 = vld [vmem:[%s5569_s8 + $0x218] sm:$0xff] }
 0x31a   :  { %3197 = vmatpush.xpose.msk.msra.mxu0 %vm115_vm1, %v3169_v13  ;;  %3096 = vmatpush.xpose.msk.msra.mxu1 %vm115_vm1, %v1344_v16  ;;  %v3678_v13 = vld [vmem:[%s5571_s10 + $0x1] ss:$0 sm:$0xff] }
 0x31b   :  { %v3243_v16 = vld [vmem:[%s5569_s8 + $0x2c0] sm:$0xff] }
 0x31c   :  { %3130 = vmatpush.xpose.msk.msra.mxu2 %vm115_vm1, %v3100_v18  ;;  %v3277_v18 = vld [vmem:[%s5569_s8 + $0x340] sm:$0xff] }
 0x31d   :  { %3293 = vmatpush.xpose.msk.msra.mxu3 %vm115_vm1, %v3277_v18 }
 0x31e   :  { %v4603_v17 = vpop.eup %3724  ;;  %3198 = vmatpush.xpose.msk.msra.mxu0 %vm115_vm1, %v3168_v20  ;;  %3097 = vmatpush.xpose.msk.msra.mxu1 %vm115_vm1, %v1343_v21  ;;  %v3311_v20 = vld [vmem:[%s5569_s8 + $0x3c0] sm:$0xff]  ;;  %v3208_v21 = vld [vmem:[%s5569_s8 + $0x238] sm:$0xff] }
 0x31f   :  { %3081 = vmatmul.msk.f32.vlgmr.msrb.gmra.mxu0 %vm115_vm1, %v4603_v17  ;;  %3166 = vmatmul.msk.f32.vlgmr.msrb.gmra.mxu3 %vm115_vm1, %v4603_v17 }
 0x320   :  { %3131 = vmatpush.xpose.msk.msra.mxu2 %vm115_vm1, %v3099_v22  ;;  %v499_v22 = vadd.f32 %v3676_v12, %v4350_v55  ;;  %v3310_v55 = vld [vmem:[%s5569_s8 + $0x3b8] sm:$0xff] }
 0x321   :  { %3098 = vmatmul.msk.f32.vlgmr.msra.gmra.mxu1 %vm115_vm1, %v4603_v17  ;;  %v3238_v12 = vld [vmem:[%s5569_s8 + $0x298] sm:$0xff] }
 0x322   :  { %3218 = vmatpush.xpose.msk.msrb.mxu1 %vm115_vm1, %v3216_v23  ;;  %3199 = vmatpush.xpose.msk.msra.mxu0 %vm115_vm1, %v3167_v28  ;;  %v572_v23 = vadd.f32 %v3678_v13, %v4427_v26  ;;  %v3242_v28 = vld [vmem:[%s5569_s8 + $0x2b8] sm:$0xff]  ;;  %v3207_v26 = vld [vmem:[%s5569_s8 + $0x230] sm:$0xff] }
 0x323   :  { %3132 = vmatmul.msk.f32.vlgmr.msra.gmra.mxu2 %vm115_vm1, %v4603_v17  ;;  %v3272_v13 = vld [vmem:[%s5569_s8 + $0x318] sm:$0xff] }
 0x324   :  { %3252 = vmatpush.xpose.msk.msrb.mxu2 %vm115_vm1, %v3250_v5  ;;  %v3276_v5 = vld [vmem:[%s5569_s8 + $0x338] sm:$0xff] }
 0x325   :  { %3294 = vmatpush.xpose.msk.msra.mxu3 %vm115_vm1, %v3276_v5 }
 0x326   :  { %3320 = vmatpush.xpose.msk.msrb.mxu0 %vm115_vm1, %v3318_v31  ;;  %3219 = vmatpush.xpose.msk.msrb.mxu1 %vm115_vm1, %v3215_v33  ;;  %v611_v31 = vpop.f32.mrf.mxu1 }
 0x327   :  { %3200 = vmatmul.msk.f32.vlgmr.msra.gmra.mxu0 %vm115_vm1, %v4603_v17 }
 0x328   :  { %3253 = vmatpush.xpose.msk.msrb.mxu2 %vm115_vm1, %v3249_v34 }
 0x32a   :  { %3321 = vmatpush.xpose.msk.msrb.mxu0 %vm115_vm1, %v3317_v36  ;;  %3220 = vmatpush.xpose.msk.msrb.mxu1 %vm115_vm1, %v3214_v37  ;;  %v3275_v36 = vld [vmem:[%s5569_s8 + $0x330] sm:$0xff] }
 0x32b   :  { %v576_v24 = vpop.permute.xlu2 %575  ;;  %3295 = vmatpush.xpose.msk.msra.mxu3 %vm115_vm1, %v3275_v36  ;;  %v3304_v36 = vld [vmem:[%s5569_s8 + $0x388] sm:$0xff] }
 0x32c   :  { %3254 = vmatpush.xpose.msk.msrb.mxu2 %vm115_vm1, %v3248_v42  ;;  %v578_v33 = vmul.f32 %v576_v24, %v572_v23  ;;  %v3309_v42 = vld [vmem:[%s5569_s8 + $0x3b0] sm:$0xff] }
 0x32e   :  { %3322 = vmatpush.xpose.msk.msrb.mxu0 %vm115_vm1, %v3316_v46  ;;  %3221 = vmatpush.xpose.msk.msrb.mxu1 %vm115_vm1, %v3213_v40  ;;  %v3680_v46 = vld [vmem:[%s5571_s10 + $0x2] ss:$0 sm:$0xff]  ;;  %v3240_v40 = vld [vmem:[%s5569_s8 + $0x2a8] sm:$0xff]  ;;  %v651_v1 = vpop.f32.mrf.mxu1 }
 0x330   :  { %3255 = vmatpush.xpose.msk.msrb.mxu2 %vm115_vm1, %v3247_v47  ;;  %v3274_v47 = vld [vmem:[%s5569_s8 + $0x328] sm:$0xff] }
 0x331   :  { %3296 = vmatpush.xpose.msk.msra.mxu3 %vm115_vm1, %v3274_v47 }
 0x332   :  { %3323 = vmatpush.xpose.msk.msrb.mxu0 %vm115_vm1, %v3315_v50  ;;  %3222 = vmatpush.xpose.msk.msrb.mxu1 %vm115_vm1, %v3212_v53  ;;  %v3308_v53 = vld [vmem:[%s5569_s8 + $0x3a8] sm:$0xff] }
 0x334   :  { %3256 = vmatpush.xpose.msk.msrb.mxu2 %vm115_vm1, %v3246_v56  ;;  %v3682_v56 = vld [vmem:[%s5571_s10 + $0x3] ss:$0 sm:$0xff] }
 0x335   :  { %v652_v8 = vadd.f32 %v3682_v56, %v651_v1  ;;  %v3303_v56 = vld [vmem:[%s5569_s8 + $0x380] sm:$0xff]  ;;  %v3351_v1 = vld [vmem:[%s5569_s8 + $0x470] sm:$0xff] }
 0x336   :  { %3324 = vmatpush.xpose.msk.msrb.mxu0 %vm115_vm1, %v3314_v58  ;;  %3223 = vmatpush.xpose.msk.msrb.mxu1 %vm115_vm1, %v3211_v60  ;;  %v612_v58 = vadd.f32 %v3680_v46, %v611_v31  ;;  %v3239_v60 = vld [vmem:[%s5569_s8 + $0x2a0] sm:$0xff] }
 0x337   :  { %v3684_v46 = vld [vmem:[%s5571_s10 + $0x7] ss:$0 sm:$0xff] }
 0x338   :  { %3257 = vmatpush.xpose.msk.msrb.mxu2 %vm115_vm1, %v3245_v32  ;;  %v3273_v32 = vld [vmem:[%s5569_s8 + $0x320] sm:$0xff] }
 0x339   :  { %3297 = vmatpush.xpose.msk.msra.mxu3 %vm115_vm1, %v3273_v32  ;;  %v3454_v32 = vld [vmem:[%s5569_s8 + $0x5f8] sm:$0xff] }
 0x33a   :  { %3325 = vmatpush.xpose.msk.msrb.mxu0 %vm115_vm1, %v3313_v2  ;;  %3224 = vmatpush.xpose.msk.msrb.mxu1 %vm115_vm1, %v3210_v4  ;;  %v3307_v2 = vld [vmem:[%s5569_s8 + $0x3a0] sm:$0xff] }
 0x33b   :  { %v3672_v4 = vld [vmem:[%s5571_s10 + $0x4] ss:$0 sm:$0xff] }
 0x33c   :  { %3258 = vmatpush.xpose.msk.msrb.mxu2 %vm115_vm1, %v3244_v6  ;;  %v3679_v6 = vld [vmem:[%s5571_s10 + $0x5] ss:$0 sm:$0xff]  ;;  %v692_v18 = vadd.f32 %v3672_v4, %v4185_v59  ;;  %v3237_v59 = vld [vmem:[%s5569_s8 + $0x290] sm:$0xff]  ;;  %v3681_v4 = vld [vmem:[%s5571_s10 + $0x9] ss:$0 sm:$0xff] }
 0x33d   :  { %3298 = vmatpush.xpose.msk.msra.mxu3 %vm115_vm1, %v3272_v13  ;;  %v3350_v13 = vld [vmem:[%s5569_s8 + $0x468] sm:$0xff] }
 0x33e   :  { %3326 = vmatpush.xpose.msk.msrb.mxu0 %vm115_vm1, %v3312_v10  ;;  %3225 = vmatpush.xpose.msk.msrb.mxu1 %vm115_vm1, %v3209_v11 }
 0x340   :  { %3259 = vmatpush.xpose.msk.msrb.mxu2 %vm115_vm1, %v3243_v16  ;;  %v3306_v16 = vld [vmem:[%s5569_s8 + $0x398] sm:$0xff] }
 0x342   :  { %3327 = vmatpush.xpose.msk.msrb.mxu0 %vm115_vm1, %v3311_v20  ;;  %3226 = vmatpush.xpose.msk.msrb.mxu1 %vm115_vm1, %v3208_v21  ;;  %v3203_v21 = vld [vmem:[%s5569_s8 + $0x210] sm:$0xff] }
 0x343   :  { %v616_v48 = vpop.permute.xlu0 %615 }
 0x344   :  { %v536_v7 = vpop.permute.xlu1 %535  ;;  %3260 = vmatpush.xpose.msk.msrb.mxu2 %vm115_vm1, %v3242_v28  ;;  %v618_v10 = vmul.f32 %v616_v48, %v612_v58  ;;  %v3305_v28 = vld [vmem:[%s5569_s8 + $0x390] sm:$0xff]  ;;  %v3235_v48 = vld [vmem:[%s5569_s8 + $0x280] sm:$0xff] }
 0x345   :  { %v538_v27 = vmul.f32 %v536_v7, %v531_v19  ;;  %v732_v19 = vadd.f32 %v3679_v6, %v4463_v30  ;;  %v3271_v30 = vld [vmem:[%s5569_s8 + $0x310] sm:$0xff] }
 0x346   :  { %3328 = vmatpush.xpose.msk.msrb.mxu0 %vm115_vm1, %v3310_v55  ;;  %3227 = vmatpush.xpose.msk.msrb.mxu1 %vm115_vm1, %v3207_v26  ;;  %v3202_v55 = vld [vmem:[%s5569_s8 + $0x208] sm:$0xff]  ;;  %v3685_v26 = vld [vmem:[%s5571_s10 + $0x6] ss:$0 sm:$0xff] }
 0x347   :  { %v539_v34 = vadd.f32 %v538_v27, %v499_v22  ;;  %3299 = vmatpush.xpose.msk.msra.mxu3 %vm115_vm1, %v3271_v30 }
 0x348   :  { %3261 = vmatpush.xpose.msk.msrb.mxu2 %vm115_vm1, %v3241_v35  ;;  %v816_v35 = vpop.permute.xlu2 %815 }
 0x349   :  { %v579_v37 = vadd.f32 %v578_v33, %v539_v34  ;;  %v3236_v33 = vld [vmem:[%s5569_s8 + $0x288] sm:$0xff] }
 0x34a   :  { %3329 = vmatpush.xpose.msk.msrb.mxu0 %vm115_vm1, %v3309_v42  ;;  %3228 = vmatpush.xpose.msk.msrb.mxu1 %vm115_vm1, %v3206_v45  ;;  %v3270_v34 = vld [vmem:[%s5569_s8 + $0x308] sm:$0xff]  ;;  %v771_v42 = vpop.f32.mrf.mxu0  ;;  %v3352_v45 = vld [vmem:[%s5569_s8 + $0x478] sm:$0xff] }
 0x34b   :  { %v619_v20 = vadd.f32 %v618_v10, %v579_v37  ;;  %v3201_v37 = vld [vmem:[%s5569_s8 + $0x200] sm:$0xff]  ;;  %3300 = vmatpush.xpose.msk.msra.mxu3 %vm115_vm1, %v3270_v34  ;;  %v3419_v10 = vld [vmem:[%s5569_s8 + $0x570] sm:$0xff] }
 0x34c   :  { %3262 = vmatpush.xpose.msk.msrb.mxu2 %vm115_vm1, %v3240_v40  ;;  %v736_v22 = vpop.permute.xlu0 %735  ;;  %v772_v40 = vadd.f32 %v3685_v26, %v771_v42  ;;  %v3451_v34 = vld [vmem:[%s5569_s8 + $0x5e0] sm:$0xff] }
 0x34d   :  { %v656_v50 = vpop.permute.xlu1 %655  ;;  %v738_v5 = vmul.f32 %v736_v22, %v732_v19 }
 0x34e   :  { %3330 = vmatpush.xpose.msk.msrb.mxu0 %vm115_vm1, %v3308_v53  ;;  %3229 = vmatpush.xpose.msk.msrb.mxu1 %vm115_vm1, %v3205_v57  ;;  %v658_v11 = vmul.f32 %v656_v50, %v652_v8  ;;  %v3269_v50 = vld [vmem:[%s5569_s8 + $0x300] sm:$0xff]  ;;  %v811_v53 = vpop.f32.mrf.mxu1  ;;  %v3386_v57 = vld [vmem:[%s5569_s8 + $0x4f8] sm:$0xff]  ;;  %v3385_v8 = vld [vmem:[%s5569_s8 + $0x4f0] sm:$0xff] }
 0x34f   :  { %3301 = vmatpush.xpose.msk.msra.mxu3 %vm115_vm1, %v3269_v50  ;;  %v812_v6 = vadd.f32 %v3684_v46, %v811_v53  ;;  %v3416_v50 = vld [vmem:[%s5569_s8 + $0x558] sm:$0xff] }
 0x350   :  { %3263 = vmatpush.xpose.msk.msrb.mxu2 %vm115_vm1, %v3239_v60  ;;  %v659_v24 = vadd.f32 %v658_v11, %v619_v20  ;;  %v3420_v60 = vld [vmem:[%s5569_s8 + $0x578] sm:$0xff]  ;;  %v3453_v11 = vld [vmem:[%s5569_s8 + $0x5f0] sm:$0xff] }
 0x351   :  { %v818_v19 = vmul.f32 %v816_v35, %v812_v6 }
 0x352   :  { %3331 = vmatpush.xpose.msk.msrb.mxu0 %vm115_vm1, %v3307_v2  ;;  %3230 = vmatpush.xpose.msk.msrb.mxu1 %vm115_vm1, %v3204_v9  ;;  %v3673_v2 = vld [vmem:[%s5571_s10 + $0x8] ss:$0 sm:$0xff] }
 0x353   :  { %3422 = vmatpush.xpose.msk.msrb.mxu3 %vm115_vm1, %v3420_v60 }
 0x354   :  { %3264 = vmatpush.xpose.msk.msrb.mxu2 %vm115_vm1, %v3238_v12  ;;  %v896_v12 = vpop.permute.xlu2 %895  ;;  %3302 = vmatmul.msk.f32.vlgmr.msra.gmra.mxu3 %vm115_vm1, %v4603_v17 }
 0x356   :  { %3332 = vmatpush.xpose.msk.msrb.mxu0 %vm115_vm1, %v3306_v16  ;;  %3231 = vmatpush.xpose.msk.msrb.mxu1 %vm115_vm1, %v3203_v21  ;;  %v852_v16 = vadd.f32 %v3673_v2, %v4191_v61  ;;  %v3384_v21 = vld [vmem:[%s5569_s8 + $0x4e8] sm:$0xff]  ;;  %v936_v26 = vpop.permute.xlu0 %935  ;;  %v3415_v2 = vld [vmem:[%s5569_s8 + $0x550] sm:$0xff] }
 0x357   :  { %v696_v23 = vpop.permute.xlu1 %695  ;;  %3423 = vmatpush.xpose.msk.msrb.mxu3 %vm115_vm1, %v3419_v10  ;;  %v3418_v61 = vld [vmem:[%s5569_s8 + $0x568] sm:$0xff] }
 0x358   :  { %v698_v7 = vmul.f32 %v696_v23, %v692_v18  ;;  %3265 = vmatpush.xpose.msk.msrb.mxu2 %vm115_vm1, %v3237_v59  ;;  %v892_v18 = vadd.f32 %v3681_v4, %v4498_v41  ;;  %v3452_v41 = vld [vmem:[%s5569_s8 + $0x5e8] sm:$0xff]  ;;  %v3449_v4 = vld [vmem:[%s5569_s8 + $0x5d0] sm:$0xff] }
 0x35a   :  { %v699_v27 = vadd.f32 %v698_v7, %v659_v24  ;;  %3333 = vmatpush.xpose.msk.msrb.mxu0 %vm115_vm1, %v3305_v28  ;;  %3232 = vmatpush.xpose.msk.msrb.mxu1 %vm115_vm1, %v3202_v55  ;;  %v3687_v24 = vld [vmem:[%s5571_s10 + $0xa] ss:$0 sm:$0xff]  ;;  %v3349_v7 = vld [vmem:[%s5569_s8 + $0x460] sm:$0xff]  ;;  %v898_v59 = vmul.f32 %v896_v12, %v892_v18  ;;  %v3674_v28 = vld [vmem:[%s5571_s10 + $0xc] ss:$0 sm:$0xff]  ;;  %v931_v55 = vpop.f32.mrf.mxu0 }
 0x35b   :  { %3424 = vmatpush.xpose.msk.msrb.mxu3 %vm115_vm1, %v3418_v61  ;;  %v932_v35 = vadd.f32 %v3687_v24, %v931_v55  ;;  %v1012_v42 = vadd.f32 %v3674_v28, %v4193_v62  ;;  %v3450_v62 = vld [vmem:[%s5569_s8 + $0x5d8] sm:$0xff]  ;;  %v3414_v18 = vld [vmem:[%s5569_s8 + $0x548] sm:$0xff]  ;;  %v3447_v28 = vld [vmem:[%s5569_s8 + $0x5c0] sm:$0xff] }
 0x35c   :  { %v739_v31 = vadd.f32 %v738_v5, %v699_v27  ;;  %3266 = vmatpush.xpose.msk.msrb.mxu2 %vm115_vm1, %v3236_v33  ;;  %v3688_v5 = vld [vmem:[%s5571_s10 + $0xb] ss:$0 sm:$0xff]  ;;  %v3383_v27 = vld [vmem:[%s5569_s8 + $0x4e0] sm:$0xff]  ;;  %v1016_v46 = vpop.permute.xlu2 %1015 }
 0x35d   :  { %v3417_v33 = vld [vmem:[%s5569_s8 + $0x560] sm:$0xff] }
 0x35e   :  { %3334 = vmatpush.xpose.msk.msrb.mxu0 %vm115_vm1, %v3304_v36  ;;  %3233 = vmatpush.xpose.msk.msrb.mxu1 %vm115_vm1, %v3201_v37  ;;  %v3348_v36 = vld [vmem:[%s5569_s8 + $0x458] sm:$0xff]  ;;  %v971_v37 = vpop.f32.mrf.mxu1 }
 0x35f   :  { %3425 = vmatpush.xpose.msk.msrb.mxu3 %vm115_vm1, %v3417_v33  ;;  %v1136_v61 = vpop.permute.xlu0 %1135  ;;  %v3412_v33 = vld [vmem:[%s5569_s8 + $0x538] sm:$0xff] }
 0x360   :  { %v776_v47 = vpop.permute.xlu1 %775  ;;  %3267 = vmatpush.xpose.msk.msrb.mxu2 %vm115_vm1, %v3235_v48 }
 0x361   :  { %v778_v58 = vmul.f32 %v776_v47, %v772_v40  ;;  %3234 = vmatmul.msk.f32.vlgmr.msrb.gmra.mxu1 %vm115_vm1, %v4603_v17  ;;  %v938_v40 = vmul.f32 %v936_v26, %v932_v35  ;;  %v3382_v47 = vld [vmem:[%s5569_s8 + $0x4d8] sm:$0xff]  ;;  %v3343_v35 = vld [vmem:[%s5569_s8 + $0x430] sm:$0xff] }
 0x362   :  { %3354 = vmatpush.xpose.msk.msra.mxu1 %vm115_vm1, %v3352_v45  ;;  %3335 = vmatpush.xpose.msk.msrb.mxu0 %vm115_vm1, %v3303_v56  ;;  %v972_v45 = vadd.f32 %v3688_v5, %v971_v37  ;;  %v1091_v10 = vpop.f32.mrf.mxu0  ;;  %v3344_v5 = vld [vmem:[%s5569_s8 + $0x438] sm:$0xff]  ;;  %v3377_v37 = vld [vmem:[%s5569_s8 + $0x4b0] sm:$0xff] }
 0x363   :  { %v779_v9 = vadd.f32 %v778_v58, %v739_v31  ;;  %3268 = vmatmul.msk.f32.vlgmr.msrb.gmra.mxu2 %vm115_vm1, %v4603_v17  ;;  %v1018_v58 = vmul.f32 %v1016_v46, %v1012_v42  ;;  %3426 = vmatpush.xpose.msk.msrb.mxu3 %vm115_vm1, %v3416_v50  ;;  %v3378_v26 = vld [vmem:[%s5569_s8 + $0x4b8] sm:$0xff]  ;;  %v3411_v42 = vld [vmem:[%s5569_s8 + $0x530] sm:$0xff]  ;;  %v3342_v46 = vld [vmem:[%s5569_s8 + $0x428] sm:$0xff] }
 0x364   :  { %3388 = vmatpush.xpose.msk.msra.mxu2 %vm115_vm1, %v3386_v57  ;;  %v3347_v57 = vld [vmem:[%s5569_s8 + $0x450] sm:$0xff]  ;;  %v3341_v50 = vld [vmem:[%s5569_s8 + $0x420] sm:$0xff] }
 0x365   :  { %3336 = vmatmul.msk.f32.vlgmr.msrb.gmra.mxu0 %vm115_vm1, %v4603_v17  ;;  %v819_v22 = vadd.f32 %v818_v19, %v779_v9  ;;  %v3689_v9 = vld [vmem:[%s5571_s10 + $0xe] ss:$0 sm:$0xff] }
 0x366   :  { %3456 = vmatpush.xpose.msk.msra.mxu0 %vm115_vm1, %v3454_v32  ;;  %3355 = vmatpush.xpose.msk.msra.mxu1 %vm115_vm1, %v3351_v1  ;;  %v3381_v32 = vld [vmem:[%s5569_s8 + $0x4d0] sm:$0xff]  ;;  %v3683_v1 = vld [vmem:[%s5571_s10 + $0xd] ss:$0 sm:$0xff] }
 0x367   :  { %3427 = vmatpush.xpose.msk.msrb.mxu3 %vm115_vm1, %v3415_v2  ;;  %v1052_v12 = vadd.f32 %v3683_v1, %v4533_v54  ;;  %v3448_v19 = vld [vmem:[%s5569_s8 + $0x5c8] sm:$0xff]  ;;  %v3345_v54 = vld [vmem:[%s5569_s8 + $0x440] sm:$0xff]  ;;  %v3339_v1 = vld [vmem:[%s5569_s8 + $0x410] sm:$0xff] }
 0x368   :  { %3389 = vmatpush.xpose.msk.msra.mxu2 %vm115_vm1, %v3385_v8  ;;  %v3346_v8 = vld [vmem:[%s5569_s8 + $0x448] sm:$0xff]  ;;  %v3373_v2 = vld [vmem:[%s5569_s8 + $0x490] sm:$0xff] }
 0x369   :  { %v856_v20 = vpop.permute.xlu1 %855 }
 0x36a   :  { %3457 = vmatpush.xpose.msk.msra.mxu0 %vm115_vm1, %v3453_v11  ;;  %v858_v23 = vmul.f32 %v856_v20, %v852_v16  ;;  %3356 = vmatpush.xpose.msk.msra.mxu1 %vm115_vm1, %v3350_v13  ;;  %v3380_v11 = vld [vmem:[%s5569_s8 + $0x4c8] sm:$0xff]  ;;  %v1131_v16 = vpop.f32.mrf.mxu1  ;;  %v1096_v20 = vpop.permute.xlu2 %1095 }
 0x36b   :  { %v3690_v13 = vld [vmem:[%s5571_s10 + $0xf] ss:$0 sm:$0xff]  ;;  %3428 = vmatpush.xpose.msk.msrb.mxu3 %vm115_vm1, %v3414_v18  ;;  %v3405_v18 = vld [vmem:[%s5569_s8 + $0x500] sm:$0xff] }
 0x36c   :  { %v859_v30 = vadd.f32 %v858_v23, %v819_v22  ;;  %3390 = vmatpush.xpose.msk.msra.mxu2 %vm115_vm1, %v3384_v21  ;;  %v1092_v22 = vadd.f32 %v3689_v9, %v1091_v10  ;;  %v1132_v24 = vadd.f32 %v3690_v13, %v1131_v16  ;;  %v3372_v9 = vld [vmem:[%s5569_s8 + $0x488] sm:$0xff]  ;;  %v3488_v13 = vld [vmem:[%s5569_s8 + $0x678] sm:$0xff]  ;;  %v3371_v16 = vld [vmem:[%s5569_s8 + $0x480] sm:$0xff] }
 0x36d   :  { %v3406_v10 = vld [vmem:[%s5569_s8 + $0x508] sm:$0xff] }
 0x36e   :  { %3458 = vmatpush.xpose.msk.msra.mxu0 %vm115_vm1, %v3452_v41  ;;  %v899_v31 = vadd.f32 %v898_v59, %v859_v30  ;;  %3357 = vmatpush.xpose.msk.msra.mxu1 %vm115_vm1, %v3349_v7  ;;  %v3379_v41 = vld [vmem:[%s5569_s8 + $0x4c0] sm:$0xff]  ;;  %v1098_v7 = vmul.f32 %v1096_v20, %v1092_v22  ;;  %v3487_v22 = vld [vmem:[%s5569_s8 + $0x670] sm:$0xff] }
 0x36f   :  { %v3413_v30 = vld [vmem:[%s5569_s8 + $0x540] sm:$0xff] }
 0x370   :  { %3391 = vmatpush.xpose.msk.msra.mxu2 %vm115_vm1, %v3383_v27  ;;  %v939_v53 = vadd.f32 %v938_v40, %v899_v31  ;;  %v1138_v27 = vmul.f32 %v1136_v61, %v1132_v24  ;;  %3429 = vmatpush.xpose.msk.msrb.mxu3 %vm115_vm1, %v3413_v30  ;;  %v3376_v40 = vld [vmem:[%s5569_s8 + $0x4a8] sm:$0xff]  ;;  %v3439_v20 = vld [vmem:[%s5569_s8 + $0x580] sm:$0xff]  ;;  %v3555_v61 = vld [vmem:[%s5569_s8 + $0x770] sm:$0xff] }
 0x371   :  { %v3486_v24 = vld [vmem:[%s5569_s8 + $0x668] sm:$0xff] }
 0x372   :  { %3459 = vmatpush.xpose.msk.msra.mxu0 %vm115_vm1, %v3451_v34  ;;  %v976_v48 = vpop.permute.xlu1 %975  ;;  %3358 = vmatpush.xpose.msk.msra.mxu1 %vm115_vm1, %v3348_v36  ;;  %v3446_v34 = vld [vmem:[%s5569_s8 + $0x5b8] sm:$0xff]  ;;  %v3588_v30 = vld [vmem:[%s5569_s8 + $0x7e8] sm:$0xff] }
 0x373   :  { %v978_v56 = vmul.f32 %v976_v48, %v972_v45  ;;  %v3445_v45 = vld [vmem:[%s5569_s8 + $0x5b0] sm:$0xff]  ;;  %v3444_v48 = vld [vmem:[%s5569_s8 + $0x5a8] sm:$0xff] }
 0x374   :  { %3392 = vmatpush.xpose.msk.msra.mxu2 %vm115_vm1, %v3382_v47  ;;  %3430 = vmatpush.xpose.msk.msrb.mxu3 %vm115_vm1, %v3412_v33  ;;  %v3410_v47 = vld [vmem:[%s5569_s8 + $0x528] sm:$0xff]  ;;  %v3518_v33 = vld [vmem:[%s5569_s8 + $0x6d8] sm:$0xff] }
 0x375   :  { %v979_v60 = vadd.f32 %v978_v56, %v939_v53  ;;  %v3409_v53 = vld [vmem:[%s5569_s8 + $0x520] sm:$0xff] }
 0x376   :  { %3460 = vmatpush.xpose.msk.msra.mxu0 %vm115_vm1, %v3450_v62  ;;  %3359 = vmatpush.xpose.msk.msra.mxu1 %vm115_vm1, %v3347_v57  ;;  %v3375_v62 = vld [vmem:[%s5569_s8 + $0x4a0] sm:$0xff]  ;;  %v3340_v57 = vld [vmem:[%s5569_s8 + $0x418] sm:$0xff] }
 0x377   :  { %v1019_v6 = vadd.f32 %v1018_v58, %v979_v60  ;;  %v3443_v56 = vld [vmem:[%s5569_s8 + $0x5a0] sm:$0xff]  ;;  %v3374_v58 = vld [vmem:[%s5569_s8 + $0x498] sm:$0xff] }
 0x378   :  { %3393 = vmatpush.xpose.msk.msra.mxu2 %vm115_vm1, %v3381_v32  ;;  %3431 = vmatpush.xpose.msk.msrb.mxu3 %vm115_vm1, %v3411_v42  ;;  %v3408_v60 = vld [vmem:[%s5569_s8 + $0x518] sm:$0xff]  ;;  %v3551_v42 = vld [vmem:[%s5569_s8 + $0x750] sm:$0xff] }
 0x379   :  { %v3442_v32 = vld [vmem:[%s5569_s8 + $0x598] sm:$0xff] }
 0x37a   :  { %3461 = vmatpush.xpose.msk.msra.mxu0 %vm115_vm1, %v3449_v4  ;;  %3360 = vmatpush.xpose.msk.msra.mxu1 %vm115_vm1, %v3346_v8  ;;  %v3407_v4 = vld [vmem:[%s5569_s8 + $0x510] sm:$0xff]  ;;  %v3338_v8 = vld [vmem:[%s5569_s8 + $0x408] sm:$0xff] }
 0x37b   :  { %v1056_v21 = vpop.permute.xlu1 %1055 }
 0x37c   :  { %v1058_v23 = vmul.f32 %v1056_v21, %v1052_v12  ;;  %3394 = vmatpush.xpose.msk.msra.mxu2 %vm115_vm1, %v3380_v11  ;;  %3432 = vmatpush.xpose.msk.msrb.mxu3 %vm115_vm1, %v3410_v47  ;;  %v3440_v11 = vld [vmem:[%s5569_s8 + $0x588] sm:$0xff]  ;;  %v3337_v12 = vld [vmem:[%s5569_s8 + $0x400] sm:$0xff]  ;;  %v3556_v21 = vld [vmem:[%s5569_s8 + $0x778] sm:$0xff] }
 0x37d   :  { %v3550_v47 = vld [vmem:[%s5569_s8 + $0x748] sm:$0xff] }
 0x37e   :  { %3462 = vmatpush.xpose.msk.msra.mxu0 %vm115_vm1, %v3448_v19  ;;  %v1059_v59 = vadd.f32 %v1058_v23, %v1019_v6  ;;  %3361 = vmatpush.xpose.msk.msra.mxu1 %vm115_vm1, %v3345_v54  ;;  %v3441_v6 = vld [vmem:[%s5569_s8 + $0x590] sm:$0xff]  ;;  %v3522_v19 = vld [vmem:[%s5569_s8 + $0x6f8] sm:$0xff] }
 0x37f   :  { %v3590_v54 = vld [vmem:[%s5569_s8 + $0x7f8] sm:$0xff]  ;;  %v3521_v23 = vld [vmem:[%s5569_s8 + $0x6f0] sm:$0xff] }
 0x380   :  { %v1099_v55 = vadd.f32 %v1098_v7, %v1059_v59  ;;  %3395 = vmatpush.xpose.msk.msra.mxu2 %vm115_vm1, %v3379_v41  ;;  %3433 = vmatpush.xpose.msk.msrb.mxu3 %vm115_vm1, %v3409_v53  ;;  %v3589_v41 = vld [vmem:[%s5569_s8 + $0x7f0] sm:$0xff]  ;;  %v3520_v7 = vld [vmem:[%s5569_s8 + $0x6e8] sm:$0xff]  ;;  %v3549_v53 = vld [vmem:[%s5569_s8 + $0x740] sm:$0xff] }
 0x381   :  { %v3554_v59 = vld [vmem:[%s5569_s8 + $0x768] sm:$0xff] }
 0x382   :  { %3463 = vmatpush.xpose.msk.msra.mxu0 %vm115_vm1, %v3447_v28  ;;  %v5092_v31 = vadd.f32 %v1138_v27, %v1099_v55  ;;  %3362 = vmatpush.xpose.msk.msra.mxu1 %vm115_vm1, %v3344_v5  ;;  %v3485_v28 = vld [vmem:[%s5569_s8 + $0x660] sm:$0xff] }
 0x383   :  { %v3519_v5 = vld [vmem:[%s5569_s8 + $0x6e0] sm:$0xff] }
 0x384   :  { %v1140_v36 = vsel %vm346_vm2, %v5092_v31, 0.0  ;;  %3396 = vmatpush.xpose.msk.msra.mxu2 %vm115_vm1, %v3378_v26  ;;  %3434 = vmatpush.xpose.msk.msrb.mxu3 %vm115_vm1, %v3408_v60  ;;  %v3553_v27 = vld [vmem:[%s5569_s8 + $0x760] sm:$0xff]  ;;  %v3484_v26 = vld [vmem:[%s5569_s8 + $0x658] sm:$0xff] }
 0x385   :  { %1141 = vadd.xlane.f32.xlu1 %v1140_v36  ;;  %v3587_v55 = vld [vmem:[%s5569_s8 + $0x7e0] sm:$0xff]  ;;  %v3483_v36 = vld [vmem:[%s5569_s8 + $0x650] sm:$0xff]  ;;  %v3548_v60 = vld [vmem:[%s5569_s8 + $0x738] sm:$0xff] }
 0x386   :  { %3464 = vmatpush.xpose.msk.msra.mxu0 %vm115_vm1, %v3446_v34  ;;  %3363 = vmatpush.xpose.msk.msra.mxu1 %vm115_vm1, %v3343_v35  ;;  %v3552_v34 = vld [vmem:[%s5569_s8 + $0x758] sm:$0xff] }
 0x387   :  { %v3586_v35 = vld [vmem:[%s5569_s8 + $0x7d8] sm:$0xff] }
 0x388   :  { %3397 = vmatpush.xpose.msk.msra.mxu2 %vm115_vm1, %v3377_v37  ;;  %3435 = vmatpush.xpose.msk.msrb.mxu3 %vm115_vm1, %v3407_v4  ;;  %v3517_v37 = vld [vmem:[%s5569_s8 + $0x6d0] sm:$0xff] }
 0x389   :  { %v3547_v4 = vld [vmem:[%s5569_s8 + $0x730] sm:$0xff] }
 0x38a   :  { %3465 = vmatpush.xpose.msk.msra.mxu0 %vm115_vm1, %v3445_v45  ;;  %3364 = vmatpush.xpose.msk.msra.mxu1 %vm115_vm1, %v3342_v46  ;;  %v3585_v45 = vld [vmem:[%s5569_s8 + $0x7d0] sm:$0xff]  ;;  %v3482_v46 = vld [vmem:[%s5569_s8 + $0x648] sm:$0xff] }
 0x38c   :  { %3398 = vmatpush.xpose.msk.msra.mxu2 %vm115_vm1, %v3376_v40  ;;  %3436 = vmatpush.xpose.msk.msrb.mxu3 %vm115_vm1, %v3406_v10  ;;  %v3516_v40 = vld [vmem:[%s5569_s8 + $0x6c8] sm:$0xff] }
 0x38d   :  { %v3546_v10 = vld [vmem:[%s5569_s8 + $0x728] sm:$0xff] }
 0x38e   :  { %3466 = vmatpush.xpose.msk.msra.mxu0 %vm115_vm1, %v3444_v48  ;;  %3365 = vmatpush.xpose.msk.msra.mxu1 %vm115_vm1, %v3341_v50  ;;  %v3584_v48 = vld [vmem:[%s5569_s8 + $0x7c8] sm:$0xff]  ;;  %v3481_v50 = vld [vmem:[%s5569_s8 + $0x640] sm:$0xff] }
 0x390   :  { %3399 = vmatpush.xpose.msk.msra.mxu2 %vm115_vm1, %v3375_v62  ;;  %3437 = vmatpush.xpose.msk.msrb.mxu3 %vm115_vm1, %v3405_v18  ;;  %v3515_v62 = vld [vmem:[%s5569_s8 + $0x6c0] sm:$0xff] }
 0x391   :  { %v3579_v18 = vld [vmem:[%s5569_s8 + $0x7a0] sm:$0xff] }
 0x392   :  { %3467 = vmatpush.xpose.msk.msra.mxu0 %vm115_vm1, %v3443_v56  ;;  %3366 = vmatpush.xpose.msk.msra.mxu1 %vm115_vm1, %v3340_v57  ;;  %v3583_v56 = vld [vmem:[%s5569_s8 + $0x7c0] sm:$0xff]  ;;  %v3480_v57 = vld [vmem:[%s5569_s8 + $0x638] sm:$0xff] }
 0x393   :  { %3438 = vmatmul.msk.f32.vlgmr.msrb.gmra.mxu3 %vm115_vm1, %v4603_v17 }
 0x394   :  { %3400 = vmatpush.xpose.msk.msra.mxu2 %vm115_vm1, %v3374_v58  ;;  %3558 = vmatpush.xpose.msk.msra.mxu3 %vm115_vm1, %v3556_v21  ;;  %v3514_v58 = vld [vmem:[%s5569_s8 + $0x6b8] sm:$0xff] }
 0x395   :  { %v3544_v21 = vld [vmem:[%s5569_s8 + $0x718] sm:$0xff] }
 0x396   :  { %3468 = vmatpush.xpose.msk.msra.mxu0 %vm115_vm1, %v3442_v32  ;;  %3367 = vmatpush.xpose.msk.msra.mxu1 %vm115_vm1, %v3339_v1  ;;  %v3582_v32 = vld [vmem:[%s5569_s8 + $0x7b8] sm:$0xff]  ;;  %v3479_v1 = vld [vmem:[%s5569_s8 + $0x630] sm:$0xff] }
 0x398   :  { %3401 = vmatpush.xpose.msk.msra.mxu2 %vm115_vm1, %v3373_v2  ;;  %3559 = vmatpush.xpose.msk.msra.mxu3 %vm115_vm1, %v3555_v61  ;;  %v3513_v2 = vld [vmem:[%s5569_s8 + $0x6b0] sm:$0xff] }
 0x399   :  { %v3543_v61 = vld [vmem:[%s5569_s8 + $0x710] sm:$0xff] }
 0x39a   :  { %3469 = vmatpush.xpose.msk.msra.mxu0 %vm115_vm1, %v3441_v6  ;;  %3368 = vmatpush.xpose.msk.msra.mxu1 %vm115_vm1, %v3338_v8  ;;  %v3581_v6 = vld [vmem:[%s5569_s8 + $0x7b0] sm:$0xff]  ;;  %v3478_v8 = vld [vmem:[%s5569_s8 + $0x628] sm:$0xff] }
 0x39c   :  { %3402 = vmatpush.xpose.msk.msra.mxu2 %vm115_vm1, %v3372_v9  ;;  %3560 = vmatpush.xpose.msk.msra.mxu3 %vm115_vm1, %v3554_v59  ;;  %v3512_v9 = vld [vmem:[%s5569_s8 + $0x6a8] sm:$0xff] }
 0x39d   :  { %v3542_v59 = vld [vmem:[%s5569_s8 + $0x708] sm:$0xff] }
 0x39e   :  { %3470 = vmatpush.xpose.msk.msra.mxu0 %vm115_vm1, %v3440_v11  ;;  %3369 = vmatpush.xpose.msk.msra.mxu1 %vm115_vm1, %v3337_v12  ;;  %v3580_v11 = vld [vmem:[%s5569_s8 + $0x7a8] sm:$0xff]  ;;  %v3477_v12 = vld [vmem:[%s5569_s8 + $0x620] sm:$0xff] }
 0x3a0   :  { %3403 = vmatpush.xpose.msk.msra.mxu2 %vm115_vm1, %v3371_v16  ;;  %3561 = vmatpush.xpose.msk.msra.mxu3 %vm115_vm1, %v3553_v27  ;;  %v3545_v16 = vld [vmem:[%s5569_s8 + $0x720] sm:$0xff] }
 0x3a1   :  { %3370 = vmatmul.msk.f32.vlgmr.msra.gmra.mxu1 %vm115_vm1, %v4603_v17  ;;  %v3541_v27 = vld [vmem:[%s5569_s8 + $0x700] sm:$0xff] }
 0x3a2   :  { %3490 = vmatpush.xpose.msk.msrb.mxu1 %vm115_vm1, %v3488_v13  ;;  %3471 = vmatpush.xpose.msk.msra.mxu0 %vm115_vm1, %v3439_v20  ;;  %v3511_v13 = vld [vmem:[%s5569_s8 + $0x6a0] sm:$0xff]  ;;  %v3510_v20 = vld [vmem:[%s5569_s8 + $0x698] sm:$0xff] }
 0x3a3   :  { %3404 = vmatmul.msk.f32.vlgmr.msra.gmra.mxu2 %vm115_vm1, %v4603_v17 }
 0x3a4   :  { %3524 = vmatpush.xpose.msk.msrb.mxu2 %vm115_vm1, %v3522_v19  ;;  %3562 = vmatpush.xpose.msk.msra.mxu3 %vm115_vm1, %v3552_v34  ;;  %v3476_v19 = vld [vmem:[%s5569_s8 + $0x618] sm:$0xff] }
 0x3a5   :  { %3472 = vmatmul.msk.f32.vlgmr.msra.gmra.mxu0 %vm115_vm1, %v4603_v17 }
 0x3a6   :  { %3592 = vmatpush.xpose.msk.msrb.mxu0 %vm115_vm1, %v3590_v54  ;;  %3491 = vmatpush.xpose.msk.msrb.mxu1 %vm115_vm1, %v3487_v22  ;;  %v3578_v54 = vld [vmem:[%s5569_s8 + $0x798] sm:$0xff]  ;;  %v3475_v22 = vld [vmem:[%s5569_s8 + $0x610] sm:$0xff] }
 0x3a8   :  { %3525 = vmatpush.xpose.msk.msrb.mxu2 %vm115_vm1, %v3521_v23  ;;  %3563 = vmatpush.xpose.msk.msra.mxu3 %vm115_vm1, %v3551_v42  ;;  %v3509_v23 = vld [vmem:[%s5569_s8 + $0x690] sm:$0xff] }
 0x3aa   :  { %3593 = vmatpush.xpose.msk.msrb.mxu0 %vm115_vm1, %v3589_v41  ;;  %3492 = vmatpush.xpose.msk.msrb.mxu1 %vm115_vm1, %v3486_v24  ;;  %v3577_v41 = vld [vmem:[%s5569_s8 + $0x790] sm:$0xff]  ;;  %v3474_v24 = vld [vmem:[%s5569_s8 + $0x608] sm:$0xff] }
 0x3ac   :  { %3526 = vmatpush.xpose.msk.msrb.mxu2 %vm115_vm1, %v3520_v7  ;;  %3564 = vmatpush.xpose.msk.msra.mxu3 %vm115_vm1, %v3550_v47  ;;  %v3508_v7 = vld [vmem:[%s5569_s8 + $0x688] sm:$0xff] }
 0x3ae   :  { %3594 = vmatpush.xpose.msk.msrb.mxu0 %vm115_vm1, %v3588_v30  ;;  %3493 = vmatpush.xpose.msk.msrb.mxu1 %vm115_vm1, %v3485_v28  ;;  %v3576_v30 = vld [vmem:[%s5569_s8 + $0x788] sm:$0xff]  ;;  %v3473_v28 = vld [vmem:[%s5569_s8 + $0x600] sm:$0xff] }
 0x3b0   :  { %3527 = vmatpush.xpose.msk.msrb.mxu2 %vm115_vm1, %v3519_v5  ;;  %3565 = vmatpush.xpose.msk.msra.mxu3 %vm115_vm1, %v3549_v53  ;;  %v3507_v5 = vld [vmem:[%s5569_s8 + $0x680] sm:$0xff] }
 0x3b2   :  { %3595 = vmatpush.xpose.msk.msrb.mxu0 %vm115_vm1, %v3587_v55  ;;  %3494 = vmatpush.xpose.msk.msrb.mxu1 %vm115_vm1, %v3484_v26  ;;  %v3575_v55 = vld [vmem:[%s5569_s8 + $0x780] sm:$0xff] }
 0x3b4   :  { %3528 = vmatpush.xpose.msk.msrb.mxu2 %vm115_vm1, %v3518_v33  ;;  %3566 = vmatpush.xpose.msk.msra.mxu3 %vm115_vm1, %v3548_v60 }
 0x3b6   :  { %3596 = vmatpush.xpose.msk.msrb.mxu0 %vm115_vm1, %v3586_v35  ;;  %3495 = vmatpush.xpose.msk.msrb.mxu1 %vm115_vm1, %v3483_v36 }
 0x3b8   :  { %3529 = vmatpush.xpose.msk.msrb.mxu2 %vm115_vm1, %v3517_v37  ;;  %3567 = vmatpush.xpose.msk.msra.mxu3 %vm115_vm1, %v3547_v4 }
 0x3ba   :  { %3597 = vmatpush.xpose.msk.msrb.mxu0 %vm115_vm1, %v3585_v45  ;;  %3496 = vmatpush.xpose.msk.msrb.mxu1 %vm115_vm1, %v3482_v46 }
 0x3bc   :  { %3530 = vmatpush.xpose.msk.msrb.mxu2 %vm115_vm1, %v3516_v40  ;;  %3568 = vmatpush.xpose.msk.msra.mxu3 %vm115_vm1, %v3546_v10 }
 0x3be   :  { %3598 = vmatpush.xpose.msk.msrb.mxu0 %vm115_vm1, %v3584_v48  ;;  %3497 = vmatpush.xpose.msk.msrb.mxu1 %vm115_vm1, %v3481_v50 }
 0x3c0   :  { %3531 = vmatpush.xpose.msk.msrb.mxu2 %vm115_vm1, %v3515_v62  ;;  %3569 = vmatpush.xpose.msk.msra.mxu3 %vm115_vm1, %v3545_v16 }
 0x3c2   :  { %3599 = vmatpush.xpose.msk.msrb.mxu0 %vm115_vm1, %v3583_v56  ;;  %3498 = vmatpush.xpose.msk.msrb.mxu1 %vm115_vm1, %v3480_v57 }
 0x3c4   :  { %3532 = vmatpush.xpose.msk.msrb.mxu2 %vm115_vm1, %v3514_v58  ;;  %3570 = vmatpush.xpose.msk.msra.mxu3 %vm115_vm1, %v3544_v21  ;;  %v3698_v21 = vld [vmem:[%s5572_s11 + $0x5] ss:$0 sm:$0xff] }
 0x3c6   :  { %3600 = vmatpush.xpose.msk.msrb.mxu0 %vm115_vm1, %v3582_v32  ;;  %3499 = vmatpush.xpose.msk.msrb.mxu1 %vm115_vm1, %v3479_v1  ;;  %v3695_v32 = vld [vmem:[%s5572_s11 + $0x2] ss:$0 sm:$0xff] }
 0x3c8   :  { %3533 = vmatpush.xpose.msk.msrb.mxu2 %vm115_vm1, %v3513_v2  ;;  %3571 = vmatpush.xpose.msk.msra.mxu3 %vm115_vm1, %v3543_v61  ;;  %v3699_v61 = vld [vmem:[%s5572_s11 + $0x6] ss:$0 sm:$0xff] }
 0x3ca   :  { %3601 = vmatpush.xpose.msk.msrb.mxu0 %vm115_vm1, %v3581_v6  ;;  %3500 = vmatpush.xpose.msk.msrb.mxu1 %vm115_vm1, %v3478_v8  ;;  %v3693_v6 = vld [vmem:[%s5572_s11 + $0x3] ss:$0 sm:$0xff] }
 0x3cc   :  { %3534 = vmatpush.xpose.msk.msrb.mxu2 %vm115_vm1, %v3512_v9  ;;  %3572 = vmatpush.xpose.msk.msra.mxu3 %vm115_vm1, %v3542_v59  ;;  %v3696_v9 = vld [vmem:[%s5572_s11 + $0x4] ss:$0 sm:$0xff] }
 0x3ce   :  { %3602 = vmatpush.xpose.msk.msrb.mxu0 %vm115_vm1, %v3580_v11  ;;  %3501 = vmatpush.xpose.msk.msrb.mxu1 %vm115_vm1, %v3477_v12 }
 0x3d0   :  { %3535 = vmatpush.xpose.msk.msrb.mxu2 %vm115_vm1, %v3511_v13  ;;  %3573 = vmatpush.xpose.msk.msra.mxu3 %vm115_vm1, %v3541_v27 }
 0x3d2   :  { %3603 = vmatpush.xpose.msk.msrb.mxu0 %vm115_vm1, %v3579_v18  ;;  %3502 = vmatpush.xpose.msk.msrb.mxu1 %vm115_vm1, %v3476_v19 }
 0x3d3   :  { %3574 = vmatmul.msk.f32.vlgmr.msra.gmra.mxu3 %vm115_vm1, %v4603_v17 }
 0x3d4   :  { %3536 = vmatpush.xpose.msk.msrb.mxu2 %vm115_vm1, %v3510_v20 }
 0x3d6   :  { %3604 = vmatpush.xpose.msk.msrb.mxu0 %vm115_vm1, %v3578_v54  ;;  %3503 = vmatpush.xpose.msk.msrb.mxu1 %vm115_vm1, %v3475_v22 }
 0x3d8   :  { %3537 = vmatpush.xpose.msk.msrb.mxu2 %vm115_vm1, %v3509_v23 }
 0x3da   :  { %3605 = vmatpush.xpose.msk.msrb.mxu0 %vm115_vm1, %v3577_v41  ;;  %3504 = vmatpush.xpose.msk.msrb.mxu1 %vm115_vm1, %v3474_v24 }
 0x3dc   :  { %3538 = vmatpush.xpose.msk.msrb.mxu2 %vm115_vm1, %v3508_v7  ;;  %v3697_v7 = vld [vmem:[%s5572_s11 + $0x7] ss:$0 sm:$0xff] }
 0x3de   :  { %3606 = vmatpush.xpose.msk.msrb.mxu0 %vm115_vm1, %v3576_v30  ;;  %3505 = vmatpush.xpose.msk.msrb.mxu1 %vm115_vm1, %v3473_v28 }
 0x3e0   :  { %3539 = vmatpush.xpose.msk.msrb.mxu2 %vm115_vm1, %v3507_v5 }
 0x3e1   :  { %3506 = vmatmul.msk.f32.vlgmr.msrb.gmra.mxu1 %vm115_vm1, %v4603_v17 }
 0x3e2   :  { %3607 = vmatpush.xpose.msk.msrb.mxu0 %vm115_vm1, %v3575_v55  ;;  %v3700_v55 = vld [vmem:[%s5572_s11 + $0x8] ss:$0 sm:$0xff] }
 0x3e3   :  { %3540 = vmatmul.msk.f32.vlgmr.msrb.gmra.mxu2 %vm115_vm1, %v4603_v17 }
 0x3e5   :  { %3608 = vmatmul.msk.f32.vlgmr.msrb.gmra.mxu0 %vm115_vm1, %v4603_v17 }
 0x3f8   :  { %v1142_v26 = vpop.xlane.xlu1 %1141 }
 0x3f9   :  { %v1143_v33 = vmul.f32 %v1142_v26, %v4109_v39 }
 0x3fb   :  { %v1144_v34 = vsub.f32 %v5092_v31, %v1143_v33 }
 0x3fd   :  { %v1145_v35 = vmul.f32 %v1144_v34, %v1144_v34 }
 0x3ff   :  { %v1146_v36 = vsel %vm346_vm2, %v1145_v35, 0.0 }
 0x400   :  { %1147 = vadd.xlane.f32.xlu2 %v1146_v36  ;;  %v3702_v36 = vld [vmem:[%s5572_s11 + $0x9] ss:$0 sm:$0xff] }
 0x473   :  { %v1148_v37 = vpop.xlane.xlu2 %1147 }
 0x474   :  { %v1149_v42 = vmul.f32 %v1148_v37, %v4109_v39 }
 0x476   :  { %v1150_v45 = vadd.f32 1e-05, %v1149_v42 }
 0x478   :  { %3726 = vrsqrt.f32 %v1150_v45  ;;  %vm1157_vm8 = vweird.f32 %v1150_v45 }
 0x47e   :  { %v3727_v46 = vpop.eup %3726 }
 0x47f   :  { %v1152_v40 = vmul.f32 %v3727_v46, %v1150_v45  ;;  %vm1158_vm7 = vweird.f32 %v3727_v46 }
 0x480   :  { %vm1159_vm9 = vmor %vm1157_vm8, %vm1158_vm7 }
 0x481   :  { %v1153_v47 = vmul.f32 %v3727_v46, %v1152_v40 }
 0x483   :  { %v1154_v48 = vmul.f32 0.5, %v1153_v47  ;;  %v3703_v47 = vld [vmem:[%s5572_s11 + $0xa] ss:$0 sm:$0xff] }
 0x485   :  { %v1155_v50 = vsub.f32 1.5, %v1154_v48 }
 0x487   :  { %v1156_v17 = vmul.f32 %v3727_v46, %v1155_v50 }
 0x489   :  { %v1160_v62 = vsel %vm1159_vm9, %v3727_v46, %v1156_v17 }
 0x48a   :  { %v1161_v31 = vmul.f32 %v1160_v62, %v1144_v34 }
 0x48c   :  { %3728 = vtanh.f32 %v1161_v31  ;;  %v3701_v31 = vld [vmem:[%s5572_s11 + $0xb] ss:$0 sm:$0xff] }
 0x492   :  { %v3729_v53 = vpop.eup %3728 }
 0x493   :  { %1721 = vperm.xlu1 %3650, %v3729_v53   ;;  %1625 = vperm.xlu2 %3649, %v3729_v53  }
 0x494   :  { %1433 = vperm.xlu0 %3647, %v3729_v53  }
 0x49b   :  { %3654 = vset.pattern.permute.xlu1 %v3762_v44  ;;  %3653 = vset.pattern.permute.xlu2 %v3768_v3  ;;  %v1340_v44 = vpop.f32.mrf.mxu0  ;;  %v1525_v3 = vpop.f32.mrf.mxu2 }
 0x49c   :  { %3648 = vset.pattern.permute.xlu0 %v3758_v29  ;;  %2105 = vperm.xlu1 %3654, %v3729_v53  }
 0x49d   :  { %2009 = vperm.xlu2 %3653, %v3729_v53   ;;  %1529 = vperm.xlu0 %3648, %v3729_v53  }
 0x4a3   :  { %v1717_v57 = vpop.f32.mrf.mxu0  ;;  %v1909_v12 = vpop.f32.mrf.mxu2 }
 0x4a4   :  { %3656 = vset.pattern.permute.xlu1 %v3764_v51  ;;  %v1718_v19 = vadd.f32 %v3693_v6, %v1717_v57  ;;  %v1910_v59 = vadd.f32 %v3698_v21, %v1909_v12 }
 0x4a5   :  { %3655 = vset.pattern.permute.xlu2 %v3770_v15  ;;  %3651 = vset.pattern.permute.xlu0 %v3765_v52  ;;  %v1428_v52 = vpop.f32.mrf.mxu1  ;;  %v1621_v15 = vpop.f32.mrf.mxu3 }
 0x4a6   :  { %2297 = vperm.xlu1 %3656, %v3729_v53   ;;  %2201 = vperm.xlu2 %3655, %v3729_v53   ;;  %v1622_v8 = vadd.f32 %v3695_v32, %v1621_v15 }
 0x4a7   :  { %1817 = vperm.xlu0 %3651, %v3729_v53  }
 0x4ab   :  { %v2101_v22 = vpop.f32.mrf.mxu0  ;;  %v2293_v34 = vpop.f32.mrf.mxu2 }
 0x4ac   :  { %v2102_v35 = vadd.f32 %v3697_v7, %v2101_v22 }
 0x4ad   :  { %v1813_v4 = vpop.f32.mrf.mxu1  ;;  %v2005_v16 = vpop.f32.mrf.mxu3 }
 0x4ae   :  { %3659 = vset.pattern.permute.xlu1 %v3767_v0  ;;  %3658 = vset.pattern.permute.xlu2 %v3771_v25  ;;  %v3694_v0 = vld [vmem:[%s5572_s11 + $0x1] ss:$0 sm:$0xff]  ;;  %v1814_v20 = vadd.f32 %v3696_v9, %v1813_v4  ;;  %v2006_v27 = vadd.f32 %v3699_v61, %v2005_v16 }
 0x4af   :  { %3652 = vset.pattern.permute.xlu0 %v3761_v43  ;;  %2585 = vperm.xlu1 %3659, %v3729_v53   ;;  %v3692_v43 = vld [vmem:[%s5572_s11] ss:$0 sm:$0xff] }
 0x4b0   :  { %2489 = vperm.xlu2 %3658, %v3729_v53   ;;  %1913 = vperm.xlu0 %3652, %v3729_v53  }
 0x4b3   :  { %v2485_v17 = vpop.f32.mrf.mxu0 }
 0x4b5   :  { %v2197_v28 = vpop.f32.mrf.mxu1  ;;  %v2389_v45 = vpop.f32.mrf.mxu3 }
 0x4b6   :  { %v2198_v40 = vadd.f32 %v3700_v55, %v2197_v28 }
 0x4b7   :  { %3661 = vset.pattern.permute.xlu1 %v3769_v14  ;;  %v1429_v14 = vadd.f32 %v3692_v43, %v1428_v52 }
 0x4b8   :  { %3660 = vset.pattern.permute.xlu2 %v3772_v38  ;;  %3657 = vset.pattern.permute.xlu0 %v3763_v49  ;;  %v1526_v38 = vadd.f32 %v3694_v0, %v1525_v3  ;;  %v2486_v3 = vadd.f32 %v3701_v31, %v2485_v17 }
 0x4b9   :  { %2777 = vperm.xlu1 %3661, %v3729_v53   ;;  %2681 = vperm.xlu2 %3660, %v3729_v53  }
 0x4ba   :  { %2393 = vperm.xlu0 %3657, %v3729_v53  }
 0x4bd   :  { %v2581_v0 = vpop.f32.mrf.mxu1 }
 0x4c2   :  { %3662 = vset.pattern.permute.xlu0 %v3766_v63  ;;  %v3691_v63 = vld [vmem:[%s5578_s17] ss:$0 sm:$0xff] }
 0x4c3   :  { %2873 = vperm.xlu0 %3662, %v3729_v53   ;;  %v1341_v60 = vadd.f32 %v3691_v63, %v1340_v44  ;;  %v2294_v53 = vadd.f32 %v3702_v36, %v2293_v34  ;;  %v2390_v44 = vadd.f32 %v3703_v47, %v2389_v45  ;;  %v3706_v63 = vld [vmem:[%s5572_s11 + $0xd] ss:$0 sm:$0xff] }
 0x4ed   :  { %v1626_v39 = vpop.permute.xlu2 %1625 }
 0x4ee   :  { %v1628_v13 = vmul.f32 %v1626_v39, %v1622_v8  ;;  %v2869_v8 = vpop.f32.mrf.mxu0 }
 0x4f7   :  { %v2010_v25 = vpop.permute.xlu2 %2009 }
 0x4f8   :  { %v2012_v37 = vmul.f32 %v2010_v25, %v2006_v27  ;;  %v2677_v25 = vpop.f32.mrf.mxu2 }
 0x500   :  { %v2202_v18 = vpop.permute.xlu2 %2201 }
 0x505   :  { %v1722_v51 = vpop.permute.xlu1 %1721 }
 0x506   :  { %v1434_v29 = vpop.permute.xlu0 %1433  ;;  %v1724_v41 = vmul.f32 %v1722_v51, %v1718_v19  ;;  %v3704_v51 = vld [vmem:[%s5572_s11 + $0xc] ss:$0 sm:$0xff] }
 0x507   :  { %v1436_v56 = vmul.f32 %v1434_v29, %v1429_v14  ;;  %v2204_v29 = vmul.f32 %v2202_v18, %v2198_v40 }
 0x509   :  { %v1437_v2 = vadd.f32 %v1436_v56, %v1341_v60  ;;  %v3707_v56 = vld [vmem:[%s5572_s11 + $0xe] ss:$0 sm:$0xff]  ;;  %v2773_v60 = vpop.f32.mrf.mxu3 }
 0x50a   :  { %v2490_v46 = vpop.permute.xlu2 %2489 }
 0x50b   :  { %v2492_v57 = vmul.f32 %v2490_v46, %v2486_v3 }
 0x50e   :  { %v2106_v58 = vpop.permute.xlu1 %2105 }
 0x50f   :  { %v1530_v49 = vpop.permute.xlu0 %1529  ;;  %v2108_v48 = vmul.f32 %v2106_v58, %v2102_v35 }
 0x510   :  { %v1532_v1 = vmul.f32 %v1530_v49, %v1526_v38  ;;  %v2582_v38 = vadd.f32 %v3704_v51, %v2581_v0 }
 0x512   :  { %v1533_v10 = vadd.f32 %v1532_v1, %v1437_v2  ;;  %v3705_v1 = vld [vmem:[%s5572_s11 + $0xf] ss:$0 sm:$0xff]  ;;  %v2678_v2 = vadd.f32 %v3706_v63, %v2677_v25 }
 0x513   :  { %v2682_v32 = vpop.permute.xlu2 %2681 }
 0x514   :  { %v1629_v54 = vadd.f32 %v1628_v13, %v1533_v10  ;;  %v2774_v10 = vadd.f32 %v3707_v56, %v2773_v60  ;;  %v2870_v13 = vadd.f32 %v3705_v1, %v2869_v8 }
 0x516   :  { %v1725_v30 = vadd.f32 %v1724_v41, %v1629_v54 }
 0x518   :  { %v2298_v23 = vpop.permute.xlu1 %2297 }
 0x519   :  { %v1818_v11 = vpop.permute.xlu0 %1817  ;;  %v2300_v43 = vmul.f32 %v2298_v23, %v2294_v53 }
 0x51a   :  { %v1820_v24 = vmul.f32 %v1818_v11, %v1814_v20  ;;  %v2684_v11 = vmul.f32 %v2682_v32, %v2678_v2 }
 0x51c   :  { %v1821_v26 = vadd.f32 %v1820_v24, %v1725_v30 }
 0x521   :  { %v2586_v62 = vpop.permute.xlu1 %2585 }
 0x522   :  { %v1914_v5 = vpop.permute.xlu0 %1913  ;;  %v2588_v4 = vmul.f32 %v2586_v62, %v2582_v38 }
 0x523   :  { %v1916_v33 = vmul.f32 %v1914_v5, %v1910_v59 }
 0x525   :  { %v1917_v42 = vadd.f32 %v1916_v33, %v1821_v26 }
 0x527   :  { %v2013_v50 = vadd.f32 %v2012_v37, %v1917_v42 }
 0x529   :  { %v2109_v39 = vadd.f32 %v2108_v48, %v2013_v50 }
 0x52b   :  { %v2205_v52 = vadd.f32 %v2204_v29, %v2109_v39  ;;  %v2778_v9 = vpop.permute.xlu1 %2777 }
 0x52c   :  { %v2394_v49 = vpop.permute.xlu0 %2393  ;;  %v2780_v16 = vmul.f32 %v2778_v9, %v2774_v10 }
 0x52d   :  { %v2301_v14 = vadd.f32 %v2300_v43, %v2205_v52  ;;  %v2396_v15 = vmul.f32 %v2394_v49, %v2390_v44 }
 0x52f   :  { %v2397_v58 = vadd.f32 %v2396_v15, %v2301_v14 }
 0x531   :  { %v2493_v6 = vadd.f32 %v2492_v57, %v2397_v58 }
 0x533   :  { %v2589_v12 = vadd.f32 %v2588_v4, %v2493_v6 }
 0x535   :  { %v2685_v18 = vadd.f32 %v2684_v11, %v2589_v12  ;;  %v2874_v19 = vpop.permute.xlu0 %2873 }
 0x536   :  { %v2876_v21 = vmul.f32 %v2874_v19, %v2870_v13 }
 0x537   :  { %v2781_v20 = vadd.f32 %v2780_v16, %v2685_v18 }
 0x539   :  { %v2877_v54 = vadd.f32 %v2876_v21, %v2781_v20 }
 0x53b   :  { %2878 = vst [vmem:[#allocation2] sm:$0xff] %v2877_v54 }
 0x53c   :  { %2889 = dma.vmem_to_hbm [thread:$0]  %s2885_s30, 128, %s2887_s19, [#allocation3]  }
 0x53d   :  { %3754 = dma.done.wait [#allocation3], 128  }
 0x53e   :  { %3755 = vsyncadd [#allocation3], 4294967168 }
 0x53f   :  { %2894 = vsyncpa [#allocation3], 1 }

</bundles_post_ra>
